<compile_context>
chip_gen: v7x
topology: tpu7x:2x2x1
jax: 0.10.0
libtpu: 0.0.40
codegen_flags: <defaults>
</compile_context>

<pallas_src>
import functools

import jax
import jax.numpy as jnp
from jax.experimental import pallas as pl
from jax.experimental.pallas import tpu as pltpu


# ------------------------------ small helpers ----------------------------------


def _round_up(x, m):
    return ((x + m - 1) // m) * m


def _pick_row_tile(m, max_tile=512):
    """Row-tile size: whole array if small; else the largest multiple-of-8 divisor
    of m that is <= max_tile (avoids padding); else max_tile (caller pads)."""
    if m <= max_tile:
        return m
    for t in range(max_tile, 7, -8):
        if m % t == 0:
            return t
    return max_tile


# ------------------------------ Pallas kernels ----------------------------------


def _matmul_bias_kernel(x_ref, w_ref, b_ref, o_ref, *, apply_relu):
    """o = x @ w + b (optional relu). x/w are bf16 tiles, accumulation in f32."""
    acc = jnp.dot(x_ref[...], w_ref[...], preferred_element_type=jnp.float32)
    acc = acc + b_ref[...]                       # (1, Cout) broadcasts over rows
    if apply_relu:
        acc = jnp.maximum(acc, 0.0)
    o_ref[...] = acc.astype(o_ref.dtype)


def _maxpool_relu_kernel(x_ref, o_ref):
    """2x2/stride-2 max pool + relu.

    x_ref block: (tile_p, 2, Q, 2*C) where dim1 = {even,odd} output row of the image
    and the last dim packs the two horizontally-adjacent pixels' channels.
    o_ref block: (tile_p, Q, C).
    """
    c = o_ref.shape[-1]
    x = x_ref[...]
    top = x[:, 0]                                # (tile_p, Q, 2C) even conv row
    bot = x[:, 1]                                # (tile_p, Q, 2C) odd conv row
    hm = jnp.maximum(top, bot)
    m = jnp.maximum(hm[:, :, 0:c], hm[:, :, c:2 * c])
    o_ref[...] = jnp.maximum(m, 0.0).astype(o_ref.dtype)


def _fc_head_kernel(x_ref, w1_ref, b1_ref, w2_ref, b2_ref, o_ref):
    """o = log_softmax(relu(x @ w1 + b1) @ w2 + b2, axis=-1)   (fc1+fc2 fused)."""
    h = jnp.dot(x_ref[...], w1_ref[...], preferred_element_type=jnp.float32)
    h = jnp.maximum(h + b1_ref[...], 0.0)
    # dropout(p=0.5) would go here in training mode (identity in eval).
    logits = jnp.dot(h, w2_ref[...], preferred_element_type=jnp.float32) + b2_ref[...]
    m = jnp.max(logits, axis=-1, keepdims=True)
    s = logits - m
    lse = jnp.log(jnp.sum(jnp.exp(s), axis=-1, keepdims=True))
    o_ref[...] = (s - lse).astype(o_ref.dtype)


# ------------------------------ Pallas wrappers ----------------------------------


_PARALLEL_1D = pltpu.CompilerParams(dimension_semantics=("parallel",))


def _pallas_matmul_bias(x, w, b2d, *, apply_relu, out_dtype=jnp.bfloat16, max_tile=512):
    """o = x @ w + b (+relu).  x:(M,K) bf16, w:(K,N) bf16, b2d:(1,N) f32.  Rows tiled."""
    m, k = x.shape
    _, n = w.shape
    tile = _pick_row_tile(m, max_tile)
    mp = _round_up(m, tile)
    if mp != m:
        x = jnp.pad(x, ((0, mp - m), (0, 0)))
    out = pl.pallas_call(
        functools.partial(_matmul_bias_kernel, apply_relu=apply_relu),
        out_shape=jax.ShapeDtypeStruct((mp, n), out_dtype),
        grid=(mp // tile,),
        in_specs=[
            pl.BlockSpec((tile, k), lambda i: (i, 0)),
            pl.BlockSpec((k, n), lambda i: (0, 0)),      # weight resident across steps
            pl.BlockSpec((1, n), lambda i: (0, 0)),      # bias resident across steps
        ],
        out_specs=pl.BlockSpec((tile, n), lambda i: (i, 0)),
        compiler_params=_PARALLEL_1D,
    )(x, w, b2d)
    return out[:m] if mp != m else out


def _pallas_maxpool_relu(x_nhwc):
    """2x2/stride-2 max pool + relu on NHWC (even H, W). Single-input kernel."""
    n, h, w, c = x_nhwc.shape
    p, q = (n * h) // 2, w // 2
    x4 = x_nhwc.reshape(p, 2, q, 2 * c)          # contiguous reshape -> free
    tile_p = h // 2                              # one image's output rows per grid step
    out = pl.pallas_call(
        _maxpool_relu_kernel,
        out_shape=jax.ShapeDtypeStruct((p, q, c), x_nhwc.dtype),
        grid=(p // tile_p,),
        in_specs=[pl.BlockSpec((tile_p, 2, q, 2 * c), lambda i: (i, 0, 0, 0))],
        out_specs=pl.BlockSpec((tile_p, q, c), lambda i: (i, 0, 0)),
        compiler_params=_PARALLEL_1D,
    )(x4)
    return out.reshape(n, h // 2, w // 2, c)


def _pallas_fc_head(x, w1, b1, w2, b2, max_tile=512):
    """log_softmax(relu(x@w1+b1)@w2+b2).  x:(N,576) bf16; w1 bf16; w2/b* f32."""
    m, kin = x.shape
    n_out = w2.shape[1]
    tile = _pick_row_tile(m, max_tile)
    mp = _round_up(m, tile)
    if mp != m:
        x = jnp.pad(x, ((0, mp - m), (0, 0)))
    out = pl.pallas_call(
        _fc_head_kernel,
        out_shape=jax.ShapeDtypeStruct((mp, n_out), jnp.float32),
        grid=(mp // tile,),
        in_specs=[
            pl.BlockSpec((tile, kin), lambda i: (i, 0)),
            pl.BlockSpec(w1.shape, lambda i: (0, 0)),
            pl.BlockSpec(b1.shape, lambda i: (0, 0)),
            pl.BlockSpec(w2.shape, lambda i: (0, 0)),
            pl.BlockSpec(b2.shape, lambda i: (0, 0)),
        ],
        out_specs=pl.BlockSpec((tile, n_out), lambda i: (i, 0)),
        compiler_params=_PARALLEL_1D,
    )(x, w1, b1, w2, b2)
    return out[:m] if mp != m else out


# ------------------------------- glue (JAX) ------------------------------------


def _im2col(x_nhwc, kh, kw):
    """x: (N, H, W, C) -> patches (N*OH*OW, kh*kw*C), ordered (kh, kw, cin)."""
    n, h, w, c = x_nhwc.shape
    oh, ow = h - kh + 1, w - kw + 1
    cols = []
    for i in range(kh):
        for j in range(kw):
            cols.append(x_nhwc[:, i:i + oh, j:j + ow, :])
    patches = jnp.stack(cols, axis=3)                     # (N, OH, OW, kh*kw, C)
    return patches.reshape(n * oh * ow, kh * kw * c), oh, ow


def _conv2d(x_nhwc, w_mat, b2d, kh, kw, *, apply_relu):
    """Valid 5x5 conv via im2col + tiled Pallas matmul.  w_mat: (kh*kw*Cin, Cout) bf16."""
    n = x_nhwc.shape[0]
    cout = w_mat.shape[1]
    patches, oh, ow = _im2col(x_nhwc.astype(jnp.bfloat16), kh, kw)
    out = _pallas_matmul_bias(patches, w_mat, b2d, apply_relu=apply_relu,
                              out_dtype=jnp.bfloat16)
    return out.reshape(n, oh, ow, cout)


def init_params(key):
    """Deterministic synthetic parameters matching the PyTorch module's shapes (PyTorch layout)."""
    ks = jax.random.split(key, 10)

    def uni(k, shape, fan_in):
        bound = 1.0 / jnp.sqrt(float(fan_in))
        return jax.random.uniform(k, shape, jnp.float32, -bound, bound)

    return {
        "conv1_w": uni(ks[0], (32, 1, 5, 5), 1 * 5 * 5),
        "conv1_b": uni(ks[1], (32,), 1 * 5 * 5),
        "conv2_w": uni(ks[2], (32, 32, 5, 5), 32 * 5 * 5),
        "conv2_b": uni(ks[3], (32,), 32 * 5 * 5),
        "conv3_w": uni(ks[4], (64, 32, 5, 5), 32 * 5 * 5),
        "conv3_b": uni(ks[5], (64,), 32 * 5 * 5),
        "fc1_w": uni(ks[6], (256, 576), 576),   # PyTorch Linear: (out, in)
        "fc1_b": uni(ks[7], (256,), 576),
        "fc2_w": uni(ks[8], (10, 256), 256),
        "fc2_b": uni(ks[9], (10,), 256),
    }


def prepare_params(p):
    """One-time conversion to inference layout: conv weights -> (KH*KW*Cin, Cout) bf16,
    fc weights pre-transposed to (in, out); biases as (1, out) f32.  Done outside jit."""
    def conv_w(w):  # (Cout, Cin, KH, KW) -> (KH*KW*Cin, Cout) matching _im2col ordering
        cout, cin, kh, kw = w.shape
        return jnp.transpose(w, (2, 3, 1, 0)).reshape(kh * kw * cin, cout).astype(jnp.bfloat16)

    return {
        "conv1_w": conv_w(p["conv1_w"]), "conv1_b": p["conv1_b"].reshape(1, -1),
        "conv2_w": conv_w(p["conv2_w"]), "conv2_b": p["conv2_b"].reshape(1, -1),
        "conv3_w": conv_w(p["conv3_w"]), "conv3_b": p["conv3_b"].reshape(1, -1),
        "fc1_w": jnp.transpose(p["fc1_w"]).astype(jnp.bfloat16),   # (576, 256)
        "fc1_b": p["fc1_b"].reshape(1, -1),
        "fc2_w": jnp.transpose(p["fc2_w"]),                        # (256, 10) f32 (small head)
        "fc2_b": p["fc2_b"].reshape(1, -1),
    }


def cnn_forward(ip, x_nchw, eval=True):
    """Forward pass. x_nchw: (N, 1, 28, 28) float32 -> (N, 10) log-probabilities."""
    x = jnp.transpose(x_nchw, (0, 2, 3, 1))                                 # NCHW -> NHWC

    # conv1 -> relu
    x = _conv2d(x, ip["conv1_w"], ip["conv1_b"], 5, 5, apply_relu=True)     # (N,24,24,32)
    # conv2 -> maxpool(2) -> relu
    x = _conv2d(x, ip["conv2_w"], ip["conv2_b"], 5, 5, apply_relu=False)    # (N,20,20,32)
    x = _pallas_maxpool_relu(x)                                             # (N,10,10,32)
    # dropout(p=0.5): identity in eval mode (see TODO at top of file).
    # conv3 -> maxpool(2) -> relu
    x = _conv2d(x, ip["conv3_w"], ip["conv3_b"], 5, 5, apply_relu=False)    # (N,6,6,64)
    x = _pallas_maxpool_relu(x)                                             # (N,3,3,64)
    # dropout(p=0.5): identity in eval mode.

    # Flatten exactly like PyTorch's x.view(-1, 3*3*64): NCHW (C,H,W) ordering.
    n = x.shape[0]
    x = jnp.transpose(x, (0, 3, 1, 2)).reshape(n, 3 * 3 * 64)               # (N, 576)
    x = x.astype(jnp.bfloat16)

    # fc1 -> relu -> (dropout: identity) -> fc2 -> log_softmax, fused in one kernel.
    return _pallas_fc_head(x, ip["fc1_w"], ip["fc1_b"], ip["fc2_w"], ip["fc2_b"])


if __name__ == "__main__":
    key = jax.random.PRNGKey(0)
    pkey, xkey = jax.random.split(key)
    params = init_params(pkey)
    iparams = prepare_params(params)
    # The module's fc1 (3*3*64 inputs) implies a 28x28 single-channel input; use batch=2.
    x = jax.random.normal(xkey, (2, 1, 28, 28), dtype=jnp.float32)

    fwd = jax.jit(lambda p, x: cnn_forward(p, x, eval=True))
    out = jax.block_until_ready(fwd(iparams, x))

    assert out.shape == (2, 10) and out.dtype == jnp.float32
    # log_softmax rows must exponentiate-sum to ~1.
    row_sums = jnp.sum(jnp.exp(out), axis=1)
    assert bool(jnp.all(jnp.abs(row_sums - 1.0) < 1e-3))
    print("KERNEL_OK")
</pallas_src>

<mosaic_0001>
module attributes {stable_mosaic.version = 11 : i64} {
  func.func @_matmul_bias_kernel(%arg0: i32, %arg1: memref<384x25xbf16, #tpu.memory_space<vmem>>, %arg2: memref<25x32xbf16, #tpu.memory_space<vmem>>, %arg3: memref<1x32xf32, #tpu.memory_space<vmem>>, %arg4: memref<384x32xbf16, #tpu.memory_space<vmem>>) attributes {dimension_semantics = [#tpu.dimension_semantics<parallel>], iteration_bounds = array<i64: 3>, scalar_prefetch = 0 : i64, scratch_operands = 0 : i64, tpu.core_type = #tpu.core_type<tc>, window_params = [{transform_indices = @transform_0, window_bounds = array<i64: 384, 25>}, {pipeline_mode = #tpu.pipeline_mode<synchronous>, transform_indices = @transform_1, window_bounds = array<i64: 25, 32>}, {pipeline_mode = #tpu.pipeline_mode<synchronous>, transform_indices = @transform_2, window_bounds = array<i64: 1, 32>}, {transform_indices = @transform_3, window_bounds = array<i64: 384, 32>}]} {
    %c0 = arith.constant 0 : index
    %c0_0 = arith.constant 0 : index
    %0 = vector.load %arg1[%c0, %c0_0] : memref<384x25xbf16, #tpu.memory_space<vmem>>, vector<384x25xbf16>
    %c0_1 = arith.constant 0 : index
    %c0_2 = arith.constant 0 : index
    %1 = vector.load %arg2[%c0_1, %c0_2] : memref<25x32xbf16, #tpu.memory_space<vmem>>, vector<25x32xbf16>
    %cst = arith.constant dense<0.000000e+00> : vector<384x32xf32>
    %2 = tpu.matmul %0, %1, %cst {dimension_numbers = #tpu.dot_dimension_numbers<[1], [0], [0], [1], [0, 0, 1, 1], [], []>} : vector<384x25xbf16>, vector<25x32xbf16>, vector<384x32xf32> -> vector<384x32xf32>
    %c0_3 = arith.constant 0 : index
    %c0_4 = arith.constant 0 : index
    %3 = vector.load %arg3[%c0_3, %c0_4] : memref<1x32xf32, #tpu.memory_space<vmem>>, vector<1x32xf32>
    %4 = vector.broadcast %3 : vector<1x32xf32> to vector<384x32xf32>
    %5 = arith.addf %2, %4 : vector<384x32xf32>
    %cst_5 = arith.constant 0.000000e+00 : f32
    %6 = vector.broadcast %cst_5 : f32 to vector<384x32xf32>
    %7 = arith.maximumf %5, %6 : vector<384x32xf32>
    %8 = arith.truncf %7 : vector<384x32xf32> to vector<384x32xbf16>
    %c0_6 = arith.constant 0 : index
    %c0_7 = arith.constant 0 : index
    %9 = vector.load %arg4[%c0_6, %c0_7] : memref<384x32xbf16, #tpu.memory_space<vmem>>, vector<384x32xbf16>
    tpu.vector_store %arg4[%c0_6, %c0_7], %8 {strides = array<i32>} : memref<384x32xbf16, #tpu.memory_space<vmem>>, vector<384x32xbf16>,
    return
  }
  func.func @transform_0(%arg0: i32) -> (i32, i32) {
    %c0_i32 = arith.constant 0 : i32
    %c0_i32_0 = arith.constant 0 : i32
    return %arg0, %c0_i32 : i32, i32
  }
  func.func @transform_1(%arg0: i32) -> (i32, i32) {
    %c0_i32 = arith.constant 0 : i32
    %c0_i32_0 = arith.constant 0 : i32
    %c0_i32_1 = arith.constant 0 : i32
    return %c0_i32, %c0_i32_0 : i32, i32
  }
  func.func @transform_2(%arg0: i32) -> (i32, i32) {
    %c0_i32 = arith.constant 0 : i32
    %c0_i32_0 = arith.constant 0 : i32
    %c0_i32_1 = arith.constant 0 : i32
    return %c0_i32, %c0_i32_0 : i32, i32
  }
  func.func @transform_3(%arg0: i32) -> (i32, i32) {
    %c0_i32 = arith.constant 0 : i32
    %c0_i32_0 = arith.constant 0 : i32
    return %arg0, %c0_i32 : i32, i32
  }
}

module attributes {stable_mosaic.version = 11 : i64} {
  func.func @_matmul_bias_kernel(%arg0: i32, %arg1: memref<400x800xbf16, #tpu.memory_space<vmem>>, %arg2: memref<800x32xbf16, #tpu.memory_space<vmem>>, %arg3: memref<1x32xf32, #tpu.memory_space<vmem>>, %arg4: memref<400x32xbf16, #tpu.memory_space<vmem>>) attributes {dimension_semantics = [#tpu.dimension_semantics<parallel>], iteration_bounds = array<i64: 2>, scalar_prefetch = 0 : i64, scratch_operands = 0 : i64, tpu.core_type = #tpu.core_type<tc>, window_params = [{transform_indices = @transform_0, window_bounds = array<i64: 400, 800>}, {pipeline_mode = #tpu.pipeline_mode<synchronous>, transform_indices = @transform_1, window_bounds = array<i64: 800, 32>}, {pipeline_mode = #tpu.pipeline_mode<synchronous>, transform_indices = @transform_2, window_bounds = array<i64: 1, 32>}, {transform_indices = @transform_3, window_bounds = array<i64: 400, 32>}]} {
    %c0 = arith.constant 0 : index
    %c0_0 = arith.constant 0 : index
    %0 = vector.load %arg1[%c0, %c0_0] : memref<400x800xbf16, #tpu.memory_space<vmem>>, vector<400x800xbf16>
    %c0_1 = arith.constant 0 : index
    %c0_2 = arith.constant 0 : index
    %1 = vector.load %arg2[%c0_1, %c0_2] : memref<800x32xbf16, #tpu.memory_space<vmem>>, vector<800x32xbf16>
    %cst = arith.constant dense<0.000000e+00> : vector<400x32xf32>
    %2 = tpu.matmul %0, %1, %cst {dimension_numbers = #tpu.dot_dimension_numbers<[1], [0], [0], [1], [0, 0, 1, 1], [], []>} : vector<400x800xbf16>, vector<800x32xbf16>, vector<400x32xf32> -> vector<400x32xf32>
    %c0_3 = arith.constant 0 : index
    %c0_4 = arith.constant 0 : index
    %3 = vector.load %arg3[%c0_3, %c0_4] : memref<1x32xf32, #tpu.memory_space<vmem>>, vector<1x32xf32>
    %4 = vector.broadcast %3 : vector<1x32xf32> to vector<400x32xf32>
    %5 = arith.addf %2, %4 : vector<400x32xf32>
    %6 = arith.truncf %5 : vector<400x32xf32> to vector<400x32xbf16>
    %c0_5 = arith.constant 0 : index
    %c0_6 = arith.constant 0 : index
    %7 = vector.load %arg4[%c0_5, %c0_6] : memref<400x32xbf16, #tpu.memory_space<vmem>>, vector<400x32xbf16>
    tpu.vector_store %arg4[%c0_5, %c0_6], %6 {strides = array<i32>} : memref<400x32xbf16, #tpu.memory_space<vmem>>, vector<400x32xbf16>,
    return
  }
  func.func @transform_0(%arg0: i32) -> (i32, i32) {
    %c0_i32 = arith.constant 0 : i32
    %c0_i32_0 = arith.constant 0 : i32
    return %arg0, %c0_i32 : i32, i32
  }
  func.func @transform_1(%arg0: i32) -> (i32, i32) {
    %c0_i32 = arith.constant 0 : i32
    %c0_i32_0 = arith.constant 0 : i32
    %c0_i32_1 = arith.constant 0 : i32
    return %c0_i32, %c0_i32_0 : i32, i32
  }
  func.func @transform_2(%arg0: i32) -> (i32, i32) {
    %c0_i32 = arith.constant 0 : i32
    %c0_i32_0 = arith.constant 0 : i32
    %c0_i32_1 = arith.constant 0 : i32
    return %c0_i32, %c0_i32_0 : i32, i32
  }
  func.func @transform_3(%arg0: i32) -> (i32, i32) {
    %c0_i32 = arith.constant 0 : i32
    %c0_i32_0 = arith.constant 0 : i32
    return %arg0, %c0_i32 : i32, i32
  }
}

module attributes {stable_mosaic.version = 11 : i64} {
  func.func @_maxpool_relu_kernel(%arg0: i32, %arg1: memref<10x2x10x64xbf16, #tpu.memory_space<vmem>>, %arg2: memref<10x10x32xbf16, #tpu.memory_space<vmem>>) attributes {dimension_semantics = [#tpu.dimension_semantics<parallel>], iteration_bounds = array<i64: 2>, scalar_prefetch = 0 : i64, scratch_operands = 0 : i64, tpu.core_type = #tpu.core_type<tc>, window_params = [{transform_indices = @transform_0, window_bounds = array<i64: 10, 2, 10, 64>}, {transform_indices = @transform_1, window_bounds = array<i64: 10, 10, 32>}]} {
    %c0 = arith.constant 0 : index
    %c0_0 = arith.constant 0 : index
    %c0_1 = arith.constant 0 : index
    %c0_2 = arith.constant 0 : index
    %0 = vector.load %arg1[%c0, %c0_0, %c0_1, %c0_2] : memref<10x2x10x64xbf16, #tpu.memory_space<vmem>>, vector<10x2x10x64xbf16>
    %1 = vector.extract_strided_slice %0 {offsets = [0, 0, 0, 0], sizes = [10, 1, 10, 64], strides = [1, 1, 1, 1]} : vector<10x2x10x64xbf16> to vector<10x1x10x64xbf16>
    %2 = vector.shape_cast %1 : vector<10x1x10x64xbf16> to vector<10x10x64xbf16>
    %3 = vector.extract_strided_slice %0 {offsets = [0, 1, 0, 0], sizes = [10, 1, 10, 64], strides = [1, 1, 1, 1]} : vector<10x2x10x64xbf16> to vector<10x1x10x64xbf16>
    %4 = vector.shape_cast %3 : vector<10x1x10x64xbf16> to vector<10x10x64xbf16>
    %5 = arith.maximumf %2, %4 : vector<10x10x64xbf16>
    %6 = vector.extract_strided_slice %5 {offsets = [0, 0, 0], sizes = [10, 10, 32], strides = [1, 1, 1]} : vector<10x10x64xbf16> to vector<10x10x32xbf16>
    %7 = vector.extract_strided_slice %5 {offsets = [0, 0, 32], sizes = [10, 10, 32], strides = [1, 1, 1]} : vector<10x10x64xbf16> to vector<10x10x32xbf16>
    %8 = arith.maximumf %6, %7 : vector<10x10x32xbf16>
    %cst = arith.constant 0.000000e+00 : bf16
    %9 = vector.broadcast %cst : bf16 to vector<10x10x32xbf16>
    %10 = arith.maximumf %8, %9 : vector<10x10x32xbf16>
    %c0_3 = arith.constant 0 : index
    %c0_4 = arith.constant 0 : index
    %c0_5 = arith.constant 0 : index
    %11 = vector.load %arg2[%c0_3, %c0_4, %c0_5] : memref<10x10x32xbf16, #tpu.memory_space<vmem>>, vector<10x10x32xbf16>
    tpu.vector_store %arg2[%c0_3, %c0_4, %c0_5], %10 {strides = array<i32>} : memref<10x10x32xbf16, #tpu.memory_space<vmem>>, vector<10x10x32xbf16>,
    return
  }
  func.func @transform_0(%arg0: i32) -> (i32, i32, i32, i32) {
    %c0_i32 = arith.constant 0 : i32
    %c0_i32_0 = arith.constant 0 : i32
    %c0_i32_1 = arith.constant 0 : i32
    %c0_i32_2 = arith.constant 0 : i32
    return %arg0, %c0_i32, %c0_i32_0, %c0_i32_1 : i32, i32, i32, i32
  }
  func.func @transform_1(%arg0: i32) -> (i32, i32, i32) {
    %c0_i32 = arith.constant 0 : i32
    %c0_i32_0 = arith.constant 0 : i32
    %c0_i32_1 = arith.constant 0 : i32
    return %arg0, %c0_i32, %c0_i32_0 : i32, i32, i32
  }
}

module attributes {stable_mosaic.version = 11 : i64} {
  func.func @_matmul_bias_kernel(%arg0: i32, %arg1: memref<72x800xbf16, #tpu.memory_space<vmem>>, %arg2: memref<800x64xbf16, #tpu.memory_space<vmem>>, %arg3: memref<1x64xf32, #tpu.memory_space<vmem>>, %arg4: memref<72x64xbf16, #tpu.memory_space<vmem>>) attributes {dimension_semantics = [#tpu.dimension_semantics<parallel>], iteration_bounds = array<i64: 1>, scalar_prefetch = 0 : i64, scratch_operands = 0 : i64, tpu.core_type = #tpu.core_type<tc>, window_params = [{transform_indices = @transform_0, window_bounds = array<i64: 72, 800>}, {pipeline_mode = #tpu.pipeline_mode<synchronous>, transform_indices = @transform_1, window_bounds = array<i64: 800, 64>}, {pipeline_mode = #tpu.pipeline_mode<synchronous>, transform_indices = @transform_2, window_bounds = array<i64: 1, 64>}, {transform_indices = @transform_3, window_bounds = array<i64: 72, 64>}]} {
    %c0 = arith.constant 0 : index
    %c0_0 = arith.constant 0 : index
    %0 = vector.load %arg1[%c0, %c0_0] : memref<72x800xbf16, #tpu.memory_space<vmem>>, vector<72x800xbf16>
    %c0_1 = arith.constant 0 : index
    %c0_2 = arith.constant 0 : index
    %1 = vector.load %arg2[%c0_1, %c0_2] : memref<800x64xbf16, #tpu.memory_space<vmem>>, vector<800x64xbf16>
    %cst = arith.constant dense<0.000000e+00> : vector<72x64xf32>
    %2 = tpu.matmul %0, %1, %cst {dimension_numbers = #tpu.dot_dimension_numbers<[1], [0], [0], [1], [0, 0, 1, 1], [], []>} : vector<72x800xbf16>, vector<800x64xbf16>, vector<72x64xf32> -> vector<72x64xf32>
    %c0_3 = arith.constant 0 : index
    %c0_4 = arith.constant 0 : index
    %3 = vector.load %arg3[%c0_3, %c0_4] : memref<1x64xf32, #tpu.memory_space<vmem>>, vector<1x64xf32>
    %4 = vector.broadcast %3 : vector<1x64xf32> to vector<72x64xf32>
    %5 = arith.addf %2, %4 : vector<72x64xf32>
    %6 = arith.truncf %5 : vector<72x64xf32> to vector<72x64xbf16>
    %c0_5 = arith.constant 0 : index
    %c0_6 = arith.constant 0 : index
    %7 = vector.load %arg4[%c0_5, %c0_6] : memref<72x64xbf16, #tpu.memory_space<vmem>>, vector<72x64xbf16>
    tpu.vector_store %arg4[%c0_5, %c0_6], %6 {strides = array<i32>} : memref<72x64xbf16, #tpu.memory_space<vmem>>, vector<72x64xbf16>,
    return
  }
  func.func @transform_0(%arg0: i32) -> (i32, i32) {
    %c0_i32 = arith.constant 0 : i32
    %c0_i32_0 = arith.constant 0 : i32
    return %arg0, %c0_i32 : i32, i32
  }
  func.func @transform_1(%arg0: i32) -> (i32, i32) {
    %c0_i32 = arith.constant 0 : i32
    %c0_i32_0 = arith.constant 0 : i32
    %c0_i32_1 = arith.constant 0 : i32
    return %c0_i32, %c0_i32_0 : i32, i32
  }
  func.func @transform_2(%arg0: i32) -> (i32, i32) {
    %c0_i32 = arith.constant 0 : i32
    %c0_i32_0 = arith.constant 0 : i32
    %c0_i32_1 = arith.constant 0 : i32
    return %c0_i32, %c0_i32_0 : i32, i32
  }
  func.func @transform_3(%arg0: i32) -> (i32, i32) {
    %c0_i32 = arith.constant 0 : i32
    %c0_i32_0 = arith.constant 0 : i32
    return %arg0, %c0_i32 : i32, i32
  }
}

module attributes {stable_mosaic.version = 11 : i64} {
  func.func @_maxpool_relu_kernel(%arg0: i32, %arg1: memref<3x2x3x128xbf16, #tpu.memory_space<vmem>>, %arg2: memref<3x3x64xbf16, #tpu.memory_space<vmem>>) attributes {dimension_semantics = [#tpu.dimension_semantics<parallel>], iteration_bounds = array<i64: 2>, scalar_prefetch = 0 : i64, scratch_operands = 0 : i64, tpu.core_type = #tpu.core_type<tc>, window_params = [{transform_indices = @transform_0, window_bounds = array<i64: 3, 2, 3, 128>}, {transform_indices = @transform_1, window_bounds = array<i64: 3, 3, 64>}]} {
    %c0 = arith.constant 0 : index
    %c0_0 = arith.constant 0 : index
    %c0_1 = arith.constant 0 : index
    %c0_2 = arith.constant 0 : index
    %0 = vector.load %arg1[%c0, %c0_0, %c0_1, %c0_2] : memref<3x2x3x128xbf16, #tpu.memory_space<vmem>>, vector<3x2x3x128xbf16>
    %1 = vector.extract_strided_slice %0 {offsets = [0, 0, 0, 0], sizes = [3, 1, 3, 128], strides = [1, 1, 1, 1]} : vector<3x2x3x128xbf16> to vector<3x1x3x128xbf16>
    %2 = vector.shape_cast %1 : vector<3x1x3x128xbf16> to vector<3x3x128xbf16>
    %3 = vector.extract_strided_slice %0 {offsets = [0, 1, 0, 0], sizes = [3, 1, 3, 128], strides = [1, 1, 1, 1]} : vector<3x2x3x128xbf16> to vector<3x1x3x128xbf16>
    %4 = vector.shape_cast %3 : vector<3x1x3x128xbf16> to vector<3x3x128xbf16>
    %5 = arith.maximumf %2, %4 : vector<3x3x128xbf16>
    %6 = vector.extract_strided_slice %5 {offsets = [0, 0, 0], sizes = [3, 3, 64], strides = [1, 1, 1]} : vector<3x3x128xbf16> to vector<3x3x64xbf16>
    %7 = vector.extract_strided_slice %5 {offsets = [0, 0, 64], sizes = [3, 3, 64], strides = [1, 1, 1]} : vector<3x3x128xbf16> to vector<3x3x64xbf16>
    %8 = arith.maximumf %6, %7 : vector<3x3x64xbf16>
    %cst = arith.constant 0.000000e+00 : bf16
    %9 = vector.broadcast %cst : bf16 to vector<3x3x64xbf16>
    %10 = arith.maximumf %8, %9 : vector<3x3x64xbf16>
    %c0_3 = arith.constant 0 : index
    %c0_4 = arith.constant 0 : index
    %c0_5 = arith.constant 0 : index
    %11 = vector.load %arg2[%c0_3, %c0_4, %c0_5] : memref<3x3x64xbf16, #tpu.memory_space<vmem>>, vector<3x3x64xbf16>
    tpu.vector_store %arg2[%c0_3, %c0_4, %c0_5], %10 {strides = array<i32>} : memref<3x3x64xbf16, #tpu.memory_space<vmem>>, vector<3x3x64xbf16>,
    return
  }
  func.func @transform_0(%arg0: i32) -> (i32, i32, i32, i32) {
    %c0_i32 = arith.constant 0 : i32
    %c0_i32_0 = arith.constant 0 : i32
    %c0_i32_1 = arith.constant 0 : i32
    %c0_i32_2 = arith.constant 0 : i32
    return %arg0, %c0_i32, %c0_i32_0, %c0_i32_1 : i32, i32, i32, i32
  }
  func.func @transform_1(%arg0: i32) -> (i32, i32, i32) {
    %c0_i32 = arith.constant 0 : i32
    %c0_i32_0 = arith.constant 0 : i32
    %c0_i32_1 = arith.constant 0 : i32
    return %arg0, %c0_i32, %c0_i32_0 : i32, i32, i32
  }
}

module attributes {stable_mosaic.version = 11 : i64} {
  func.func @_fc_head_kernel(%arg0: i32, %arg1: memref<2x576xbf16, #tpu.memory_space<vmem>>, %arg2: memref<576x256xbf16, #tpu.memory_space<vmem>>, %arg3: memref<1x256xf32, #tpu.memory_space<vmem>>, %arg4: memref<256x10xf32, #tpu.memory_space<vmem>>, %arg5: memref<1x10xf32, #tpu.memory_space<vmem>>, %arg6: memref<2x10xf32, #tpu.memory_space<vmem>>) attributes {dimension_semantics = [#tpu.dimension_semantics<parallel>], iteration_bounds = array<i64: 1>, scalar_prefetch = 0 : i64, scratch_operands = 0 : i64, tpu.core_type = #tpu.core_type<tc>, window_params = [{transform_indices = @transform_0, window_bounds = array<i64: 2, 576>}, {pipeline_mode = #tpu.pipeline_mode<synchronous>, transform_indices = @transform_1, window_bounds = array<i64: 576, 256>}, {pipeline_mode = #tpu.pipeline_mode<synchronous>, transform_indices = @transform_2, window_bounds = array<i64: 1, 256>}, {pipeline_mode = #tpu.pipeline_mode<synchronous>, transform_indices = @transform_3, window_bounds = array<i64: 256, 10>}, {pipeline_mode = #tpu.pipeline_mode<synchronous>, transform_indices = @transform_4, window_bounds = array<i64: 1, 10>}, {transform_indices = @transform_5, window_bounds = array<i64: 2, 10>}]} {
    %c0 = arith.constant 0 : index
    %c0_0 = arith.constant 0 : index
    %0 = vector.load %arg1[%c0, %c0_0] : memref<2x576xbf16, #tpu.memory_space<vmem>>, vector<2x576xbf16>
    %c0_1 = arith.constant 0 : index
    %c0_2 = arith.constant 0 : index
    %1 = vector.load %arg2[%c0_1, %c0_2] : memref<576x256xbf16, #tpu.memory_space<vmem>>, vector<576x256xbf16>
    %cst = arith.constant dense<0.000000e+00> : vector<2x256xf32>
    %2 = tpu.matmul %0, %1, %cst {dimension_numbers = #tpu.dot_dimension_numbers<[1], [0], [0], [1], [0, 0, 1, 1], [], []>} : vector<2x576xbf16>, vector<576x256xbf16>, vector<2x256xf32> -> vector<2x256xf32>
    %c0_3 = arith.constant 0 : index
    %c0_4 = arith.constant 0 : index
    %3 = vector.load %arg3[%c0_3, %c0_4] : memref<1x256xf32, #tpu.memory_space<vmem>>, vector<1x256xf32>
    %4 = vector.broadcast %3 : vector<1x256xf32> to vector<2x256xf32>
    %5 = arith.addf %2, %4 : vector<2x256xf32>
    %cst_5 = arith.constant 0.000000e+00 : f32
    %6 = vector.broadcast %cst_5 : f32 to vector<2x256xf32>
    %7 = arith.maximumf %5, %6 : vector<2x256xf32>
    %c0_6 = arith.constant 0 : index
    %c0_7 = arith.constant 0 : index
    %8 = vector.load %arg4[%c0_6, %c0_7] : memref<256x10xf32, #tpu.memory_space<vmem>>, vector<256x10xf32>
    %cst_8 = arith.constant dense<0.000000e+00> : vector<2x10xf32>
    %9 = tpu.matmul %7, %8, %cst_8 {dimension_numbers = #tpu.dot_dimension_numbers<[1], [0], [0], [1], [0, 0, 1, 1], [], []>} : vector<2x256xf32>, vector<256x10xf32>, vector<2x10xf32> -> vector<2x10xf32>
    %c0_9 = arith.constant 0 : index
    %c0_10 = arith.constant 0 : index
    %10 = vector.load %arg5[%c0_9, %c0_10] : memref<1x10xf32, #tpu.memory_space<vmem>>, vector<1x10xf32>
    %11 = vector.broadcast %10 : vector<1x10xf32> to vector<2x10xf32>
    %12 = arith.addf %9, %11 : vector<2x10xf32>
    %cst_11 = arith.constant dense<0xFF800000> : vector<2xf32>
    %13 = vector.multi_reduction <maximumf>, %12, %cst_11 [1] : vector<2x10xf32> to vector<2xf32>
    %14 = vector.shape_cast %13 : vector<2xf32> to vector<2x1xf32>
    %15 = vector.broadcast %14 : vector<2x1xf32> to vector<2x10xf32>
    %16 = arith.subf %12, %15 : vector<2x10xf32>
    %17 = math.exp %16 : vector<2x10xf32>
    %cst_12 = arith.constant dense<0.000000e+00> : vector<2xf32>
    %18 = vector.multi_reduction <add>, %17, %cst_12 [1] : vector<2x10xf32> to vector<2xf32>
    %19 = vector.shape_cast %18 : vector<2xf32> to vector<2x1xf32>
    %20 = math.log %19 : vector<2x1xf32>
    %21 = vector.broadcast %20 : vector<2x1xf32> to vector<2x10xf32>
    %22 = arith.subf %16, %21 : vector<2x10xf32>
    %c0_13 = arith.constant 0 : index
    %c0_14 = arith.constant 0 : index
    %23 = vector.load %arg6[%c0_13, %c0_14] : memref<2x10xf32, #tpu.memory_space<vmem>>, vector<2x10xf32>
    tpu.vector_store %arg6[%c0_13, %c0_14], %22 {strides = array<i32>} : memref<2x10xf32, #tpu.memory_space<vmem>>, vector<2x10xf32>,
    return
  }
  func.func @transform_0(%arg0: i32) -> (i32, i32) {
    %c0_i32 = arith.constant 0 : i32
    %c0_i32_0 = arith.constant 0 : i32
    return %arg0, %c0_i32 : i32, i32
  }
  func.func @transform_1(%arg0: i32) -> (i32, i32) {
    %c0_i32 = arith.constant 0 : i32
    %c0_i32_0 = arith.constant 0 : i32
    %c0_i32_1 = arith.constant 0 : i32
    return %c0_i32, %c0_i32_0 : i32, i32
  }
  func.func @transform_2(%arg0: i32) -> (i32, i32) {
    %c0_i32 = arith.constant 0 : i32
    %c0_i32_0 = arith.constant 0 : i32
    %c0_i32_1 = arith.constant 0 : i32
    return %c0_i32, %c0_i32_0 : i32, i32
  }
  func.func @transform_3(%arg0: i32) -> (i32, i32) {
    %c0_i32 = arith.constant 0 : i32
    %c0_i32_0 = arith.constant 0 : i32
    %c0_i32_1 = arith.constant 0 : i32
    return %c0_i32, %c0_i32_0 : i32, i32
  }
  func.func @transform_4(%arg0: i32) -> (i32, i32) {
    %c0_i32 = arith.constant 0 : i32
    %c0_i32_0 = arith.constant 0 : i32
    %c0_i32_1 = arith.constant 0 : i32
    return %c0_i32, %c0_i32_0 : i32, i32
  }
  func.func @transform_5(%arg0: i32) -> (i32, i32) {
    %c0_i32 = arith.constant 0 : i32
    %c0_i32_0 = arith.constant 0 : i32
    return %arg0, %c0_i32 : i32, i32
  }
}

</mosaic_0001>

<bundles_post_ra>
// kernel: _lambda_.6
= control target key start
LH: loop header
LB: loop body
LE: loop exit
PB: predicated region body
PF: predicated region fallthrough
CT: control target
= control target key end

     0   :  { %8 = vsyncpa [#allocation3], 0  ;;  %s1764_s0 = inlined_call_operand.vmem [shape: bf16[1152,25], index: 0, kind: input, shape index: {}]   ;;  %s1765_s1 = inlined_call_operand.hbm [shape: bf16[25,32], index: 1, kind: input, shape index: {}]   ;;  %s1766_s2 = inlined_call_operand.hbm [shape: f32[1,32], index: 2, kind: input, shape index: {}]   ;;  %s1767_s3 = inlined_call_operand.vmem [shape: bf16[1152,32], index: 3, kind: output, shape index: {}]  }
   0x1   :  { %9 = vsyncpa [#allocation5], 0  ;;  %s1462_s12 = smov 0  }
   0x2 LB: > { %s1065_s13 = sadd.s32 4294967295, %s1435_s12   ;;  %p1067_p0 = scmp.ge.s32.totalorder %s1435_s12, 1  ;;  %s1435_s12 = sphi %s1462_s12, %s15_s12  }
   0x3   : > { %p114_p1 = scmp.lt.s32.totalorder %s1435_s12, 4  ;;  %s1437_s14 = smov [#allocation2]  }
   0x4   : > { %s126_s15 = sshll.u32 %s1437_s14, 4  ;;  %p1476_p3 = scmp.eq.s32.totalorder %s1065_s13, 0  ;;  %s127_s15 = int_to_ptr.vmem [resolvable:$true] %s126_s15 }
   0x5   : > { %p1470_p2 = pnand %p1067_p0, %p114_p1  ;;  %s1438_s18 = smov [#allocation4]  }
   0x6   : > { %s1772_s17 = scalar_select %p1476_p3, 1, 0 }
   0x7   : > { %s1771_s16 = scalar_select %p1470_p2, 1, 0 }
   0x8   : > { %p1315_p4 = pneg %p1470_p2  ;;  %s140_s19 = sshll.u32 %s1438_s18, 4  ;;  %s1488_s19 = int_to_ptr.vmem [resolvable:$true] %s140_s19 }
   0x9   : > { %s1365_s23 = scalar_lea.hbm %s1765_s1, 256 }
   0xa   : > { %p1484_p5 = pnand %p1476_p3, %p1315_p4  ;;  %p1366_p6 = scmp.ne.s32.totalorder %s1765_s1, %s1365_s23 }
   0xb   : > { %p1372_p10 = scmp.lt.u32.totalorder %s1365_s23, %s1765_s1 }
   0xc   : > { %p1367_p7 = pneg %p1484_p5 }
   0xe   : > { %p1368_p8 = pnand %p1367_p7, %p1366_p6 }
  0x10   : > { %p1369_p9 = pneg %p1368_p8 }
  0x12   : > { %p1374_p11 = pnand %p1372_p10, %p1369_p9 }
  0x14   : > { %1377 = shalt.err (!%p1374_p11)
}
  0x15   : > { %s1378_s28 = scalar_lea.vmem %s127_s15, 256  ;;  %p1386_p1 = scmp.lt.s32.totalorder %s127_s15, %s127_s15 }
  0x16   : > { %p1379_p12 = scmp.ne.s32.totalorder %s127_s15, %s1378_s28  ;;  %p1387_p4 = scmp.lt.s32.totalorder %s1378_s28, %s1378_s28 }
  0x18   : > { %p1381_p13 = pnand %p1379_p12, %p1367_p7  ;;  %p1388_p3 = por %p1387_p4, %p1386_p1 }
  0x1a   : > { %p1382_p0 = pneg %p1381_p13 }
  0x1c   : > { %p1389_p2 = pnand %p1388_p3, %p1382_p0 }
  0x1e   : > { %1392 = shalt.err (!%p1389_p2)
}
  0x1f   : > { %s1439_s29 = smov 64   ;;  %s1440_s30 = smov 4  }
  0x20   : > { %1318 = dma.hbm_to_vmem [thread:$0]  (!%p1484_p5), %s1765_s1, 256, %s127_s15, [#allocation3], %s1439_s29, %s1439_s29, %s1440_s30  }
  0x21   : > { %s1393_s8 = scalar_lea.hbm %s1766_s2, 16 }
  0x22   : > { %p1394_p6 = scmp.ne.s32.totalorder %s1766_s2, %s1393_s8  ;;  %p1400_p8 = scmp.lt.u32.totalorder %s1393_s8, %s1766_s2 }
  0x24   : > { %p1396_p2 = pnand %p1394_p6, %p1367_p7 }
  0x26   : > { %p1397_p3 = pneg %p1396_p2 }
  0x28   : > { %p1402_p9 = pnand %p1400_p8, %p1397_p3 }
  0x2a   : > { %1405 = shalt.err (!%p1402_p9)
}
  0x2b   : > { %s1406_s15 = scalar_lea.vmem %s1488_s19, 16  ;;  %s1413_s18 = scalar_lea.vmem %s1488_s19, 32 }
  0x2c   : > { %p1407_p10 = scmp.ne.s32.totalorder %s1488_s19, %s1406_s15  ;;  %p1414_p13 = scmp.lt.s32.totalorder %s1488_s19, %s1488_s19 }
  0x2d   : > { %p1415_p0 = scmp.lt.s32.totalorder %s1413_s18, %s1406_s15 }
  0x2e   : > { %p1409_p11 = pnand %p1407_p10, %p1367_p7 }
  0x2f   : > { %p1416_p1 = por %p1415_p0, %p1414_p13 }
  0x30   : > { %p1410_p12 = pneg %p1409_p11 }
  0x32   : > { %p1417_p4 = pnand %p1416_p1, %p1410_p12 }
  0x34   : > { %1420 = shalt.err (!%p1417_p4)
}
  0x35   : > { %1321 = dma.hbm_to_vmem [thread:$0]  (!%p1484_p5), %s1766_s2, 16, %s1488_s19, [#allocation5]  }
  0x36   : > { %p1774_p6 = scmp.ne.s32.totalorder %s1771_s16, 0 }
  0x37   : > { %p1775_p7 = scmp.ne.s32.totalorder (!%p1774_p6), %s1772_s17, 0 }
  0x38   : > { %162 = sbr.rel (%p1774_p6) target bundleno = 338 (0x152), region = 32 }
  0x3f   : > { %1426 = dma.done.wait (%p1775_p7), [#allocation3], 256  }
  0x40   : > { %1428 = vsyncadd (%p1775_p7), [#allocation3], 4294967040 }
  0x41   : > { %1430 = dma.done.wait (%p1775_p7), [#allocation5], 16  }
  0x42   : > { %1432 = vsyncadd (%p1775_p7), [#allocation5], 4294967280  ;;  %s190_s20 = smul.u32 48, %s1065_s13  ;;  %vm466_vm0 = vcmask 1043456   ;;  %vm467_vm1 = vcmask 1044480   ;;  %v1441_v0 = vmov 65535  }
  0x43   : > { %v468_v1 = vsel %vm466_vm0, 4294967295, %v1441_v0  ;;  %vm393_vm2 = vcmask 203776   ;;  %v1339_v2 = vld [vmem:[#allocation2] sm:$0xff]   ;;  %v1340_v4 = vld [vmem:[#allocation2 + $0x8] sm:$0x1f]   ;;  %vm938_vm3 = vcmask 257024  }
  0x44   : > { %p191_p5 = scmp.lt.s32.totalorder %s190_s20, 143  ;;  %v469_v3 = vsel %vm467_vm1, %v468_v1, 0  ;;  %1251 = vmatprep.subr.bf16.mxu0 %v1339_v2  ;;  %1303 = vmatprep.subr.bf16.mxu1 %v1339_v2  ;;  %v1608_v30 = vld [vmem:[#allocation4] ss:$0 sm:$0xff] }
  0x45   : > { %1252 = vmatpush3.bf16.msra.mxu0 %v1339_v2  ;;  %1305 = vmatpush3.bf16.msra.mxu1 %v1339_v2  ;;  %v471_v6 = vand.u32 %v1340_v4, %v469_v3 }
  0x46   : > { %s1777_s20 = smov (!%p191_p5, %s190_s20), 143 }
  0x47   : > { %s1074_s16 = sshll.u32 %s1777_s20, 2  ;;  %1253 = vmatprep.subr.bf16.mxu0 %v471_v6  ;;  %1304 = vmatprep.subr.bf16.mxu1 %v471_v6 }
  0x48   : > { %s1558_s23 = scalar_lea.vmem %s1764_s0, %s1074_s16  ;;  %s1621_s25 = scalar_lea.vmem %s1767_s3, %s1074_s16 }
  0x49   : > { %v1341_v5 = vld [vmem:[%s1558_s23] sm:$0xff]   ;;  %v1343_v8 = vld [vmem:[%s1558_s23 + $0x8] sm:$0xff]   ;;  %v1345_v10 = vld [vmem:[%s1558_s23 + $0x10] sm:$0xff]   ;;  %1254 = vmatpush3.bf16.msra.mxu0 %v471_v6  ;;  %1306 = vmatpush3.bf16.msra.mxu1 %v471_v6 }
  0x4a   : > { %v1342_v7 = vld [vmem:[%s1558_s23 + $0x60] sm:$0xff]   ;;  %1255 = vmatprep.mubr.msk.bf16.mxu0 %vm393_vm2, %v1341_v5  ;;  %v1344_v9 = vld [vmem:[%s1558_s23 + $0x68] sm:$0xff]   ;;  %v1346_v11 = vld [vmem:[%s1558_s23 + $0x70] sm:$0xff]  }
  0x4b   : > { %1279 = vmatprep.mubr.msk.bf16.mxu1 %vm393_vm2, %v1342_v7  ;;  %v1347_v12 = vld [vmem:[%s1558_s23 + $0x18] sm:$0xff]   ;;  %v1349_v14 = vld [vmem:[%s1558_s23 + $0x20] sm:$0xff]   ;;  %v1351_v16 = vld [vmem:[%s1558_s23 + $0x28] sm:$0xff]  }
  0x4c   : > { %1256 = vmatmul.mubr.msk.bf16.vlgmr.msra.gmra.mrb[0].mxu0 %vm393_vm2, %v1343_v8  ;;  %1280 = vmatmul.mubr.msk.bf16.vlgmr.msra.gmra.mrb[0].mxu1 %vm393_vm2, %v1344_v9  ;;  %v1348_v13 = vld [vmem:[%s1558_s23 + $0x78] sm:$0xff]   ;;  %v1350_v15 = vld [vmem:[%s1558_s23 + $0x80] sm:$0xff]   ;;  %v1352_v17 = vld [vmem:[%s1558_s23 + $0x88] sm:$0xff]  }
  0x4d   : > { %1259 = vmatprep.mubr.msk.bf16.mxu0 %vm393_vm2, %v1345_v10  ;;  %1283 = vmatprep.mubr.msk.bf16.mxu1 %vm393_vm2, %v1346_v11  ;;  %v1353_v18 = vld [vmem:[%s1558_s23 + $0x30] sm:$0xff]   ;;  %v1355_v20 = vld [vmem:[%s1558_s23 + $0x38] sm:$0xff]   ;;  %v1357_v22 = vld [vmem:[%s1558_s23 + $0x40] sm:$0xff]  }
  0x4e   : > { %v1354_v19 = vld [vmem:[%s1558_s23 + $0x90] sm:$0xff]   ;;  %v1356_v21 = vld [vmem:[%s1558_s23 + $0x98] sm:$0xff]   ;;  %v1358_v23 = vld [vmem:[%s1558_s23 + $0xa0] sm:$0xff]  }
  0x4f   : > { %v1359_v24 = vld [vmem:[%s1558_s23 + $0x48] sm:$0xff]   ;;  %v1361_v26 = vld [vmem:[%s1558_s23 + $0x50] sm:$0xff]   ;;  %v1363_v28 = vld [vmem:[%s1558_s23 + $0x58] sm:$0xff]  }
  0x50   : > { %v1360_v25 = vld [vmem:[%s1558_s23 + $0xa8] sm:$0xff]   ;;  %v1362_v27 = vld [vmem:[%s1558_s23 + $0xb0] sm:$0xff]   ;;  %v1364_v29 = vld [vmem:[%s1558_s23 + $0xb8] sm:$0xff]  }
  0x54   : > { %1260 = vmatmul.mubr.msk.bf16.gmra.mrb[4].mxu0 %vm393_vm2, %v1347_v12  ;;  %1284 = vmatmul.mubr.msk.bf16.gmra.mrb[4].mxu1 %vm393_vm2, %v1348_v13 }
  0x55   : > { %1263 = vmatprep.mubr.msk.bf16.mxu0 %vm393_vm2, %v1349_v14  ;;  %1287 = vmatprep.mubr.msk.bf16.mxu1 %vm393_vm2, %v1350_v15 }
  0x5c   : > { %1264 = vmatmul.mubr.msk.bf16.gmra.mrb[8].mxu0 %vm393_vm2, %v1351_v16  ;;  %1288 = vmatmul.mubr.msk.bf16.gmra.mrb[8].mxu1 %vm393_vm2, %v1352_v17 }
  0x5d   : > { %1267 = vmatprep.mubr.msk.bf16.mxu0 %vm393_vm2, %v1353_v18  ;;  %1291 = vmatprep.mubr.msk.bf16.mxu1 %vm393_vm2, %v1354_v19 }
  0x64   : > { %1268 = vmatmul.mubr.msk.bf16.gmra.mrb[12].mxu0 %vm393_vm2, %v1355_v20  ;;  %1292 = vmatmul.mubr.msk.bf16.gmra.mrb[12].mxu1 %vm393_vm2, %v1356_v21 }
  0x65   : > { %1271 = vmatprep.mubr.msk.bf16.mxu0 %vm393_vm2, %v1357_v22  ;;  %1295 = vmatprep.mubr.msk.bf16.mxu1 %vm393_vm2, %v1358_v23 }
  0x6c   : > { %1272 = vmatmul.mubr.msk.bf16.gmra.mrb[16].mxu0 %vm393_vm2, %v1359_v24  ;;  %1296 = vmatmul.mubr.msk.bf16.gmra.mrb[16].mxu1 %vm393_vm2, %v1360_v25 }
  0x6d   : > { %1275 = vmatprep.mubr.msk.bf16.mxu0 %vm393_vm2, %v1361_v26  ;;  %1299 = vmatprep.mubr.msk.bf16.mxu1 %vm393_vm2, %v1362_v27 }
  0x74   : > { %1276 = vmatmul.mubr.msk.bf16.gmra.mrb[20].mxu0 %vm393_vm2, %v1363_v28  ;;  %1300 = vmatmul.mubr.msk.bf16.gmra.mrb[20].mxu1 %vm393_vm2, %v1364_v29 }
 0x11f   : > { %v1257_v31 = vpop.f32.mrb[0].mxu0  ;;  %v1281_v32 = vpop.f32.mrb[0].mxu1 }
 0x120   : > { %v516_v33 = vadd.f32 %v1257_v31, %v1608_v30  ;;  %v612_v34 = vadd.f32 %v1281_v32, %v1608_v30  ;;  %v507_v35 = vpop.f32.mrb[1].mxu0  ;;  %v603_v36 = vpop.f32.mrb[1].mxu1 }
 0x121   : > { %v508_v37 = vadd.f32 %v1608_v30, %v507_v35  ;;  %v604_v38 = vadd.f32 %v1608_v30, %v603_v36  ;;  %v1258_v39 = vpop.f32.mrb[2].mxu0  ;;  %v1282_v40 = vpop.f32.mrb[2].mxu1 }
 0x122   : > { %v700_v41 = vmax.f32 %v516_v33, 0.0  ;;  %v724_v42 = vmax.f32 %v612_v34, 0.0  ;;  %v519_v43 = vadd.f32 %v1258_v39, %v1608_v30  ;;  %v615_v44 = vadd.f32 %v1282_v40, %v1608_v30  ;;  %v510_v45 = vpop.f32.mrb[3].mxu0  ;;  %v606_v46 = vpop.f32.mrb[3].mxu1 }
 0x123   : > { %v698_v47 = vmax.f32 %v508_v37, 0.0  ;;  %v722_v48 = vmax.f32 %v604_v38, 0.0  ;;  %v511_v49 = vadd.f32 %v1608_v30, %v510_v45  ;;  %v607_v50 = vadd.f32 %v1608_v30, %v606_v46 }
 0x124   : > { %v1179_v51 = vpack.c.bf16 %v700_v41, %v700_v41  ;;  %v1203_v52 = vpack.c.bf16 %v724_v42, %v724_v42  ;;  %v701_v53 = vmax.f32 %v519_v43, 0.0  ;;  %v725_v54 = vmax.f32 %v615_v44, 0.0 }
 0x125   : > { %v1177_v55 = vpack.c.bf16 %v698_v47, %v698_v47  ;;  %v1201_v56 = vpack.c.bf16 %v722_v48, %v722_v48  ;;  %v699_v57 = vmax.f32 %v511_v49, 0.0  ;;  %v723_v58 = vmax.f32 %v607_v50, 0.0 }
 0x126   : > { %941 = vst.msk [vmem:[%s1621_s25 + $0x8] sm:$0xf] %vm938_vm3, %v1179_v51  ;;  %965 = vst.msk [vmem:[%s1621_s25 + $0x68] sm:$0xf] %vm938_vm3, %v1203_v52  ;;  %v1180_v59 = vpack.c.bf16 %v701_v53, %v701_v53  ;;  %v1204_v60 = vpack.c.bf16 %v725_v54, %v725_v54 }
 0x127   : > { %939 = vst.msk [vmem:[%s1621_s25] sm:$0xf] %vm938_vm3, %v1177_v55  ;;  %963 = vst.msk [vmem:[%s1621_s25 + $0x60] sm:$0xf] %vm938_vm3, %v1201_v56  ;;  %v1178_v61 = vpack.c.bf16 %v699_v57, %v699_v57  ;;  %v1202_v62 = vpack.c.bf16 %v723_v58, %v723_v58  ;;  %v1261_v63 = vpop.f32.mrb[4].mxu0  ;;  %v1285_v0 = vpop.f32.mrb[4].mxu1 }
 0x128   : > { %942 = vst.msk [vmem:[%s1621_s25 + $0xc] sm:$0xf] %vm938_vm3, %v1180_v59  ;;  %966 = vst.msk [vmem:[%s1621_s25 + $0x6c] sm:$0xf] %vm938_vm3, %v1204_v60  ;;  %v532_v1 = vadd.f32 %v1261_v63, %v1608_v30  ;;  %v628_v2 = vadd.f32 %v1285_v0, %v1608_v30  ;;  %v523_v3 = vpop.f32.mrb[5].mxu0  ;;  %v619_v4 = vpop.f32.mrb[5].mxu1 }
 0x129   : > { %940 = vst.msk [vmem:[%s1621_s25 + $0x4] sm:$0xf] %vm938_vm3, %v1178_v61  ;;  %964 = vst.msk [vmem:[%s1621_s25 + $0x64] sm:$0xf] %vm938_vm3, %v1202_v62  ;;  %v524_v5 = vadd.f32 %v1608_v30, %v523_v3  ;;  %v620_v6 = vadd.f32 %v1608_v30, %v619_v4  ;;  %v1262_v7 = vpop.f32.mrb[6].mxu0  ;;  %v1286_v8 = vpop.f32.mrb[6].mxu1 }
 0x12a   : > { %v704_v9 = vmax.f32 %v532_v1, 0.0  ;;  %v728_v10 = vmax.f32 %v628_v2, 0.0  ;;  %v535_v11 = vadd.f32 %v1262_v7, %v1608_v30  ;;  %v631_v12 = vadd.f32 %v1286_v8, %v1608_v30  ;;  %v526_v13 = vpop.f32.mrb[7].mxu0  ;;  %v622_v14 = vpop.f32.mrb[7].mxu1 }
 0x12b   : > { %v702_v15 = vmax.f32 %v524_v5, 0.0  ;;  %v726_v16 = vmax.f32 %v620_v6, 0.0  ;;  %v527_v17 = vadd.f32 %v1608_v30, %v526_v13  ;;  %v623_v18 = vadd.f32 %v1608_v30, %v622_v14 }
 0x12c   : > { %v1183_v19 = vpack.c.bf16 %v704_v9, %v704_v9  ;;  %v1207_v20 = vpack.c.bf16 %v728_v10, %v728_v10  ;;  %v705_v21 = vmax.f32 %v535_v11, 0.0  ;;  %v729_v22 = vmax.f32 %v631_v12, 0.0 }
 0x12d   : > { %v1181_v23 = vpack.c.bf16 %v702_v15, %v702_v15  ;;  %v1205_v24 = vpack.c.bf16 %v726_v16, %v726_v16  ;;  %v703_v25 = vmax.f32 %v527_v17, 0.0  ;;  %v727_v26 = vmax.f32 %v623_v18, 0.0 }
 0x12e   : > { %945 = vst.msk [vmem:[%s1621_s25 + $0x18] sm:$0xf] %vm938_vm3, %v1183_v19  ;;  %969 = vst.msk [vmem:[%s1621_s25 + $0x78] sm:$0xf] %vm938_vm3, %v1207_v20  ;;  %v1184_v27 = vpack.c.bf16 %v705_v21, %v705_v21  ;;  %v1208_v28 = vpack.c.bf16 %v729_v22, %v729_v22 }
 0x12f   : > { %943 = vst.msk [vmem:[%s1621_s25 + $0x10] sm:$0xf] %vm938_vm3, %v1181_v23  ;;  %967 = vst.msk [vmem:[%s1621_s25 + $0x70] sm:$0xf] %vm938_vm3, %v1205_v24  ;;  %v1182_v29 = vpack.c.bf16 %v703_v25, %v703_v25  ;;  %v1206_v31 = vpack.c.bf16 %v727_v26, %v727_v26  ;;  %v1265_v32 = vpop.f32.mrb[8].mxu0  ;;  %v1289_v33 = vpop.f32.mrb[8].mxu1 }
 0x130   : > { %946 = vst.msk [vmem:[%s1621_s25 + $0x1c] sm:$0xf] %vm938_vm3, %v1184_v27  ;;  %970 = vst.msk [vmem:[%s1621_s25 + $0x7c] sm:$0xf] %vm938_vm3, %v1208_v28  ;;  %v548_v34 = vadd.f32 %v1265_v32, %v1608_v30  ;;  %v644_v35 = vadd.f32 %v1289_v33, %v1608_v30  ;;  %v539_v36 = vpop.f32.mrb[9].mxu0  ;;  %v635_v37 = vpop.f32.mrb[9].mxu1 }
 0x131   : > { %944 = vst.msk [vmem:[%s1621_s25 + $0x14] sm:$0xf] %vm938_vm3, %v1182_v29  ;;  %968 = vst.msk [vmem:[%s1621_s25 + $0x74] sm:$0xf] %vm938_vm3, %v1206_v31  ;;  %v540_v38 = vadd.f32 %v1608_v30, %v539_v36  ;;  %v636_v39 = vadd.f32 %v1608_v30, %v635_v37  ;;  %v1266_v40 = vpop.f32.mrb[10].mxu0  ;;  %v1290_v41 = vpop.f32.mrb[10].mxu1 }
 0x132   : > { %v708_v42 = vmax.f32 %v548_v34, 0.0  ;;  %v732_v43 = vmax.f32 %v644_v35, 0.0  ;;  %v551_v44 = vadd.f32 %v1266_v40, %v1608_v30  ;;  %v647_v45 = vadd.f32 %v1290_v41, %v1608_v30  ;;  %v542_v46 = vpop.f32.mrb[11].mxu0  ;;  %v638_v47 = vpop.f32.mrb[11].mxu1 }
 0x133   : > { %v706_v48 = vmax.f32 %v540_v38, 0.0  ;;  %v730_v49 = vmax.f32 %v636_v39, 0.0  ;;  %v543_v50 = vadd.f32 %v1608_v30, %v542_v46  ;;  %v639_v51 = vadd.f32 %v1608_v30, %v638_v47 }
 0x134   : > { %v1187_v52 = vpack.c.bf16 %v708_v42, %v708_v42  ;;  %v1211_v53 = vpack.c.bf16 %v732_v43, %v732_v43  ;;  %v709_v54 = vmax.f32 %v551_v44, 0.0  ;;  %v733_v55 = vmax.f32 %v647_v45, 0.0 }
 0x135   : > { %v1185_v56 = vpack.c.bf16 %v706_v48, %v706_v48  ;;  %v1209_v57 = vpack.c.bf16 %v730_v49, %v730_v49  ;;  %v707_v58 = vmax.f32 %v543_v50, 0.0  ;;  %v731_v59 = vmax.f32 %v639_v51, 0.0 }
 0x136   : > { %949 = vst.msk [vmem:[%s1621_s25 + $0x28] sm:$0xf] %vm938_vm3, %v1187_v52  ;;  %973 = vst.msk [vmem:[%s1621_s25 + $0x88] sm:$0xf] %vm938_vm3, %v1211_v53  ;;  %v1188_v60 = vpack.c.bf16 %v709_v54, %v709_v54  ;;  %v1212_v61 = vpack.c.bf16 %v733_v55, %v733_v55 }
 0x137   : > { %947 = vst.msk [vmem:[%s1621_s25 + $0x20] sm:$0xf] %vm938_vm3, %v1185_v56  ;;  %971 = vst.msk [vmem:[%s1621_s25 + $0x80] sm:$0xf] %vm938_vm3, %v1209_v57  ;;  %v1186_v62 = vpack.c.bf16 %v707_v58, %v707_v58  ;;  %v1210_v63 = vpack.c.bf16 %v731_v59, %v731_v59  ;;  %v1269_v0 = vpop.f32.mrb[12].mxu0  ;;  %v1293_v1 = vpop.f32.mrb[12].mxu1 }
 0x138   : > { %950 = vst.msk [vmem:[%s1621_s25 + $0x2c] sm:$0xf] %vm938_vm3, %v1188_v60  ;;  %974 = vst.msk [vmem:[%s1621_s25 + $0x8c] sm:$0xf] %vm938_vm3, %v1212_v61  ;;  %v564_v2 = vadd.f32 %v1269_v0, %v1608_v30  ;;  %v660_v3 = vadd.f32 %v1293_v1, %v1608_v30  ;;  %v555_v4 = vpop.f32.mrb[13].mxu0  ;;  %v651_v5 = vpop.f32.mrb[13].mxu1 }
 0x139   : > { %948 = vst.msk [vmem:[%s1621_s25 + $0x24] sm:$0xf] %vm938_vm3, %v1186_v62  ;;  %972 = vst.msk [vmem:[%s1621_s25 + $0x84] sm:$0xf] %vm938_vm3, %v1210_v63  ;;  %v556_v6 = vadd.f32 %v1608_v30, %v555_v4  ;;  %v652_v7 = vadd.f32 %v1608_v30, %v651_v5  ;;  %v1270_v8 = vpop.f32.mrb[14].mxu0  ;;  %v1294_v9 = vpop.f32.mrb[14].mxu1 }
 0x13a   : > { %v712_v10 = vmax.f32 %v564_v2, 0.0  ;;  %v736_v11 = vmax.f32 %v660_v3, 0.0  ;;  %v567_v12 = vadd.f32 %v1270_v8, %v1608_v30  ;;  %v663_v13 = vadd.f32 %v1294_v9, %v1608_v30  ;;  %v558_v14 = vpop.f32.mrb[15].mxu0  ;;  %v654_v15 = vpop.f32.mrb[15].mxu1 }
 0x13b   : > { %v710_v16 = vmax.f32 %v556_v6, 0.0  ;;  %v734_v17 = vmax.f32 %v652_v7, 0.0  ;;  %v559_v18 = vadd.f32 %v1608_v30, %v558_v14  ;;  %v655_v19 = vadd.f32 %v1608_v30, %v654_v15 }
 0x13c   : > { %v1191_v20 = vpack.c.bf16 %v712_v10, %v712_v10  ;;  %v1215_v21 = vpack.c.bf16 %v736_v11, %v736_v11  ;;  %v713_v22 = vmax.f32 %v567_v12, 0.0  ;;  %v737_v23 = vmax.f32 %v663_v13, 0.0 }
 0x13d   : > { %v1189_v24 = vpack.c.bf16 %v710_v16, %v710_v16  ;;  %v1213_v25 = vpack.c.bf16 %v734_v17, %v734_v17  ;;  %v711_v26 = vmax.f32 %v559_v18, 0.0  ;;  %v735_v27 = vmax.f32 %v655_v19, 0.0 }
 0x13e   : > { %953 = vst.msk [vmem:[%s1621_s25 + $0x38] sm:$0xf] %vm938_vm3, %v1191_v20  ;;  %977 = vst.msk [vmem:[%s1621_s25 + $0x98] sm:$0xf] %vm938_vm3, %v1215_v21  ;;  %v1192_v28 = vpack.c.bf16 %v713_v22, %v713_v22  ;;  %v1216_v29 = vpack.c.bf16 %v737_v23, %v737_v23 }
 0x13f   : > { %951 = vst.msk [vmem:[%s1621_s25 + $0x30] sm:$0xf] %vm938_vm3, %v1189_v24  ;;  %975 = vst.msk [vmem:[%s1621_s25 + $0x90] sm:$0xf] %vm938_vm3, %v1213_v25  ;;  %v1190_v31 = vpack.c.bf16 %v711_v26, %v711_v26  ;;  %v1214_v32 = vpack.c.bf16 %v735_v27, %v735_v27  ;;  %v1273_v33 = vpop.f32.mrb[16].mxu0  ;;  %v1297_v34 = vpop.f32.mrb[16].mxu1 }
 0x140   : > { %954 = vst.msk [vmem:[%s1621_s25 + $0x3c] sm:$0xf] %vm938_vm3, %v1192_v28  ;;  %978 = vst.msk [vmem:[%s1621_s25 + $0x9c] sm:$0xf] %vm938_vm3, %v1216_v29  ;;  %v580_v35 = vadd.f32 %v1273_v33, %v1608_v30  ;;  %v676_v36 = vadd.f32 %v1297_v34, %v1608_v30  ;;  %v571_v37 = vpop.f32.mrb[17].mxu0  ;;  %v667_v38 = vpop.f32.mrb[17].mxu1 }
 0x141   : > { %952 = vst.msk [vmem:[%s1621_s25 + $0x34] sm:$0xf] %vm938_vm3, %v1190_v31  ;;  %976 = vst.msk [vmem:[%s1621_s25 + $0x94] sm:$0xf] %vm938_vm3, %v1214_v32  ;;  %v572_v39 = vadd.f32 %v1608_v30, %v571_v37  ;;  %v668_v40 = vadd.f32 %v1608_v30, %v667_v38  ;;  %v1274_v41 = vpop.f32.mrb[18].mxu0  ;;  %v1298_v42 = vpop.f32.mrb[18].mxu1 }
 0x142   : > { %v716_v43 = vmax.f32 %v580_v35, 0.0  ;;  %v740_v44 = vmax.f32 %v676_v36, 0.0  ;;  %v583_v45 = vadd.f32 %v1274_v41, %v1608_v30  ;;  %v679_v46 = vadd.f32 %v1298_v42, %v1608_v30  ;;  %v574_v47 = vpop.f32.mrb[19].mxu0  ;;  %v670_v48 = vpop.f32.mrb[19].mxu1 }
 0x143   : > { %v714_v49 = vmax.f32 %v572_v39, 0.0  ;;  %v738_v50 = vmax.f32 %v668_v40, 0.0  ;;  %v575_v51 = vadd.f32 %v1608_v30, %v574_v47  ;;  %v671_v52 = vadd.f32 %v1608_v30, %v670_v48 }
 0x144   : > { %v1195_v53 = vpack.c.bf16 %v716_v43, %v716_v43  ;;  %v1219_v54 = vpack.c.bf16 %v740_v44, %v740_v44  ;;  %v717_v55 = vmax.f32 %v583_v45, 0.0  ;;  %v741_v56 = vmax.f32 %v679_v46, 0.0 }
 0x145   : > { %v1193_v57 = vpack.c.bf16 %v714_v49, %v714_v49  ;;  %v1217_v58 = vpack.c.bf16 %v738_v50, %v738_v50  ;;  %v715_v59 = vmax.f32 %v575_v51, 0.0  ;;  %v739_v60 = vmax.f32 %v671_v52, 0.0 }
 0x146   : > { %957 = vst.msk [vmem:[%s1621_s25 + $0x48] sm:$0xf] %vm938_vm3, %v1195_v53  ;;  %981 = vst.msk [vmem:[%s1621_s25 + $0xa8] sm:$0xf] %vm938_vm3, %v1219_v54  ;;  %v1196_v61 = vpack.c.bf16 %v717_v55, %v717_v55  ;;  %v1220_v62 = vpack.c.bf16 %v741_v56, %v741_v56 }
 0x147   : > { %955 = vst.msk [vmem:[%s1621_s25 + $0x40] sm:$0xf] %vm938_vm3, %v1193_v57  ;;  %979 = vst.msk [vmem:[%s1621_s25 + $0xa0] sm:$0xf] %vm938_vm3, %v1217_v58  ;;  %v1194_v63 = vpack.c.bf16 %v715_v59, %v715_v59  ;;  %v1218_v0 = vpack.c.bf16 %v739_v60, %v739_v60  ;;  %v1277_v1 = vpop.f32.mrb[20].mxu0  ;;  %v1301_v2 = vpop.f32.mrb[20].mxu1 }
 0x148   : > { %958 = vst.msk [vmem:[%s1621_s25 + $0x4c] sm:$0xf] %vm938_vm3, %v1196_v61  ;;  %982 = vst.msk [vmem:[%s1621_s25 + $0xac] sm:$0xf] %vm938_vm3, %v1220_v62  ;;  %v596_v3 = vadd.f32 %v1277_v1, %v1608_v30  ;;  %v692_v4 = vadd.f32 %v1301_v2, %v1608_v30  ;;  %v587_v5 = vpop.f32.mrb[21].mxu0  ;;  %v683_v6 = vpop.f32.mrb[21].mxu1 }
 0x149   : > { %956 = vst.msk [vmem:[%s1621_s25 + $0x44] sm:$0xf] %vm938_vm3, %v1194_v63  ;;  %980 = vst.msk [vmem:[%s1621_s25 + $0xa4] sm:$0xf] %vm938_vm3, %v1218_v0  ;;  %v588_v7 = vadd.f32 %v1608_v30, %v587_v5  ;;  %v684_v8 = vadd.f32 %v1608_v30, %v683_v6  ;;  %v1278_v9 = vpop.f32.mrb[22].mxu0  ;;  %v1302_v10 = vpop.f32.mrb[22].mxu1 }
 0x14a   : > { %v720_v11 = vmax.f32 %v596_v3, 0.0  ;;  %v744_v12 = vmax.f32 %v692_v4, 0.0  ;;  %v599_v13 = vadd.f32 %v1278_v9, %v1608_v30  ;;  %v695_v14 = vadd.f32 %v1302_v10, %v1608_v30  ;;  %v590_v15 = vpop.f32.mrb[23].mxu0  ;;  %v686_v16 = vpop.f32.mrb[23].mxu1 }
 0x14b   : > { %v718_v17 = vmax.f32 %v588_v7, 0.0  ;;  %v742_v18 = vmax.f32 %v684_v8, 0.0  ;;  %v591_v19 = vadd.f32 %v1608_v30, %v590_v15  ;;  %v687_v20 = vadd.f32 %v1608_v30, %v686_v16 }
 0x14c   : > { %v1199_v21 = vpack.c.bf16 %v720_v11, %v720_v11  ;;  %v1223_v22 = vpack.c.bf16 %v744_v12, %v744_v12  ;;  %v721_v23 = vmax.f32 %v599_v13, 0.0  ;;  %v745_v24 = vmax.f32 %v695_v14, 0.0 }
 0x14d   : > { %v1197_v25 = vpack.c.bf16 %v718_v17, %v718_v17  ;;  %v1221_v26 = vpack.c.bf16 %v742_v18, %v742_v18  ;;  %v719_v27 = vmax.f32 %v591_v19, 0.0  ;;  %v743_v28 = vmax.f32 %v687_v20, 0.0 }
 0x14e   : > { %961 = vst.msk [vmem:[%s1621_s25 + $0x58] sm:$0xf] %vm938_vm3, %v1199_v21  ;;  %985 = vst.msk [vmem:[%s1621_s25 + $0xb8] sm:$0xf] %vm938_vm3, %v1223_v22  ;;  %v1200_v29 = vpack.c.bf16 %v721_v23, %v721_v23  ;;  %v1224_v31 = vpack.c.bf16 %v745_v24, %v745_v24 }
 0x14f   : > { %959 = vst.msk [vmem:[%s1621_s25 + $0x50] sm:$0xf] %vm938_vm3, %v1197_v25  ;;  %983 = vst.msk [vmem:[%s1621_s25 + $0xb0] sm:$0xf] %vm938_vm3, %v1221_v26  ;;  %v1198_v30 = vpack.c.bf16 %v719_v27, %v719_v27  ;;  %v1222_v32 = vpack.c.bf16 %v743_v28, %v743_v28 }
 0x150   : > { %962 = vst.msk [vmem:[%s1621_s25 + $0x5c] sm:$0xf] %vm938_vm3, %v1200_v29  ;;  %986 = vst.msk [vmem:[%s1621_s25 + $0xbc] sm:$0xf] %vm938_vm3, %v1224_v31 }
 0x151   : > { %960 = vst.msk [vmem:[%s1621_s25 + $0x54] sm:$0xf] %vm938_vm3, %v1198_v30  ;;  %984 = vst.msk [vmem:[%s1621_s25 + $0xb4] sm:$0xf] %vm938_vm3, %v1222_v32 }
 0x152 PF: > { %s15_s12 = sadd.s32 1, %s1435_s12  }
 0x153   : > { %p12_p2 = scmp.ge.s32.totalorder %s15_s12, 5  }
 0x155   :  { %14 = sbr.rel (!%p12_p2) target bundleno = 2 (0x2), region = 71 }
 0x15c   :  { %1009 = vsyncpa [#allocation3], 1 }
 0x15d   :  { %1011 = vsyncpa [#allocation3 + $0x1], 1 }
 0x15e   :  { %1012 = vsyncpa [#allocation5], 1 }

// kernel: _lambda_.8
= control target key start
LH: loop header
LB: loop body
LE: loop exit
PB: predicated region body
PF: predicated region fallthrough
CT: control target
= control target key end

     0   :  { %s429_s6 = smov 0   ;;  %s654_s0 = inlined_call_operand.vmem [shape: bf16[20,2,10,64], index: 0, kind: input, shape index: {}]   ;;  %s655_s1 = inlined_call_operand.vmem [shape: bf16[20,10,32], index: 1, kind: output, shape index: {}]  }
   0x1 LB: > { %s386_s7 = sadd.s32 4294967295, %s415_s6   ;;  %p390_p0 = scmp.ge.s32.totalorder %s415_s6, 1  ;;  %s415_s6 = sphi %s429_s6, %s11_s6  }
   0x2   : > { %p89_p1 = scmp.lt.s32.totalorder %s415_s6, 3 }
   0x4   : > { %p90_p2 = pnand %p390_p0, %p89_p1 }
   0x5   : > { %s111_s8 = smul.u32 (!%p90_p2), 10, %s386_s7  ;;  %s417_s13 = smov (!%p90_p2), 96   ;;  %vm306_vm0 = vcmask (!%p90_p2), 257024   ;;  %vm308_vm1 = vcmask (!%p90_p2), 253952  }
   0x6   : > { %93 = sbr.rel (%p90_p2) target bundleno = 176 (0xb0), region = 24 }
   0x7   : > { %p112_p3 = scmp.lt.s32.totalorder (!%p90_p2), %s111_s8, 19 }
   0xd   : > { %s657_s8 = smov (!%p112_p3, %s111_s8), 19 }
   0xe   : > { %s397_s9 = sshll.u32 %s657_s8, 4  ;;  %s398_s14 = sshll.u32 %s657_s8, 3 }
   0xf   : > { %s443_s12 = scalar_lea.vmem %s654_s0, %s397_s9  ;;  %s570_s17 = scalar_lea.vmem %s655_s1, %s398_s14 }
  0x10   : > { %v130_v0 = vld [vmem:[%s443_s12 + $0x10] sm:$0xf]  ;;  %v132_v1 = vld [vmem:[%s443_s12 + $0x18] sm:$0xf]  ;;  %v126_v2 = vld [vmem:[%s443_s12] sm:$0xf] }
  0x11   : > { %v448_v3 = vmax.bf16 %v132_v1, %v130_v0  ;;  %v128_v4 = vld [vmem:[%s443_s12 + $0x8] sm:$0xf]  ;;  %v131_v5 = vld [vmem:[%s443_s12 + $0x14] sm:$0x1]  ;;  %v133_v6 = vld [vmem:[%s443_s12 + $0x1c] sm:$0x1] }
  0x12   : > { %v453_v7 = vmax.bf16 %v128_v4, %v126_v2  ;;  %v127_v8 = vld [vmem:[%s443_s12 + $0x4] sm:$0x1]  ;;  %v129_v9 = vld [vmem:[%s443_s12 + $0xc] sm:$0x1]  ;;  %v459_v10 = vmax.bf16 %v133_v6, %v131_v5  ;;  %v134_v14 = vld [vmem:[%s443_s12 + $0x20] sm:$0xf] }
  0x13   : > { %210 = vrot.lane.b32.xlu1 %v448_v3, %s417_s13  ;;  %v463_v11 = vmax.bf16 %v129_v9, %v127_v8  ;;  %v135_v12 = vld [vmem:[%s443_s12 + $0x24] sm:$0x1]  ;;  %v137_v13 = vld [vmem:[%s443_s12 + $0x2c] sm:$0x1]  ;;  %v136_v15 = vld [vmem:[%s443_s12 + $0x28] sm:$0xf] }
  0x14   : > { %206 = vrot.lane.b32.xlu0 %v453_v7, %s417_s13  ;;  %v471_v16 = vmax.bf16 %v137_v13, %v135_v12  ;;  %v475_v17 = vmax.bf16 %v136_v15, %v134_v14  ;;  %v139_v18 = vld [vmem:[%s443_s12 + $0x34] sm:$0x1]  ;;  %v141_v19 = vld [vmem:[%s443_s12 + $0x3c] sm:$0x1]  ;;  %v138_v20 = vld [vmem:[%s443_s12 + $0x30] sm:$0xf] }
  0x15   : > { %v140_v21 = vld [vmem:[%s443_s12 + $0x38] sm:$0xf]  ;;  %v483_v22 = vmax.bf16 %v141_v19, %v139_v18  ;;  %v143_v24 = vld [vmem:[%s443_s12 + $0x44] sm:$0x1]  ;;  %v145_v25 = vld [vmem:[%s443_s12 + $0x4c] sm:$0x1] }
  0x16   : > { %v487_v23 = vmax.bf16 %v140_v21, %v138_v20  ;;  %v142_v26 = vld [vmem:[%s443_s12 + $0x40] sm:$0xf]  ;;  %v144_v27 = vld [vmem:[%s443_s12 + $0x48] sm:$0xf]  ;;  %v495_v28 = vmax.bf16 %v145_v25, %v143_v24  ;;  %v147_v30 = vld [vmem:[%s443_s12 + $0x54] sm:$0x1] }
  0x17   : > { %212 = vrot.lane.b32.xlu1 %v459_v10, %s417_s13  ;;  %v499_v29 = vmax.bf16 %v144_v27, %v142_v26  ;;  %v149_v31 = vld [vmem:[%s443_s12 + $0x5c] sm:$0x1]  ;;  %v146_v32 = vld [vmem:[%s443_s12 + $0x50] sm:$0xf]  ;;  %v148_v33 = vld [vmem:[%s443_s12 + $0x58] sm:$0xf] }
  0x18   : > { %208 = vrot.lane.b32.xlu0 %v463_v11, %s417_s13  ;;  %v507_v34 = vmax.bf16 %v149_v31, %v147_v30  ;;  %v511_v35 = vmax.bf16 %v148_v33, %v146_v32  ;;  %v151_v36 = vld [vmem:[%s443_s12 + $0x64] sm:$0x1]  ;;  %v153_v37 = vld [vmem:[%s443_s12 + $0x6c] sm:$0x1]  ;;  %v150_v38 = vld [vmem:[%s443_s12 + $0x60] sm:$0xf] }
  0x19   : > { %v152_v39 = vld [vmem:[%s443_s12 + $0x68] sm:$0xf]  ;;  %v519_v40 = vmax.bf16 %v153_v37, %v151_v36  ;;  %v155_v42 = vld [vmem:[%s443_s12 + $0x74] sm:$0x1]  ;;  %v157_v43 = vld [vmem:[%s443_s12 + $0x7c] sm:$0x1] }
  0x1a   : > { %v523_v41 = vmax.bf16 %v152_v39, %v150_v38  ;;  %v154_v44 = vld [vmem:[%s443_s12 + $0x70] sm:$0xf]  ;;  %v156_v45 = vld [vmem:[%s443_s12 + $0x78] sm:$0xf]  ;;  %v531_v46 = vmax.bf16 %v157_v43, %v155_v42  ;;  %v159_v48 = vld [vmem:[%s443_s12 + $0x84] sm:$0x1] }
  0x1b   : > { %216 = vrot.lane.b32.xlu1 %v471_v16, %s417_s13  ;;  %v535_v47 = vmax.bf16 %v156_v45, %v154_v44  ;;  %v161_v49 = vld [vmem:[%s443_s12 + $0x8c] sm:$0x1]  ;;  %v158_v50 = vld [vmem:[%s443_s12 + $0x80] sm:$0xf]  ;;  %v160_v51 = vld [vmem:[%s443_s12 + $0x88] sm:$0xf] }
  0x1c   : > { %214 = vrot.lane.b32.xlu0 %v475_v17, %s417_s13  ;;  %v543_v52 = vmax.bf16 %v161_v49, %v159_v48  ;;  %v547_v53 = vmax.bf16 %v160_v51, %v158_v50  ;;  %v163_v54 = vld [vmem:[%s443_s12 + $0x94] sm:$0x1]  ;;  %v165_v55 = vld [vmem:[%s443_s12 + $0x9c] sm:$0x1]  ;;  %v162_v56 = vld [vmem:[%s443_s12 + $0x90] sm:$0xf] }
  0x1d   : > { %v164_v57 = vld [vmem:[%s443_s12 + $0x98] sm:$0xf]  ;;  %v555_v58 = vmax.bf16 %v165_v55, %v163_v54  ;;  %v418_v0 = vmov 0  }
  0x1e   : > { %v559_v59 = vmax.bf16 %v164_v57, %v162_v56 }
  0x1f   : > { %220 = vrot.lane.b32.xlu1 %v483_v22, %s417_s13 }
  0x20   : > { %218 = vrot.lane.b32.xlu0 %v487_v23, %s417_s13 }
  0x23   : > { %224 = vrot.lane.b32.xlu1 %v495_v28, %s417_s13 }
  0x24   : > { %222 = vrot.lane.b32.xlu0 %v499_v29, %s417_s13 }
  0x27   : > { %228 = vrot.lane.b32.xlu1 %v507_v34, %s417_s13 }
  0x28   : > { %226 = vrot.lane.b32.xlu0 %v511_v35, %s417_s13 }
  0x2b   : > { %232 = vrot.lane.b32.xlu1 %v519_v40, %s417_s13 }
  0x2c   : > { %230 = vrot.lane.b32.xlu0 %v523_v41, %s417_s13 }
  0x2f   : > { %236 = vrot.lane.b32.xlu1 %v531_v46, %s417_s13 }
  0x30   : > { %234 = vrot.lane.b32.xlu0 %v535_v47, %s417_s13 }
  0x33   : > { %240 = vrot.lane.b32.xlu1 %v543_v52, %s417_s13 }
  0x34   : > { %238 = vrot.lane.b32.xlu0 %v547_v53, %s417_s13 }
  0x37   : > { %244 = vrot.lane.b32.xlu1 %v555_v58, %s417_s13 }
  0x38   : > { %242 = vrot.lane.b32.xlu0 %v559_v59, %s417_s13 }
  0x85   : > { %v211_v60 = vpop.permute.xlu1 %210 }
  0x86   : > { %v268_v61 = vmax.bf16 %v211_v60, %v448_v3  ;;  %v207_v62 = vpop.permute.xlu0 %206 }
  0x87   : > { %v266_v63 = vmax.bf16 %v207_v62, %v453_v7 }
  0x88   : > { %v288_v1 = vmax.bf16 %v418_v0, %v268_v61 }
  0x89   : > { %v286_v2 = vmax.bf16 %v418_v0, %v266_v63  ;;  %v213_v4 = vpop.permute.xlu1 %212 }
  0x8a   : > { %310 = vst.msk [vmem:[%s570_s17 + $0x8] sm:$0xf] %vm306_vm0, %v288_v1  ;;  %v269_v3 = vmax.bf16 %v213_v4, %v459_v10  ;;  %v209_v5 = vpop.permute.xlu0 %208 }
  0x8b   : > { %307 = vst.msk [vmem:[%s570_s17] sm:$0xf] %vm306_vm0, %v286_v2  ;;  %v267_v6 = vmax.bf16 %v209_v5, %v463_v11 }
  0x8c   : > { %v289_v7 = vmax.bf16 %v418_v0, %v269_v3 }
  0x8d   : > { %v287_v8 = vmax.bf16 %v418_v0, %v267_v6  ;;  %v217_v9 = vpop.permute.xlu1 %216 }
  0x8e   : > { %311 = vst.msk [vmem:[%s570_s17 + $0xc] sm:$0x1] %vm308_vm1, %v289_v7  ;;  %v271_v12 = vmax.bf16 %v217_v9, %v471_v16  ;;  %v215_v13 = vpop.permute.xlu0 %214 }
  0x8f   : > { %309 = vst.msk [vmem:[%s570_s17 + $0x4] sm:$0x1] %vm308_vm1, %v287_v8  ;;  %v270_v10 = vmax.bf16 %v215_v13, %v475_v17 }
  0x90   : > { %v291_v14 = vmax.bf16 %v418_v0, %v271_v12 }
  0x91   : > { %v290_v11 = vmax.bf16 %v418_v0, %v270_v10  ;;  %v221_v15 = vpop.permute.xlu1 %220 }
  0x92   : > { %313 = vst.msk [vmem:[%s570_s17 + $0x14] sm:$0x1] %vm308_vm1, %v291_v14  ;;  %v273_v18 = vmax.bf16 %v221_v15, %v483_v22  ;;  %v219_v19 = vpop.permute.xlu0 %218 }
  0x93   : > { %312 = vst.msk [vmem:[%s570_s17 + $0x10] sm:$0xf] %vm306_vm0, %v290_v11  ;;  %v272_v16 = vmax.bf16 %v219_v19, %v487_v23 }
  0x94   : > { %v293_v20 = vmax.bf16 %v418_v0, %v273_v18 }
  0x95   : > { %v292_v17 = vmax.bf16 %v418_v0, %v272_v16  ;;  %v225_v21 = vpop.permute.xlu1 %224 }
  0x96   : > { %315 = vst.msk [vmem:[%s570_s17 + $0x1c] sm:$0x1] %vm308_vm1, %v293_v20  ;;  %v275_v24 = vmax.bf16 %v225_v21, %v495_v28  ;;  %v223_v25 = vpop.permute.xlu0 %222 }
  0x97   : > { %314 = vst.msk [vmem:[%s570_s17 + $0x18] sm:$0xf] %vm306_vm0, %v292_v17  ;;  %v274_v22 = vmax.bf16 %v223_v25, %v499_v29 }
  0x98   : > { %v295_v26 = vmax.bf16 %v418_v0, %v275_v24 }
  0x99   : > { %v294_v23 = vmax.bf16 %v418_v0, %v274_v22  ;;  %v229_v27 = vpop.permute.xlu1 %228 }
  0x9a   : > { %317 = vst.msk [vmem:[%s570_s17 + $0x24] sm:$0x1] %vm308_vm1, %v295_v26  ;;  %v277_v30 = vmax.bf16 %v229_v27, %v507_v34  ;;  %v227_v31 = vpop.permute.xlu0 %226 }
  0x9b   : > { %316 = vst.msk [vmem:[%s570_s17 + $0x20] sm:$0xf] %vm306_vm0, %v294_v23  ;;  %v276_v28 = vmax.bf16 %v227_v31, %v511_v35 }
  0x9c   : > { %v297_v32 = vmax.bf16 %v418_v0, %v277_v30 }
  0x9d   : > { %v296_v29 = vmax.bf16 %v418_v0, %v276_v28  ;;  %v233_v33 = vpop.permute.xlu1 %232 }
  0x9e   : > { %319 = vst.msk [vmem:[%s570_s17 + $0x2c] sm:$0x1] %vm308_vm1, %v297_v32  ;;  %v279_v36 = vmax.bf16 %v233_v33, %v519_v40  ;;  %v231_v37 = vpop.permute.xlu0 %230 }
  0x9f   : > { %318 = vst.msk [vmem:[%s570_s17 + $0x28] sm:$0xf] %vm306_vm0, %v296_v29  ;;  %v278_v34 = vmax.bf16 %v231_v37, %v523_v41 }
  0xa0   : > { %v299_v38 = vmax.bf16 %v418_v0, %v279_v36 }
  0xa1   : > { %v298_v35 = vmax.bf16 %v418_v0, %v278_v34  ;;  %v237_v39 = vpop.permute.xlu1 %236 }
  0xa2   : > { %321 = vst.msk [vmem:[%s570_s17 + $0x34] sm:$0x1] %vm308_vm1, %v299_v38  ;;  %v281_v42 = vmax.bf16 %v237_v39, %v531_v46  ;;  %v235_v43 = vpop.permute.xlu0 %234 }
  0xa3   : > { %320 = vst.msk [vmem:[%s570_s17 + $0x30] sm:$0xf] %vm306_vm0, %v298_v35  ;;  %v280_v40 = vmax.bf16 %v235_v43, %v535_v47 }
  0xa4   : > { %v301_v44 = vmax.bf16 %v418_v0, %v281_v42 }
  0xa5   : > { %v300_v41 = vmax.bf16 %v418_v0, %v280_v40  ;;  %v241_v45 = vpop.permute.xlu1 %240 }
  0xa6   : > { %323 = vst.msk [vmem:[%s570_s17 + $0x3c] sm:$0x1] %vm308_vm1, %v301_v44  ;;  %v283_v48 = vmax.bf16 %v241_v45, %v543_v52  ;;  %v239_v49 = vpop.permute.xlu0 %238 }
  0xa7   : > { %322 = vst.msk [vmem:[%s570_s17 + $0x38] sm:$0xf] %vm306_vm0, %v300_v41  ;;  %v282_v46 = vmax.bf16 %v239_v49, %v547_v53 }
  0xa8   : > { %v303_v50 = vmax.bf16 %v418_v0, %v283_v48 }
  0xa9   : > { %v302_v47 = vmax.bf16 %v418_v0, %v282_v46  ;;  %v245_v51 = vpop.permute.xlu1 %244 }
  0xaa   : > { %325 = vst.msk [vmem:[%s570_s17 + $0x44] sm:$0x1] %vm308_vm1, %v303_v50  ;;  %v285_v54 = vmax.bf16 %v245_v51, %v555_v58  ;;  %v243_v55 = vpop.permute.xlu0 %242 }
  0xab   : > { %324 = vst.msk [vmem:[%s570_s17 + $0x40] sm:$0xf] %vm306_vm0, %v302_v47  ;;  %v284_v56 = vmax.bf16 %v243_v55, %v559_v59 }
  0xac   : > { %v305_v52 = vmax.bf16 %v418_v0, %v285_v54 }
  0xad   : > { %v304_v57 = vmax.bf16 %v418_v0, %v284_v56 }
  0xae   : > { %327 = vst.msk [vmem:[%s570_s17 + $0x4c] sm:$0x1] %vm308_vm1, %v305_v52 }
  0xaf   : > { %326 = vst.msk [vmem:[%s570_s17 + $0x48] sm:$0xf] %vm306_vm0, %v304_v57 }
  0xb0 PF: > { %s11_s6 = sadd.s32 1, %s415_s6  }
  0xb1   : > { %p8_p4 = scmp.ge.s32.totalorder %s11_s6, 4  }
  0xb3   :  { %10 = sbr.rel (!%p8_p4) target bundleno = 1 (0x1), region = 54 }

// kernel: _lambda_.7
= control target key start
LH: loop header
LB: loop body
LE: loop exit
PB: predicated region body
PF: predicated region fallthrough
CT: control target
= control target key end

     0   :  { %s4109_s12 = smov 0   ;;  %s4741_s0 = inlined_call_operand.vmem [shape: bf16[800,800], index: 0, kind: input, shape index: {}]   ;;  %s4742_s1 = inlined_call_operand.vmem [shape: bf16[800,32], index: 1, kind: input, shape index: {}]   ;;  %s4743_s2 = inlined_call_operand.vmem [shape: f32[1,32], index: 2, kind: input, shape index: {}]   ;;  %s4744_s3 = inlined_call_operand.vmem [shape: bf16[800,32], index: 3, kind: output, shape index: {}]  }
   0x1 LB: > { %s2975_s13 = sadd.s32 4294967295, %s4084_s12   ;;  %p2979_p0 = scmp.ge.s32.totalorder %s4084_s12, 1  ;;  %s4084_s12 = sphi %s4109_s12, %s13_s12  }
   0x2   : > { %p139_p1 = scmp.lt.s32.totalorder %s4084_s12, 3 }
   0x4   : > { %p140_p2 = pnand %p2979_p0, %p139_p1 }
   0x5   : > { %v3778_v0 = vld [vmem:[%s4742_s1] sm:$0xff] (!%p140_p2)   ;;  %v4086_v1 = vmov (!%p140_p2), 0   ;;  %v3780_v3 = vld [vmem:[%s4742_s1 + $0x8] sm:$0xff] (!%p140_p2)   ;;  %v3782_v5 = vld [vmem:[%s4742_s1 + $0x10] sm:$0xff] (!%p140_p2)   ;;  %s164_s5 = smul.u32 (!%p140_p2), 50, %s2975_s13  ;;  %v4087_v40 = vmov (!%p140_p2), 0.0  }
   0x6   : > { %143 = sbr.rel (%p140_p2) target bundleno = 683 (0x2ab), region = 32  ;;  %1736 = vmatprep.subr.bf16.mxu1 (!%p140_p2), %v4086_v1  ;;  %2202 = vmatprep.subr.bf16.mxu0 (!%p140_p2), %v4086_v1  ;;  %v3779_v2 = vld [vmem:[%s4742_s1 + $0x100] sm:$0xff] (!%p140_p2)   ;;  %v3781_v4 = vld [vmem:[%s4742_s1 + $0x108] sm:$0xff] (!%p140_p2)   ;;  %v3783_v6 = vld [vmem:[%s4742_s1 + $0x110] sm:$0xff] (!%p140_p2)   ;;  %vm4088_vm0 = vmmov (!%p140_p2), 0   ;;  %vm1660_vm1 = vcmask (!%p140_p2), 261120  }
   0x7   : > { %1737 = vmatpush1.bf16.msra.mxu1 (!%p140_p2), %v3778_v0  ;;  %2203 = vmatpush1.bf16.msra.mxu0 (!%p140_p2), %v3779_v2  ;;  %v3784_v7 = vld [vmem:[%s4742_s1 + $0x18] sm:$0xff] (!%p140_p2)   ;;  %v3786_v9 = vld [vmem:[%s4742_s1 + $0x20] sm:$0xff] (!%p140_p2)   ;;  %v3788_v11 = vld [vmem:[%s4742_s1 + $0x28] sm:$0xff] (!%p140_p2)   ;;  %p165_p3 = scmp.lt.s32.totalorder (!%p140_p2), %s164_s5, 99  ;;  %vm2868_vm2 = vcmask (!%p140_p2), 257024  }
   0x8   : > { %1738 = vmatprep.subr.bf16.mxu1 (!%p140_p2), %v4086_v1  ;;  %2204 = vmatprep.subr.bf16.mxu0 (!%p140_p2), %v4086_v1  ;;  %v3785_v8 = vld [vmem:[%s4742_s1 + $0x118] sm:$0xff] (!%p140_p2)   ;;  %v3787_v10 = vld [vmem:[%s4742_s1 + $0x120] sm:$0xff] (!%p140_p2)   ;;  %v3789_v12 = vld [vmem:[%s4742_s1 + $0x128] sm:$0xff] (!%p140_p2)  }
   0x9   : > { %v3790_v13 = vld [vmem:[%s4742_s1 + $0x30] sm:$0xff] (!%p140_p2)   ;;  %v3792_v15 = vld [vmem:[%s4742_s1 + $0x38] sm:$0xff] (!%p140_p2)   ;;  %v3794_v17 = vld [vmem:[%s4742_s1 + $0x40] sm:$0xff] (!%p140_p2)  }
   0xa   : > { %v3791_v14 = vld [vmem:[%s4742_s1 + $0x130] sm:$0xff] (!%p140_p2)   ;;  %v3793_v16 = vld [vmem:[%s4742_s1 + $0x138] sm:$0xff] (!%p140_p2)   ;;  %v3795_v18 = vld [vmem:[%s4742_s1 + $0x140] sm:$0xff] (!%p140_p2)  }
   0xb   : > { %1739 = vmatpush1.bf16.msra.mxu1 (!%p140_p2), %v3780_v3  ;;  %2205 = vmatpush1.bf16.msra.mxu0 (!%p140_p2), %v3781_v4  ;;  %v3796_v20 = vld [vmem:[%s4742_s1 + $0x48] sm:$0xff] (!%p140_p2)   ;;  %v3798_v23 = vld [vmem:[%s4742_s1 + $0x50] sm:$0xff] (!%p140_p2)   ;;  %v3800_v25 = vld [vmem:[%s4742_s1 + $0x58] sm:$0xff] (!%p140_p2)  }
   0xc   : > { %1740 = vmatprep.subr.bf16.mxu1 (!%p140_p2), %v4086_v1  ;;  %2206 = vmatprep.subr.bf16.mxu0 (!%p140_p2), %v4086_v1  ;;  %v3797_v22 = vld [vmem:[%s4742_s1 + $0x148] sm:$0xff] (!%p140_p2)   ;;  %v3799_v24 = vld [vmem:[%s4742_s1 + $0x150] sm:$0xff] (!%p140_p2)   ;;  %v3801_v26 = vld [vmem:[%s4742_s1 + $0x158] sm:$0xff] (!%p140_p2)  }
   0xd   : > { %s4746_s5 = smov (!%p165_p3, %s164_s5), 99  ;;  %v3802_v27 = vld [vmem:[%s4742_s1 + $0x60] sm:$0xff]   ;;  %v3804_v29 = vld [vmem:[%s4742_s1 + $0x68] sm:$0xff]   ;;  %v3806_v31 = vld [vmem:[%s4742_s1 + $0x70] sm:$0xff]  }
   0xe   : > { %s3766_s19 = smul.u32 28, %s4746_s5  ;;  %v3803_v28 = vld [vmem:[%s4742_s1 + $0x160] sm:$0xff]   ;;  %v3805_v30 = vld [vmem:[%s4742_s1 + $0x168] sm:$0xff]   ;;  %v3807_v32 = vld [vmem:[%s4742_s1 + $0x170] sm:$0xff]   ;;  %s2981_s22 = sshll.u32 %s4746_s5, 2 }
   0xf   : > { %1741 = vmatpush1.bf16.msra.mxu1 %v3782_v5  ;;  %2207 = vmatpush1.bf16.msra.mxu0 %v3783_v6  ;;  %v3808_v33 = vld [vmem:[%s4742_s1 + $0x78] sm:$0xff]   ;;  %v3816_v37 = vld [vmem:[%s4742_s1 + $0x80] sm:$0xff]   ;;  %v3824_v42 = vld [vmem:[%s4742_s1 + $0x88] sm:$0xff]   ;;  %s4588_s24 = scalar_lea.vmem %s4744_s3, %s2981_s22 }
  0x10   : > { %1742 = vmatprep.subr.bf16.mxu1 %v4086_v1  ;;  %2208 = vmatprep.subr.bf16.mxu0 %v4086_v1  ;;  %s4192_s26 = scalar_lea.vmem %s4741_s0, %s3766_s19  ;;  %v3809_v34 = vld [vmem:[%s4742_s1 + $0x178] sm:$0xff]   ;;  %v3817_v38 = vld [vmem:[%s4742_s1 + $0x180] sm:$0xff]   ;;  %v3837_v47 = vld [vmem:[%s4742_s1 + $0x90] sm:$0xff]  }
  0x11   : > { %v3812_v19 = vld [vmem:[%s4192_s26 + $0x4] ss:$28 sps:$4 sm:$0xff]   ;;  %v3815_v21 = vld [vmem:[%s4192_s26 + $0x14] ss:$28 sps:$4 sm:$0xff]   ;;  %v3818_v39 = vld [vmem:[%s4192_s26 + $0x3c] ss:$28 sps:$4 sm:$0xff]  }
  0x12   : > { %1768 = vmatprep.mubr.bf16.mxu1 %v3812_v19  ;;  %2234 = vmatprep.mubr.bf16.mxu0 %v3815_v21  ;;  %v3810_v35 = vld [vmem:[%s4192_s26] ss:$28 sps:$4 sm:$0xff]   ;;  %v3813_v36 = vld [vmem:[%s4192_s26 + $0x10] ss:$28 sps:$4 sm:$0xff]   ;;  %v3822_v43 = vld [vmem:[%s4192_s26 + $0x38] ss:$28 sps:$4 sm:$0xff]  }
  0x13   : > { %1743 = vmatpush1.bf16.msra.mxu1 %v3784_v7  ;;  %2209 = vmatpush1.bf16.msra.mxu0 %v3785_v8  ;;  %v3820_v41 = vld [vmem:[%s4192_s26 + $0x4c] ss:$28 sps:$4 sm:$0xff]   ;;  %v3825_v45 = vld [vmem:[%s4192_s26 + $0x74] ss:$28 sps:$4 sm:$0xff]   ;;  %v3827_v46 = vld [vmem:[%s4192_s26 + $0x84] ss:$28 sps:$4 sm:$0xff]  }
  0x14   : > { %1744 = vmatprep.subr.bf16.mxu1 %v4086_v1  ;;  %2210 = vmatprep.subr.bf16.mxu0 %v4086_v1  ;;  %v3823_v44 = vld [vmem:[%s4192_s26 + $0x48] ss:$28 sps:$4 sm:$0xff]   ;;  %v3829_v48 = vld [vmem:[%s4192_s26 + $0x70] ss:$28 sps:$4 sm:$0xff]   ;;  %v3846_v49 = vld [vmem:[%s4742_s1 + $0x98] sm:$0xff]  }
  0x15   : > { %v3830_v50 = vld [vmem:[%s4192_s26 + $0x80] ss:$28 sps:$4 sm:$0xff]   ;;  %v3831_v51 = vld [vmem:[%s4192_s26 + $0xac] ss:$28 sps:$4 sm:$0xff]   ;;  %v3836_v57 = vld [vmem:[%s4192_s26 + $0xb8] ss:$28 sps:$4 sm:$0xff]  }
  0x16   : > { %v3833_v52 = vld [vmem:[%s4192_s26 + $0xbc] ss:$28 sps:$4 sm:$0xff]   ;;  %v3857_v53 = vld [vmem:[%s4742_s1 + $0xa0] sm:$0xff]   ;;  %v3902_v54 = vld [vmem:[%s4742_s1 + $0x188] sm:$0xff]  }
  0x17   : > { %1745 = vmatpush1.bf16.msra.mxu1 %v3786_v9  ;;  %2211 = vmatpush1.bf16.msra.mxu0 %v3787_v10  ;;  %v3869_v55 = vld [vmem:[%s4742_s1 + $0xa8] sm:$0xff]   ;;  %v3838_v58 = vld [vmem:[%s4192_s26 + $0xe4] ss:$28 sps:$4 sm:$0xff]   ;;  %v3840_v59 = vld [vmem:[%s4192_s26 + $0xf4] ss:$28 sps:$4 sm:$0xff]  }
  0x18   : > { %1746 = vmatprep.subr.bf16.mxu1 %v4086_v1  ;;  %2212 = vmatprep.subr.bf16.mxu0 %v4086_v1  ;;  %v3835_v56 = vld [vmem:[%s4192_s26 + $0xa8] ss:$28 sps:$4 sm:$0xff]   ;;  %v3877_v60 = vld [vmem:[%s4742_s1 + $0xb0] sm:$0xff]   ;;  %v3890_v61 = vld [vmem:[%s4742_s1 + $0xb8] sm:$0xff]  }
  0x19   : > { %v3842_v62 = vld [vmem:[%s4192_s26 + $0xe0] ss:$28 sps:$4 sm:$0xff]   ;;  %v3843_v63 = vld [vmem:[%s4192_s26 + $0xf0] ss:$28 sps:$4 sm:$0xff]   ;;  %v3849_v5 = vld [vmem:[%s4192_s26 + $0x118] ss:$28 sps:$4 sm:$0xff]  }
  0x1a   : > { %v3844_v0 = vld [vmem:[%s4192_s26 + $0x11c] ss:$28 sps:$4 sm:$0xff]   ;;  %v3847_v2 = vld [vmem:[%s4192_s26 + $0x12c] ss:$28 sps:$4 sm:$0xff]   ;;  %v3897_v3 = vld [vmem:[%s4742_s1 + $0xc0] sm:$0xff]  }
  0x1b   : > { %1747 = vmatpush1.bf16.msra.mxu1 %v3788_v11  ;;  %2213 = vmatpush1.bf16.msra.mxu0 %v3789_v12  ;;  %v3911_v4 = vld [vmem:[%s4742_s1 + $0xc8] sm:$0xff]   ;;  %v3851_v7 = vld [vmem:[%s4192_s26 + $0x154] ss:$28 sps:$4 sm:$0xff]   ;;  %v3853_v8 = vld [vmem:[%s4192_s26 + $0x164] ss:$28 sps:$4 sm:$0xff]  }
  0x1c   : > { %1748 = vmatprep.subr.bf16.mxu1 %v4086_v1  ;;  %2214 = vmatprep.subr.bf16.mxu0 %v4086_v1  ;;  %v3850_v6 = vld [vmem:[%s4192_s26 + $0x128] ss:$28 sps:$4 sm:$0xff]   ;;  %v3918_v9 = vld [vmem:[%s4742_s1 + $0xd0] sm:$0xff]   ;;  %v3931_v11 = vld [vmem:[%s4742_s1 + $0xd8] sm:$0xff]  }
  0x1d   : > { %v3855_v10 = vld [vmem:[%s4192_s26 + $0x150] ss:$28 sps:$4 sm:$0xff]   ;;  %v3856_v12 = vld [vmem:[%s4192_s26 + $0x160] ss:$28 sps:$4 sm:$0xff]  }
  0x1e   : > { %v3864_v19 = vld [vmem:[%s4192_s26 + $0x1c4] ss:$28 sps:$4 sm:$0xff]   ;;  %v3963_v21 = vld [vmem:[%s4742_s1 + $0xf0] sm:$0xff]  }
  0x1f   : > { %1749 = vmatpush1.bf16.msra.mxu1 %v3790_v13  ;;  %2215 = vmatpush1.bf16.msra.mxu0 %v3791_v14  ;;  %v3858_v13 = vld [vmem:[%s4192_s26 + $0x18c] ss:$28 sps:$4 sm:$0xff]   ;;  %v3860_v14 = vld [vmem:[%s4192_s26 + $0x19c] ss:$28 sps:$4 sm:$0xff]  }
  0x20   : > { %1750 = vmatprep.subr.bf16.mxu1 %v4086_v1  ;;  %2216 = vmatprep.subr.bf16.mxu0 %v4086_v1 }
  0x23   : > { %1751 = vmatpush1.bf16.msra.mxu1 %v3792_v15  ;;  %2217 = vmatpush1.bf16.msra.mxu0 %v3793_v16  ;;  %v3940_v15 = vld [vmem:[%s4742_s1 + $0xe0] sm:$0xff]  }
  0x24   : > { %1752 = vmatprep.subr.bf16.mxu1 %v4086_v1  ;;  %2218 = vmatprep.subr.bf16.mxu0 %v4086_v1  ;;  %v3862_v16 = vld [vmem:[%s4192_s26 + $0x188] ss:$28 sps:$4 sm:$0xff]  }
  0x27   : > { %1753 = vmatpush1.bf16.msra.mxu1 %v3794_v17  ;;  %2219 = vmatpush1.bf16.msra.mxu0 %v3795_v18  ;;  %v3951_v17 = vld [vmem:[%s4742_s1 + $0xe8] sm:$0xff]   ;;  %v3863_v18 = vld [vmem:[%s4192_s26 + $0x198] ss:$28 sps:$4 sm:$0xff]  }
  0x28   : > { %1754 = vmatprep.subr.bf16.mxu1 %v4086_v1  ;;  %2220 = vmatprep.subr.bf16.mxu0 %v4086_v1 }
  0x2b   : > { %1755 = vmatpush1.bf16.msra.mxu1 %v3796_v20  ;;  %2221 = vmatpush1.bf16.msra.mxu0 %v3797_v22  ;;  %v3866_v20 = vld [vmem:[%s4192_s26 + $0x1d4] ss:$28 sps:$4 sm:$0xff]   ;;  %v3868_v22 = vld [vmem:[%s4192_s26 + $0x1c0] ss:$28 sps:$4 sm:$0xff]  }
  0x2c   : > { %1756 = vmatprep.subr.bf16.mxu1 %v4086_v1  ;;  %2222 = vmatprep.subr.bf16.mxu0 %v4086_v1 }
  0x2f   : > { %1757 = vmatpush1.bf16.msra.mxu1 %v3798_v23  ;;  %2223 = vmatpush1.bf16.msra.mxu0 %v3799_v24  ;;  %v3971_v23 = vld [vmem:[%s4742_s1 + $0xf8] sm:$0xff]   ;;  %v3870_v24 = vld [vmem:[%s4192_s26 + $0x1d0] ss:$28 sps:$4 sm:$0xff]  }
  0x30   : > { %1758 = vmatprep.subr.bf16.mxu1 %v4086_v1  ;;  %2224 = vmatprep.subr.bf16.mxu0 %v4086_v1 }
  0x33   : > { %1759 = vmatpush1.bf16.msra.mxu1 %v3800_v25  ;;  %2225 = vmatpush1.bf16.msra.mxu0 %v3801_v26  ;;  %v3871_v25 = vld [vmem:[%s4192_s26 + $0x1fc] ss:$28 sps:$4 sm:$0xff]   ;;  %v3873_v26 = vld [vmem:[%s4192_s26 + $0x20c] ss:$28 sps:$4 sm:$0xff]  }
  0x34   : > { %1760 = vmatprep.subr.bf16.mxu1 %v4086_v1  ;;  %2226 = vmatprep.subr.bf16.mxu0 %v4086_v1 }
  0x37   : > { %1761 = vmatpush1.bf16.msra.mxu1 %v3802_v27  ;;  %2227 = vmatpush1.bf16.msra.mxu0 %v3803_v28  ;;  %v3875_v27 = vld [vmem:[%s4192_s26 + $0x1f8] ss:$28 sps:$4 sm:$0xff]   ;;  %v3876_v28 = vld [vmem:[%s4192_s26 + $0x208] ss:$28 sps:$4 sm:$0xff]  }
  0x38   : > { %1762 = vmatprep.subr.bf16.mxu1 %v4086_v1  ;;  %2228 = vmatprep.subr.bf16.mxu0 %v4086_v1 }
  0x3b   : > { %1763 = vmatpush1.bf16.msra.mxu1 %v3804_v29  ;;  %2229 = vmatpush1.bf16.msra.mxu0 %v3805_v30  ;;  %v3878_v29 = vld [vmem:[%s4192_s26 + $0x234] ss:$28 sps:$4 sm:$0xff]   ;;  %v3880_v30 = vld [vmem:[%s4192_s26 + $0x244] ss:$28 sps:$4 sm:$0xff]  }
  0x3c   : > { %1764 = vmatprep.subr.bf16.mxu1 %v4086_v1  ;;  %2230 = vmatprep.subr.bf16.mxu0 %v4086_v1 }
  0x3f   : > { %1765 = vmatpush1.bf16.msra.mxu1 %v3806_v31  ;;  %2231 = vmatpush1.bf16.msra.mxu0 %v3807_v32  ;;  %v3883_v31 = vld [vmem:[%s4192_s26 + $0x240] ss:$28 sps:$4 sm:$0xff]   ;;  %v3884_v32 = vld [vmem:[%s4192_s26 + $0x26c] ss:$28 sps:$4 sm:$0xff]  }
  0x40   : > { %1766 = vmatprep.subr.bf16.mxu1 %v4086_v1  ;;  %2232 = vmatprep.subr.bf16.mxu0 %v4086_v1 }
  0x43   : > { %1767 = vmatpush1.bf16.msra.mxu1 %v3808_v33  ;;  %2233 = vmatpush1.bf16.msra.mxu0 %v3809_v34  ;;  %v3886_v33 = vld [vmem:[%s4192_s26 + $0x27c] ss:$28 sps:$4 sm:$0xff]   ;;  %v3888_v34 = vld [vmem:[%s4192_s26 + $0x268] ss:$28 sps:$4 sm:$0xff]  }
  0x44   : > { %1969 = vmatprep.subr.bf16.mxu1 %v4086_v1  ;;  %3362 = vmatprep.subr.bf16.mxu0 %v4087_v40 }
  0x46   : > { %1769 = vmatmul.mubr.bf16.vlgmr.msra.gmra.mrb[0].mxu1 %v3810_v35  ;;  %2235 = vmatmul.mubr.bf16.vlgmr.msra.gmra.mrb[0].mxu0 %v3813_v36  ;;  %v3889_v35 = vld [vmem:[%s4192_s26 + $0x278] ss:$28 sps:$4 sm:$0xff]   ;;  %v3891_v36 = vld [vmem:[%s4192_s26 + $0x2a4] ss:$28 sps:$4 sm:$0xff]  }
  0x47   : > { %1970 = vmatpush1.bf16.msra.mxu1 %v3816_v37  ;;  %3363 = vmatpush3.bf16.msra.mxu0 %v3817_v38  ;;  %v3893_v37 = vld [vmem:[%s4192_s26 + $0x2b4] ss:$28 sps:$4 sm:$0xff]   ;;  %v3895_v38 = vld [vmem:[%s4192_s26 + $0x2a0] ss:$28 sps:$4 sm:$0xff]  }
  0x48   : > { %1776 = vmatprep.mubr.bf16.mxu1 %v3818_v39  ;;  %2242 = vmatprep.mubr.bf16.mxu0 %v3820_v41  ;;  %v3896_v39 = vld [vmem:[%s4192_s26 + $0x2b0] ss:$28 sps:$4 sm:$0xff]   ;;  %v3898_v41 = vld [vmem:[%s4192_s26 + $0x2dc] ss:$28 sps:$4 sm:$0xff]  }
  0x49   : > { %1971 = vmatprep.subr.bf16.mxu1 %v4086_v1  ;;  %3364 = vmatprep.subr.bf16.mxu0 %v4087_v40 }
  0x4b   : > { %1972 = vmatpush1.bf16.msra.mxu1 %v3824_v42  ;;  %3365 = vmatpush3.bf16.msra.mxu0 %v3902_v54  ;;  %v3900_v42 = vld [vmem:[%s4192_s26 + $0x2ec] ss:$28 sps:$4 sm:$0xff]   ;;  %v3921_v54 = vld [vmem:[%s4192_s26 + $0x394] ss:$28 sps:$4 sm:$0xff]  }
  0x4c   : > { %1973 = vmatprep.subr.bf16.mxu1 %v4086_v1 }
  0x4e   : > { %1777 = vmatmul.mubr.bf16.gmra.mrb[4].mxu1 %v3822_v43  ;;  %2243 = vmatmul.mubr.bf16.gmra.mrb[4].mxu0 %v3823_v44  ;;  %v3903_v43 = vld [vmem:[%s4192_s26 + $0x2d8] ss:$28 sps:$4 sm:$0xff]   ;;  %v3904_v44 = vld [vmem:[%s4192_s26 + $0x2e8] ss:$28 sps:$4 sm:$0xff]  }
  0x4f   : > { %1784 = vmatprep.mubr.bf16.mxu1 %v3825_v45  ;;  %2250 = vmatprep.mubr.bf16.mxu0 %v3827_v46  ;;  %v3905_v45 = vld [vmem:[%s4192_s26 + $0x314] ss:$28 sps:$4 sm:$0xff]   ;;  %v3907_v46 = vld [vmem:[%s4192_s26 + $0x324] ss:$28 sps:$4 sm:$0xff]  }
  0x50   : > { %1974 = vmatpush1.bf16.msra.mxu1 %v3837_v47  ;;  %v3909_v47 = vld [vmem:[%s4192_s26 + $0x310] ss:$28 sps:$4 sm:$0xff]  }
  0x51   : > { %1975 = vmatprep.subr.bf16.mxu1 %v4086_v1 }
  0x54   : > { %1976 = vmatpush1.bf16.msra.mxu1 %v3846_v49  ;;  %v3912_v49 = vld [vmem:[%s4192_s26 + $0x34c] ss:$28 sps:$4 sm:$0xff]  }
  0x55   : > { %1977 = vmatprep.subr.bf16.mxu1 %v4086_v1 }
  0x56   : > { %1785 = vmatmul.mubr.bf16.gmra.mrb[8].mxu1 %v3829_v48  ;;  %2251 = vmatmul.mubr.bf16.gmra.mrb[8].mxu0 %v3830_v50  ;;  %v3910_v48 = vld [vmem:[%s4192_s26 + $0x320] ss:$28 sps:$4 sm:$0xff]  }
  0x57   : > { %1792 = vmatprep.mubr.bf16.mxu1 %v3831_v51  ;;  %2258 = vmatprep.mubr.bf16.mxu0 %v3833_v52  ;;  %v3914_v50 = vld [vmem:[%s4192_s26 + $0x35c] ss:$28 sps:$4 sm:$0xff]   ;;  %v3916_v51 = vld [vmem:[%s4192_s26 + $0x348] ss:$28 sps:$4 sm:$0xff]  }
  0x58   : > { %1978 = vmatpush1.bf16.msra.mxu1 %v3857_v53  ;;  %v3917_v52 = vld [vmem:[%s4192_s26 + $0x358] ss:$28 sps:$4 sm:$0xff]   ;;  %v3919_v53 = vld [vmem:[%s4192_s26 + $0x384] ss:$28 sps:$4 sm:$0xff]  }
  0x59   : > { %1979 = vmatprep.subr.bf16.mxu1 %v4086_v1 }
  0x5c   : > { %1980 = vmatpush1.bf16.msra.mxu1 %v3869_v55  ;;  %v3923_v55 = vld [vmem:[%s4192_s26 + $0x380] ss:$28 sps:$4 sm:$0xff]  }
  0x5d   : > { %1981 = vmatprep.subr.bf16.mxu1 %v4086_v1 }
  0x5e   : > { %1793 = vmatmul.mubr.bf16.gmra.mrb[12].mxu1 %v3835_v56  ;;  %2259 = vmatmul.mubr.bf16.gmra.mrb[12].mxu0 %v3836_v57  ;;  %v3924_v56 = vld [vmem:[%s4192_s26 + $0x390] ss:$28 sps:$4 sm:$0xff]   ;;  %v3925_v57 = vld [vmem:[%s4192_s26 + $0x3bc] ss:$28 sps:$4 sm:$0xff]  }
  0x5f   : > { %1800 = vmatprep.mubr.bf16.mxu1 %v3838_v58  ;;  %2266 = vmatprep.mubr.bf16.mxu0 %v3840_v59  ;;  %v3927_v58 = vld [vmem:[%s4192_s26 + $0x3cc] ss:$28 sps:$4 sm:$0xff]   ;;  %v3929_v59 = vld [vmem:[%s4192_s26 + $0x3b8] ss:$28 sps:$4 sm:$0xff]  }
  0x60   : > { %1982 = vmatpush1.bf16.msra.mxu1 %v3877_v60  ;;  %v3930_v60 = vld [vmem:[%s4192_s26 + $0x3c8] ss:$28 sps:$4 sm:$0xff]  }
  0x61   : > { %1983 = vmatprep.subr.bf16.mxu1 %v4086_v1 }
  0x64   : > { %1984 = vmatpush1.bf16.msra.mxu1 %v3890_v61  ;;  %v3932_v61 = vld [vmem:[%s4192_s26 + $0x3f4] ss:$28 sps:$4 sm:$0xff]  }
  0x65   : > { %1985 = vmatprep.subr.bf16.mxu1 %v4086_v1 }
  0x66   : > { %1801 = vmatmul.mubr.bf16.gmra.mrb[16].mxu1 %v3842_v62  ;;  %2267 = vmatmul.mubr.bf16.gmra.mrb[16].mxu0 %v3843_v63  ;;  %v3934_v62 = vld [vmem:[%s4192_s26 + $0x404] ss:$28 sps:$4 sm:$0xff]   ;;  %v3936_v63 = vld [vmem:[%s4192_s26 + $0x3f0] ss:$28 sps:$4 sm:$0xff]  }
  0x67   : > { %1808 = vmatprep.mubr.bf16.mxu1 %v3844_v0  ;;  %2274 = vmatprep.mubr.bf16.mxu0 %v3847_v2  ;;  %v3937_v0 = vld [vmem:[%s4192_s26 + $0x400] ss:$28 sps:$4 sm:$0xff]   ;;  %v3938_v2 = vld [vmem:[%s4192_s26 + $0x42c] ss:$28 sps:$4 sm:$0xff]  }
  0x68   : > { %1986 = vmatpush1.bf16.msra.mxu1 %v3897_v3  ;;  %v3941_v3 = vld [vmem:[%s4192_s26 + $0x43c] ss:$28 sps:$4 sm:$0xff]  }
  0x69   : > { %1987 = vmatprep.subr.bf16.mxu1 %v4086_v1 }
  0x6c   : > { %1988 = vmatpush1.bf16.msra.mxu1 %v3911_v4  ;;  %v3943_v4 = vld [vmem:[%s4192_s26 + $0x428] ss:$28 sps:$4 sm:$0xff]  }
  0x6d   : > { %1989 = vmatprep.subr.bf16.mxu1 %v4086_v1 }
  0x6e   : > { %1809 = vmatmul.mubr.bf16.gmra.mrb[20].mxu1 %v3849_v5  ;;  %2275 = vmatmul.mubr.bf16.gmra.mrb[20].mxu0 %v3850_v6  ;;  %v3944_v5 = vld [vmem:[%s4192_s26 + $0x438] ss:$28 sps:$4 sm:$0xff]   ;;  %v3945_v6 = vld [vmem:[%s4192_s26 + $0x464] ss:$28 sps:$4 sm:$0xff]  }
  0x6f   : > { %1816 = vmatprep.mubr.bf16.mxu1 %v3851_v7  ;;  %2282 = vmatprep.mubr.bf16.mxu0 %v3853_v8  ;;  %v3947_v7 = vld [vmem:[%s4192_s26 + $0x474] ss:$28 sps:$4 sm:$0xff]   ;;  %v3949_v8 = vld [vmem:[%s4192_s26 + $0x460] ss:$28 sps:$4 sm:$0xff]  }
  0x70   : > { %1990 = vmatpush1.bf16.msra.mxu1 %v3918_v9  ;;  %v3950_v9 = vld [vmem:[%s4192_s26 + $0x470] ss:$28 sps:$4 sm:$0xff]  }
  0x71   : > { %1991 = vmatprep.subr.bf16.mxu1 %v4086_v1 }
  0x74   : > { %1992 = vmatpush1.bf16.msra.mxu1 %v3931_v11  ;;  %v3954_v11 = vld [vmem:[%s4192_s26 + $0x4ac] ss:$28 sps:$4 sm:$0xff]  }
  0x75   : > { %1993 = vmatprep.subr.bf16.mxu1 %v4086_v1 }
  0x76   : > { %1817 = vmatmul.mubr.bf16.gmra.mrb[24].mxu1 %v3855_v10  ;;  %2283 = vmatmul.mubr.bf16.gmra.mrb[24].mxu0 %v3856_v12  ;;  %v3952_v10 = vld [vmem:[%s4192_s26 + $0x49c] ss:$28 sps:$4 sm:$0xff]  }
  0x77   : > { %1824 = vmatprep.mubr.bf16.mxu1 %v3858_v13  ;;  %2290 = vmatprep.mubr.bf16.mxu0 %v3860_v14  ;;  %v3956_v12 = vld [vmem:[%s4192_s26 + $0x498] ss:$28 sps:$4 sm:$0xff]   ;;  %v3957_v13 = vld [vmem:[%s4192_s26 + $0x4a8] ss:$28 sps:$4 sm:$0xff]  }
  0x78   : > { %1994 = vmatpush1.bf16.msra.mxu1 %v3940_v15  ;;  %v3958_v14 = vld [vmem:[%s4192_s26 + $0x4d4] ss:$28 sps:$4 sm:$0xff]   ;;  %v3960_v15 = vld [vmem:[%s4192_s26 + $0x4e4] ss:$28 sps:$4 sm:$0xff]  }
  0x79   : > { %1995 = vmatprep.subr.bf16.mxu1 %v4086_v1 }
  0x7c   : > { %1996 = vmatpush1.bf16.msra.mxu1 %v3951_v17  ;;  %v3964_v17 = vld [vmem:[%s4192_s26 + $0x4e0] ss:$28 sps:$4 sm:$0xff]  }
  0x7d   : > { %1997 = vmatprep.subr.bf16.mxu1 %v4086_v1 }
  0x7e   : > { %1825 = vmatmul.mubr.bf16.gmra.mrb[28].mxu1 %v3862_v16  ;;  %2291 = vmatmul.mubr.bf16.gmra.mrb[28].mxu0 %v3863_v18  ;;  %v3962_v16 = vld [vmem:[%s4192_s26 + $0x4d0] ss:$28 sps:$4 sm:$0xff]  }
  0x7f   : > { %1832 = vmatprep.mubr.bf16.mxu1 %v3864_v19  ;;  %2298 = vmatprep.mubr.bf16.mxu0 %v3866_v20  ;;  %v3965_v18 = vld [vmem:[%s4192_s26 + $0x50c] ss:$28 sps:$4 sm:$0xff]   ;;  %v3967_v19 = vld [vmem:[%s4192_s26 + $0x51c] ss:$28 sps:$4 sm:$0xff]  }
  0x80   : > { %1998 = vmatpush1.bf16.msra.mxu1 %v3963_v21  ;;  %v3969_v20 = vld [vmem:[%s4192_s26 + $0x508] ss:$28 sps:$4 sm:$0xff]   ;;  %v3970_v21 = vld [vmem:[%s4192_s26 + $0x518] ss:$28 sps:$4 sm:$0xff]  }
  0x81   : > { %1999 = vmatprep.subr.bf16.mxu1 %v4086_v1  ;;  %v3882_v1 = vld [vmem:[%s4192_s26 + $0x230] ss:$28 sps:$4 sm:$0xff]  }
  0x84   : > { %2000 = vmatpush1.bf16.msra.mxu1 %v3971_v23  ;;  %v3974_v23 = vld [vmem:[%s4192_s26 + $0x554] ss:$28 sps:$4 sm:$0xff]  }
  0x86   : > { %1833 = vmatmul.mubr.bf16.gmra.mrb[32].mxu1 %v3868_v22  ;;  %2299 = vmatmul.mubr.bf16.gmra.mrb[32].mxu0 %v3870_v24  ;;  %v3972_v22 = vld [vmem:[%s4192_s26 + $0x544] ss:$28 sps:$4 sm:$0xff]  }
  0x87   : > { %1840 = vmatprep.mubr.bf16.mxu1 %v3871_v25  ;;  %2306 = vmatprep.mubr.bf16.mxu0 %v3873_v26  ;;  %v3976_v24 = vld [vmem:[%s4192_s26 + $0x540] ss:$28 sps:$4 sm:$0xff]   ;;  %v3977_v25 = vld [vmem:[%s4192_s26 + $0x550] ss:$28 sps:$4 sm:$0xff]  }
  0x88   : > { %v3980_v26 = vld [vmem:[%s4192_s26 + $0xc] ss:$28 sps:$4 sm:$0xff]  }
  0x8e   : > { %1841 = vmatmul.mubr.bf16.gmra.mrb[36].mxu1 %v3875_v27  ;;  %2307 = vmatmul.mubr.bf16.gmra.mrb[36].mxu0 %v3876_v28  ;;  %v3978_v27 = vld [vmem:[%s4192_s26 + $0x8] ss:$28 sps:$4 sm:$0xff]   ;;  %v3981_v28 = vld [vmem:[%s4192_s26 + $0x18] ss:$28 sps:$4 sm:$0xff]  }
  0x8f   : > { %1848 = vmatprep.mubr.bf16.mxu1 %v3878_v29  ;;  %2314 = vmatprep.mubr.bf16.mxu0 %v3880_v30  ;;  %v3982_v29 = vld [vmem:[%s4192_s26 + $0x44] ss:$28 sps:$4 sm:$0xff]  }
  0x90   : > { %v3984_v30 = vld [vmem:[%s4192_s26 + $0x40] ss:$28 sps:$4 sm:$0xff]  }
  0x96   : > { %1849 = vmatmul.mubr.bf16.gmra.mrb[40].mxu1 %v3882_v1  ;;  %2315 = vmatmul.mubr.bf16.gmra.mrb[40].mxu0 %v3883_v31  ;;  %v3985_v1 = vld [vmem:[%s4192_s26 + $0x50] ss:$28 sps:$4 sm:$0xff]   ;;  %v3986_v31 = vld [vmem:[%s4192_s26 + $0x7c] ss:$28 sps:$4 sm:$0xff]  }
  0x97   : > { %1856 = vmatprep.mubr.bf16.mxu1 %v3884_v32  ;;  %2322 = vmatprep.mubr.bf16.mxu0 %v3886_v33  ;;  %v3988_v32 = vld [vmem:[%s4192_s26 + $0x78] ss:$28 sps:$4 sm:$0xff]   ;;  %v3989_v33 = vld [vmem:[%s4192_s26 + $0x88] ss:$28 sps:$4 sm:$0xff]  }
  0x9e   : > { %1857 = vmatmul.mubr.bf16.gmra.mrb[44].mxu1 %v3888_v34  ;;  %2323 = vmatmul.mubr.bf16.gmra.mrb[44].mxu0 %v3889_v35  ;;  %v3990_v34 = vld [vmem:[%s4192_s26 + $0xb4] ss:$28 sps:$4 sm:$0xff]  }
  0x9f   : > { %1864 = vmatprep.mubr.bf16.mxu1 %v3891_v36  ;;  %2330 = vmatprep.mubr.bf16.mxu0 %v3893_v37  ;;  %v3992_v35 = vld [vmem:[%s4192_s26 + $0xb0] ss:$28 sps:$4 sm:$0xff]   ;;  %v3993_v36 = vld [vmem:[%s4192_s26 + $0xc0] ss:$28 sps:$4 sm:$0xff]  }
  0xa0   : > { %v3994_v37 = vld [vmem:[%s4192_s26 + $0xec] ss:$28 sps:$4 sm:$0xff]  }
  0xa6   : > { %1865 = vmatmul.mubr.bf16.gmra.mrb[48].mxu1 %v3895_v38  ;;  %2331 = vmatmul.mubr.bf16.gmra.mrb[48].mxu0 %v3896_v39  ;;  %v3996_v38 = vld [vmem:[%s4192_s26 + $0xe8] ss:$28 sps:$4 sm:$0xff]   ;;  %v3997_v39 = vld [vmem:[%s4192_s26 + $0xf8] ss:$28 sps:$4 sm:$0xff]  }
  0xa7   : > { %1872 = vmatprep.mubr.bf16.mxu1 %v3898_v41  ;;  %2338 = vmatprep.mubr.bf16.mxu0 %v3900_v42  ;;  %v3998_v41 = vld [vmem:[%s4192_s26 + $0x124] ss:$28 sps:$4 sm:$0xff]  }
  0xa8   : > { %v4000_v42 = vld [vmem:[%s4192_s26 + $0x120] ss:$28 sps:$4 sm:$0xff]  }
  0xae   : > { %1873 = vmatmul.mubr.bf16.gmra.mrb[52].mxu1 %v3903_v43  ;;  %2339 = vmatmul.mubr.bf16.gmra.mrb[52].mxu0 %v3904_v44  ;;  %v4001_v43 = vld [vmem:[%s4192_s26 + $0x130] ss:$28 sps:$4 sm:$0xff]   ;;  %v4002_v44 = vld [vmem:[%s4192_s26 + $0x15c] ss:$28 sps:$4 sm:$0xff]  }
  0xaf   : > { %1880 = vmatprep.mubr.bf16.mxu1 %v3905_v45  ;;  %2346 = vmatprep.mubr.bf16.mxu0 %v3907_v46  ;;  %v4004_v45 = vld [vmem:[%s4192_s26 + $0x158] ss:$28 sps:$4 sm:$0xff]   ;;  %v4005_v46 = vld [vmem:[%s4192_s26 + $0x168] ss:$28 sps:$4 sm:$0xff]  }
  0xb6   : > { %1881 = vmatmul.mubr.bf16.gmra.mrb[56].mxu1 %v3909_v47  ;;  %2347 = vmatmul.mubr.bf16.gmra.mrb[56].mxu0 %v3910_v48  ;;  %v4006_v47 = vld [vmem:[%s4192_s26 + $0x194] ss:$28 sps:$4 sm:$0xff]  }
  0xb7   : > { %1888 = vmatprep.mubr.bf16.mxu1 %v3912_v49  ;;  %2354 = vmatprep.mubr.bf16.mxu0 %v3914_v50  ;;  %v4008_v48 = vld [vmem:[%s4192_s26 + $0x190] ss:$28 sps:$4 sm:$0xff]   ;;  %v4009_v49 = vld [vmem:[%s4192_s26 + $0x1a0] ss:$28 sps:$4 sm:$0xff]  }
  0xb8   : > { %v4010_v50 = vld [vmem:[%s4192_s26 + $0x1cc] ss:$28 sps:$4 sm:$0xff]  }
  0xbe   : > { %1889 = vmatmul.mubr.bf16.gmra.mrb[60].mxu1 %v3916_v51  ;;  %2355 = vmatmul.mubr.bf16.gmra.mrb[60].mxu0 %v3917_v52  ;;  %v4012_v51 = vld [vmem:[%s4192_s26 + $0x1c8] ss:$28 sps:$4 sm:$0xff]   ;;  %v4013_v52 = vld [vmem:[%s4192_s26 + $0x1d8] ss:$28 sps:$4 sm:$0xff]  }
  0xbf   : > { %1896 = vmatprep.mubr.bf16.mxu1 %v3919_v53  ;;  %2362 = vmatprep.mubr.bf16.mxu0 %v3921_v54  ;;  %v4014_v53 = vld [vmem:[%s4192_s26 + $0x204] ss:$28 sps:$4 sm:$0xff]  }
  0xc0   : > { %v4016_v54 = vld [vmem:[%s4192_s26 + $0x200] ss:$28 sps:$4 sm:$0xff]  }
  0xc6   : > { %1897 = vmatmul.mubr.bf16.gmra.mrb[64].mxu1 %v3923_v55  ;;  %2363 = vmatmul.mubr.bf16.gmra.mrb[64].mxu0 %v3924_v56  ;;  %v4017_v55 = vld [vmem:[%s4192_s26 + $0x210] ss:$28 sps:$4 sm:$0xff]   ;;  %v4018_v56 = vld [vmem:[%s4192_s26 + $0x23c] ss:$28 sps:$4 sm:$0xff]  }
  0xc7   : > { %1904 = vmatprep.mubr.bf16.mxu1 %v3925_v57  ;;  %2370 = vmatprep.mubr.bf16.mxu0 %v3927_v58  ;;  %v4020_v57 = vld [vmem:[%s4192_s26 + $0x238] ss:$28 sps:$4 sm:$0xff]   ;;  %v4021_v58 = vld [vmem:[%s4192_s26 + $0x248] ss:$28 sps:$4 sm:$0xff]  }
  0xce   : > { %1905 = vmatmul.mubr.bf16.gmra.mrb[68].mxu1 %v3929_v59  ;;  %2371 = vmatmul.mubr.bf16.gmra.mrb[68].mxu0 %v3930_v60  ;;  %v4022_v59 = vld [vmem:[%s4192_s26 + $0x274] ss:$28 sps:$4 sm:$0xff]  }
  0xcf   : > { %1912 = vmatprep.mubr.bf16.mxu1 %v3932_v61  ;;  %2378 = vmatprep.mubr.bf16.mxu0 %v3934_v62  ;;  %v4024_v60 = vld [vmem:[%s4192_s26 + $0x270] ss:$28 sps:$4 sm:$0xff]   ;;  %v4025_v61 = vld [vmem:[%s4192_s26 + $0x280] ss:$28 sps:$4 sm:$0xff]  }
  0xd0   : > { %v4026_v62 = vld [vmem:[%s4192_s26 + $0x2ac] ss:$28 sps:$4 sm:$0xff]  }
  0xd6   : > { %1913 = vmatmul.mubr.bf16.gmra.mrb[72].mxu1 %v3936_v63  ;;  %2379 = vmatmul.mubr.bf16.gmra.mrb[72].mxu0 %v3937_v0  ;;  %v4028_v63 = vld [vmem:[%s4192_s26 + $0x2a8] ss:$28 sps:$4 sm:$0xff]   ;;  %v4029_v0 = vld [vmem:[%s4192_s26 + $0x2b8] ss:$28 sps:$4 sm:$0xff]  }
  0xd7   : > { %1920 = vmatprep.mubr.bf16.mxu1 %v3938_v2  ;;  %2386 = vmatprep.mubr.bf16.mxu0 %v3941_v3  ;;  %v4030_v2 = vld [vmem:[%s4192_s26 + $0x2e4] ss:$28 sps:$4 sm:$0xff]  }
  0xd8   : > { %v4032_v3 = vld [vmem:[%s4192_s26 + $0x2e0] ss:$28 sps:$4 sm:$0xff]  }
  0xde   : > { %1921 = vmatmul.mubr.bf16.gmra.mrb[76].mxu1 %v3943_v4  ;;  %2387 = vmatmul.mubr.bf16.gmra.mrb[76].mxu0 %v3944_v5  ;;  %v4033_v4 = vld [vmem:[%s4192_s26 + $0x2f0] ss:$28 sps:$4 sm:$0xff]   ;;  %v4034_v5 = vld [vmem:[%s4192_s26 + $0x31c] ss:$28 sps:$4 sm:$0xff]  }
  0xdf   : > { %1928 = vmatprep.mubr.bf16.mxu1 %v3945_v6  ;;  %2394 = vmatprep.mubr.bf16.mxu0 %v3947_v7  ;;  %v4036_v6 = vld [vmem:[%s4192_s26 + $0x318] ss:$28 sps:$4 sm:$0xff]   ;;  %v4037_v7 = vld [vmem:[%s4192_s26 + $0x328] ss:$28 sps:$4 sm:$0xff]  }
  0xe6   : > { %1929 = vmatmul.mubr.bf16.gmra.mrb[80].mxu1 %v3949_v8  ;;  %2395 = vmatmul.mubr.bf16.gmra.mrb[80].mxu0 %v3950_v9  ;;  %v4038_v8 = vld [vmem:[%s4192_s26 + $0x354] ss:$28 sps:$4 sm:$0xff]  }
  0xe7   : > { %1936 = vmatprep.mubr.bf16.mxu1 %v3952_v10  ;;  %2402 = vmatprep.mubr.bf16.mxu0 %v3954_v11  ;;  %v4040_v9 = vld [vmem:[%s4192_s26 + $0x350] ss:$28 sps:$4 sm:$0xff]   ;;  %v4041_v10 = vld [vmem:[%s4192_s26 + $0x360] ss:$28 sps:$4 sm:$0xff]  }
  0xe8   : > { %v4042_v11 = vld [vmem:[%s4192_s26 + $0x38c] ss:$28 sps:$4 sm:$0xff]  }
  0xee   : > { %1937 = vmatmul.mubr.bf16.gmra.mrb[84].mxu1 %v3956_v12  ;;  %2403 = vmatmul.mubr.bf16.gmra.mrb[84].mxu0 %v3957_v13  ;;  %v4044_v12 = vld [vmem:[%s4192_s26 + $0x388] ss:$28 sps:$4 sm:$0xff]   ;;  %v4045_v13 = vld [vmem:[%s4192_s26 + $0x398] ss:$28 sps:$4 sm:$0xff]  }
  0xef   : > { %1944 = vmatprep.mubr.bf16.mxu1 %v3958_v14  ;;  %2410 = vmatprep.mubr.bf16.mxu0 %v3960_v15  ;;  %v4046_v14 = vld [vmem:[%s4192_s26 + $0x3c4] ss:$28 sps:$4 sm:$0xff]  }
  0xf0   : > { %v4048_v15 = vld [vmem:[%s4192_s26 + $0x3c0] ss:$28 sps:$4 sm:$0xff]  }
  0xf6   : > { %1945 = vmatmul.mubr.bf16.gmra.mrb[88].mxu1 %v3962_v16  ;;  %2411 = vmatmul.mubr.bf16.gmra.mrb[88].mxu0 %v3964_v17  ;;  %v4049_v16 = vld [vmem:[%s4192_s26 + $0x3d0] ss:$28 sps:$4 sm:$0xff]   ;;  %v4050_v17 = vld [vmem:[%s4192_s26 + $0x3fc] ss:$28 sps:$4 sm:$0xff]  }
  0xf7   : > { %1952 = vmatprep.mubr.bf16.mxu1 %v3965_v18  ;;  %2418 = vmatprep.mubr.bf16.mxu0 %v3967_v19  ;;  %v4052_v18 = vld [vmem:[%s4192_s26 + $0x3f8] ss:$28 sps:$4 sm:$0xff]   ;;  %v4053_v19 = vld [vmem:[%s4192_s26 + $0x408] ss:$28 sps:$4 sm:$0xff]  }
  0xfe   : > { %1953 = vmatmul.mubr.bf16.gmra.mrb[92].mxu1 %v3969_v20  ;;  %2419 = vmatmul.mubr.bf16.gmra.mrb[92].mxu0 %v3970_v21  ;;  %v4054_v20 = vld [vmem:[%s4192_s26 + $0x434] ss:$28 sps:$4 sm:$0xff]  }
  0xff   : > { %1960 = vmatprep.mubr.bf16.mxu1 %v3972_v22  ;;  %2426 = vmatprep.mubr.bf16.mxu0 %v3974_v23  ;;  %v4056_v21 = vld [vmem:[%s4192_s26 + $0x430] ss:$28 sps:$4 sm:$0xff]   ;;  %v4057_v22 = vld [vmem:[%s4192_s26 + $0x440] ss:$28 sps:$4 sm:$0xff]  }
 0x100   : > { %v4058_v23 = vld [vmem:[%s4192_s26 + $0x46c] ss:$28 sps:$4 sm:$0xff]  }
 0x106   : > { %1961 = vmatmul.mubr.bf16.gmra.mrb[96].mxu1 %v3976_v24  ;;  %2427 = vmatmul.mubr.bf16.gmra.mrb[96].mxu0 %v3977_v25  ;;  %v4060_v24 = vld [vmem:[%s4192_s26 + $0x468] ss:$28 sps:$4 sm:$0xff]   ;;  %v4061_v25 = vld [vmem:[%s4192_s26 + $0x478] ss:$28 sps:$4 sm:$0xff]  }
 0x107   : > { %2001 = vmatprep.mubr.bf16.mxu1 %v3980_v26  ;;  %3366 = vmatprep.mubr.msk.bf16.mxu0 %vm4088_vm0, %v4087_v40  ;;  %v4062_v26 = vld [vmem:[%s4192_s26 + $0x4a4] ss:$28 sps:$4 sm:$0xff]  }
 0x10e   : > { %2002 = vmatmul.mubr.bf16.vlgmr.msra.gmra.mrb[0].mxu1 %v3978_v27  ;;  %3367 = vmatmul.mubr.msk.bf16.vlgmr.msra.gmra.mrb[0].mxu0 %vm1660_vm1, %v3981_v28  ;;  %v4064_v27 = vld [vmem:[%s4192_s26 + $0x4a0] ss:$28 sps:$4 sm:$0xff]   ;;  %v4065_v28 = vld [vmem:[%s4192_s26 + $0x4b0] ss:$28 sps:$4 sm:$0xff]  }
 0x10f   : > { %2009 = vmatprep.mubr.bf16.mxu1 %v3982_v29  ;;  %3370 = vmatprep.mubr.msk.bf16.mxu0 %vm4088_vm0, %v4087_v40  ;;  %v4066_v29 = vld [vmem:[%s4192_s26 + $0x4dc] ss:$28 sps:$4 sm:$0xff]  }
 0x116   : > { %2010 = vmatmul.mubr.bf16.gmra.mrb[4].mxu1 %v3984_v30  ;;  %3371 = vmatmul.mubr.msk.bf16.gmra.mrb[4].mxu0 %vm1660_vm1, %v3985_v1  ;;  %v4068_v30 = vld [vmem:[%s4192_s26 + $0x4d8] ss:$28 sps:$4 sm:$0xff]   ;;  %v4069_v1 = vld [vmem:[%s4192_s26 + $0x4e8] ss:$28 sps:$4 sm:$0xff]  }
 0x117   : > { %2017 = vmatprep.mubr.bf16.mxu1 %v3986_v31  ;;  %3374 = vmatprep.mubr.msk.bf16.mxu0 %vm4088_vm0, %v4087_v40  ;;  %v4070_v31 = vld [vmem:[%s4192_s26 + $0x514] ss:$28 sps:$4 sm:$0xff]  }
 0x11e   : > { %2018 = vmatmul.mubr.bf16.gmra.mrb[8].mxu1 %v3988_v32  ;;  %3375 = vmatmul.mubr.msk.bf16.gmra.mrb[8].mxu0 %vm1660_vm1, %v3989_v33  ;;  %v4072_v32 = vld [vmem:[%s4192_s26 + $0x510] ss:$28 sps:$4 sm:$0xff]   ;;  %v4073_v33 = vld [vmem:[%s4192_s26 + $0x520] ss:$28 sps:$4 sm:$0xff]  }
 0x11f   : > { %2025 = vmatprep.mubr.bf16.mxu1 %v3990_v34  ;;  %3378 = vmatprep.mubr.msk.bf16.mxu0 %vm4088_vm0, %v4087_v40  ;;  %v4074_v34 = vld [vmem:[%s4192_s26 + $0x54c] ss:$28 sps:$4 sm:$0xff]  }
 0x126   : > { %2026 = vmatmul.mubr.bf16.gmra.mrb[12].mxu1 %v3992_v35  ;;  %3379 = vmatmul.mubr.msk.bf16.gmra.mrb[12].mxu0 %vm1660_vm1, %v3993_v36  ;;  %v4076_v35 = vld [vmem:[%s4192_s26 + $0x548] ss:$28 sps:$4 sm:$0xff]   ;;  %v4077_v36 = vld [vmem:[%s4192_s26 + $0x558] ss:$28 sps:$4 sm:$0xff]  }
 0x127   : > { %2033 = vmatprep.mubr.bf16.mxu1 %v3994_v37  ;;  %3382 = vmatprep.mubr.msk.bf16.mxu0 %vm4088_vm0, %v4087_v40  ;;  %v4580_v37 = vld [vmem:[%s4743_s2] ss:$0 sm:$0xff] }
 0x12e   : > { %2034 = vmatmul.mubr.bf16.gmra.mrb[16].mxu1 %v3996_v38  ;;  %3383 = vmatmul.mubr.msk.bf16.gmra.mrb[16].mxu0 %vm1660_vm1, %v3997_v39 }
 0x12f   : > { %2041 = vmatprep.mubr.bf16.mxu1 %v3998_v41  ;;  %3386 = vmatprep.mubr.msk.bf16.mxu0 %vm4088_vm0, %v4087_v40 }
 0x136   : > { %2042 = vmatmul.mubr.bf16.gmra.mrb[20].mxu1 %v4000_v42  ;;  %3387 = vmatmul.mubr.msk.bf16.gmra.mrb[20].mxu0 %vm1660_vm1, %v4001_v43 }
 0x137   : > { %2049 = vmatprep.mubr.bf16.mxu1 %v4002_v44  ;;  %3390 = vmatprep.mubr.msk.bf16.mxu0 %vm4088_vm0, %v4087_v40 }
 0x13e   : > { %2050 = vmatmul.mubr.bf16.gmra.mrb[24].mxu1 %v4004_v45  ;;  %3391 = vmatmul.mubr.msk.bf16.gmra.mrb[24].mxu0 %vm1660_vm1, %v4005_v46 }
 0x13f   : > { %2057 = vmatprep.mubr.bf16.mxu1 %v4006_v47  ;;  %3394 = vmatprep.mubr.msk.bf16.mxu0 %vm4088_vm0, %v4087_v40 }
 0x146   : > { %2058 = vmatmul.mubr.bf16.gmra.mrb[28].mxu1 %v4008_v48  ;;  %3395 = vmatmul.mubr.msk.bf16.gmra.mrb[28].mxu0 %vm1660_vm1, %v4009_v49 }
 0x147   : > { %2065 = vmatprep.mubr.bf16.mxu1 %v4010_v50  ;;  %3398 = vmatprep.mubr.msk.bf16.mxu0 %vm4088_vm0, %v4087_v40 }
 0x14e   : > { %2066 = vmatmul.mubr.bf16.gmra.mrb[32].mxu1 %v4012_v51  ;;  %3399 = vmatmul.mubr.msk.bf16.gmra.mrb[32].mxu0 %vm1660_vm1, %v4013_v52 }
 0x14f   : > { %2073 = vmatprep.mubr.bf16.mxu1 %v4014_v53  ;;  %3402 = vmatprep.mubr.msk.bf16.mxu0 %vm4088_vm0, %v4087_v40 }
 0x156   : > { %2074 = vmatmul.mubr.bf16.gmra.mrb[36].mxu1 %v4016_v54  ;;  %3403 = vmatmul.mubr.msk.bf16.gmra.mrb[36].mxu0 %vm1660_vm1, %v4017_v55 }
 0x157   : > { %2081 = vmatprep.mubr.bf16.mxu1 %v4018_v56  ;;  %3406 = vmatprep.mubr.msk.bf16.mxu0 %vm4088_vm0, %v4087_v40 }
 0x15e   : > { %2082 = vmatmul.mubr.bf16.gmra.mrb[40].mxu1 %v4020_v57  ;;  %3407 = vmatmul.mubr.msk.bf16.gmra.mrb[40].mxu0 %vm1660_vm1, %v4021_v58 }
 0x15f   : > { %2089 = vmatprep.mubr.bf16.mxu1 %v4022_v59  ;;  %3410 = vmatprep.mubr.msk.bf16.mxu0 %vm4088_vm0, %v4087_v40 }
 0x166   : > { %2090 = vmatmul.mubr.bf16.gmra.mrb[44].mxu1 %v4024_v60  ;;  %3411 = vmatmul.mubr.msk.bf16.gmra.mrb[44].mxu0 %vm1660_vm1, %v4025_v61 }
 0x167   : > { %2097 = vmatprep.mubr.bf16.mxu1 %v4026_v62  ;;  %3414 = vmatprep.mubr.msk.bf16.mxu0 %vm4088_vm0, %v4087_v40 }
 0x16e   : > { %2098 = vmatmul.mubr.bf16.gmra.mrb[48].mxu1 %v4028_v63  ;;  %3415 = vmatmul.mubr.msk.bf16.gmra.mrb[48].mxu0 %vm1660_vm1, %v4029_v0 }
 0x16f   : > { %2105 = vmatprep.mubr.bf16.mxu1 %v4030_v2  ;;  %3418 = vmatprep.mubr.msk.bf16.mxu0 %vm4088_vm0, %v4087_v40 }
 0x176   : > { %2106 = vmatmul.mubr.bf16.gmra.mrb[52].mxu1 %v4032_v3  ;;  %3419 = vmatmul.mubr.msk.bf16.gmra.mrb[52].mxu0 %vm1660_vm1, %v4033_v4 }
 0x177   : > { %2113 = vmatprep.mubr.bf16.mxu1 %v4034_v5  ;;  %3422 = vmatprep.mubr.msk.bf16.mxu0 %vm4088_vm0, %v4087_v40 }
 0x17e   : > { %2114 = vmatmul.mubr.bf16.gmra.mrb[56].mxu1 %v4036_v6  ;;  %3423 = vmatmul.mubr.msk.bf16.gmra.mrb[56].mxu0 %vm1660_vm1, %v4037_v7 }
 0x17f   : > { %2121 = vmatprep.mubr.bf16.mxu1 %v4038_v8  ;;  %3426 = vmatprep.mubr.msk.bf16.mxu0 %vm4088_vm0, %v4087_v40 }
 0x186   : > { %2122 = vmatmul.mubr.bf16.gmra.mrb[60].mxu1 %v4040_v9  ;;  %3427 = vmatmul.mubr.msk.bf16.gmra.mrb[60].mxu0 %vm1660_vm1, %v4041_v10 }
 0x187   : > { %2129 = vmatprep.mubr.bf16.mxu1 %v4042_v11  ;;  %3430 = vmatprep.mubr.msk.bf16.mxu0 %vm4088_vm0, %v4087_v40 }
 0x18e   : > { %2130 = vmatmul.mubr.bf16.gmra.mrb[64].mxu1 %v4044_v12  ;;  %3431 = vmatmul.mubr.msk.bf16.gmra.mrb[64].mxu0 %vm1660_vm1, %v4045_v13 }
 0x18f   : > { %2137 = vmatprep.mubr.bf16.mxu1 %v4046_v14  ;;  %3434 = vmatprep.mubr.msk.bf16.mxu0 %vm4088_vm0, %v4087_v40 }
 0x196   : > { %2138 = vmatmul.mubr.bf16.gmra.mrb[68].mxu1 %v4048_v15  ;;  %3435 = vmatmul.mubr.msk.bf16.gmra.mrb[68].mxu0 %vm1660_vm1, %v4049_v16 }
 0x197   : > { %2145 = vmatprep.mubr.bf16.mxu1 %v4050_v17  ;;  %3438 = vmatprep.mubr.msk.bf16.mxu0 %vm4088_vm0, %v4087_v40 }
 0x19e   : > { %2146 = vmatmul.mubr.bf16.gmra.mrb[72].mxu1 %v4052_v18  ;;  %3439 = vmatmul.mubr.msk.bf16.gmra.mrb[72].mxu0 %vm1660_vm1, %v4053_v19 }
 0x19f   : > { %2153 = vmatprep.mubr.bf16.mxu1 %v4054_v20  ;;  %3442 = vmatprep.mubr.msk.bf16.mxu0 %vm4088_vm0, %v4087_v40 }
 0x1a6   : > { %2154 = vmatmul.mubr.bf16.gmra.mrb[76].mxu1 %v4056_v21  ;;  %3443 = vmatmul.mubr.msk.bf16.gmra.mrb[76].mxu0 %vm1660_vm1, %v4057_v22 }
 0x1a7   : > { %2161 = vmatprep.mubr.bf16.mxu1 %v4058_v23  ;;  %3446 = vmatprep.mubr.msk.bf16.mxu0 %vm4088_vm0, %v4087_v40 }
 0x1ae   : > { %2162 = vmatmul.mubr.bf16.gmra.mrb[80].mxu1 %v4060_v24  ;;  %3447 = vmatmul.mubr.msk.bf16.gmra.mrb[80].mxu0 %vm1660_vm1, %v4061_v25 }
 0x1af   : > { %2169 = vmatprep.mubr.bf16.mxu1 %v4062_v26  ;;  %3450 = vmatprep.mubr.msk.bf16.mxu0 %vm4088_vm0, %v4087_v40 }
 0x1b6   : > { %2170 = vmatmul.mubr.bf16.gmra.mrb[84].mxu1 %v4064_v27  ;;  %3451 = vmatmul.mubr.msk.bf16.gmra.mrb[84].mxu0 %vm1660_vm1, %v4065_v28 }
 0x1b7   : > { %2177 = vmatprep.mubr.bf16.mxu1 %v4066_v29  ;;  %3454 = vmatprep.mubr.msk.bf16.mxu0 %vm4088_vm0, %v4087_v40 }
 0x1be   : > { %2178 = vmatmul.mubr.bf16.gmra.mrb[88].mxu1 %v4068_v30  ;;  %3455 = vmatmul.mubr.msk.bf16.gmra.mrb[88].mxu0 %vm1660_vm1, %v4069_v1 }
 0x1bf   : > { %2185 = vmatprep.mubr.bf16.mxu1 %v4070_v31  ;;  %3458 = vmatprep.mubr.msk.bf16.mxu0 %vm4088_vm0, %v4087_v40 }
 0x1c6   : > { %2186 = vmatmul.mubr.bf16.gmra.mrb[92].mxu1 %v4072_v32  ;;  %3459 = vmatmul.mubr.msk.bf16.gmra.mrb[92].mxu0 %vm1660_vm1, %v4073_v33 }
 0x1c7   : > { %2193 = vmatprep.mubr.bf16.mxu1 %v4074_v34  ;;  %3462 = vmatprep.mubr.msk.bf16.mxu0 %vm4088_vm0, %v4087_v40 }
 0x1ce   : > { %2194 = vmatmul.mubr.bf16.gmra.mrb[96].mxu1 %v4076_v35  ;;  %3463 = vmatmul.mubr.msk.bf16.gmra.mrb[96].mxu0 %vm1660_vm1, %v4077_v36 }
 0x1e1   : > { %v2003_v38 = vpop.f32.mrb[0].mxu1  ;;  %v2469_v41 = vpop.f32.mrb[0].mxu0 }
 0x1e2   : > { %v3466_v39 = vadd.f32 %v4580_v37, %v2003_v38  ;;  %v2005_v42 = vpop.f32.mrb[1].mxu1  ;;  %v3368_v43 = vpop.f32.mrb[1].mxu0 }
 0x1e3   : > { %v2006_v44 = vpop.f32.mrb[2].mxu1  ;;  %v2472_v46 = vpop.f32.mrb[2].mxu0 }
 0x1e4   : > { %v3467_v45 = vadd.f32 %v3466_v39, %v2469_v41  ;;  %v3468_v40 = vadd.f32 %v4580_v37, %v2006_v44  ;;  %v2008_v47 = vpop.f32.mrb[3].mxu1  ;;  %v3369_v48 = vpop.f32.mrb[3].mxu0 }
 0x1e6   : > { %v3285_v49 = vpack.c.bf16 %v3467_v45, %v3467_v45  ;;  %v3469_v50 = vadd.f32 %v3468_v40, %v2472_v46 }
 0x1e8   : > { %2869 = vst.msk [vmem:[%s4588_s24] sm:$0xf] %vm2868_vm2, %v3285_v49  ;;  %v3286_v51 = vpack.c.bf16 %v3469_v50, %v3469_v50 }
 0x1e9   : > { %v2011_v52 = vpop.f32.mrb[4].mxu1  ;;  %v2477_v54 = vpop.f32.mrb[4].mxu0 }
 0x1ea   : > { %2870 = vst.msk [vmem:[%s4588_s24 + $0x4] sm:$0xf] %vm2868_vm2, %v3286_v51  ;;  %v3470_v53 = vadd.f32 %v4580_v37, %v2011_v52  ;;  %v2013_v55 = vpop.f32.mrb[5].mxu1  ;;  %v3372_v56 = vpop.f32.mrb[5].mxu0 }
 0x1eb   : > { %v2014_v57 = vpop.f32.mrb[6].mxu1  ;;  %v2480_v60 = vpop.f32.mrb[6].mxu0 }
 0x1ec   : > { %v3471_v58 = vadd.f32 %v3470_v53, %v2477_v54  ;;  %v3472_v59 = vadd.f32 %v4580_v37, %v2014_v57  ;;  %v2016_v61 = vpop.f32.mrb[7].mxu1  ;;  %v3373_v62 = vpop.f32.mrb[7].mxu0 }
 0x1ee   : > { %v3287_v63 = vpack.c.bf16 %v3471_v58, %v3471_v58  ;;  %v3473_v0 = vadd.f32 %v3472_v59, %v2480_v60 }
 0x1f0   : > { %2871 = vst.msk [vmem:[%s4588_s24 + $0x8] sm:$0xf] %vm2868_vm2, %v3287_v63  ;;  %v3288_v2 = vpack.c.bf16 %v3473_v0, %v3473_v0 }
 0x1f1   : > { %v2019_v3 = vpop.f32.mrb[8].mxu1  ;;  %v2485_v5 = vpop.f32.mrb[8].mxu0 }
 0x1f2   : > { %2872 = vst.msk [vmem:[%s4588_s24 + $0xc] sm:$0xf] %vm2868_vm2, %v3288_v2  ;;  %v3474_v4 = vadd.f32 %v4580_v37, %v2019_v3  ;;  %v2021_v6 = vpop.f32.mrb[9].mxu1  ;;  %v3376_v7 = vpop.f32.mrb[9].mxu0 }
 0x1f3   : > { %v2022_v8 = vpop.f32.mrb[10].mxu1  ;;  %v2488_v11 = vpop.f32.mrb[10].mxu0 }
 0x1f4   : > { %v3475_v9 = vadd.f32 %v3474_v4, %v2485_v5  ;;  %v3476_v10 = vadd.f32 %v4580_v37, %v2022_v8  ;;  %v2024_v12 = vpop.f32.mrb[11].mxu1  ;;  %v3377_v13 = vpop.f32.mrb[11].mxu0 }
 0x1f6   : > { %v3289_v14 = vpack.c.bf16 %v3475_v9, %v3475_v9  ;;  %v3477_v15 = vadd.f32 %v3476_v10, %v2488_v11 }
 0x1f8   : > { %2873 = vst.msk [vmem:[%s4588_s24 + $0x10] sm:$0xf] %vm2868_vm2, %v3289_v14  ;;  %v3290_v16 = vpack.c.bf16 %v3477_v15, %v3477_v15 }
 0x1f9   : > { %v2027_v17 = vpop.f32.mrb[12].mxu1  ;;  %v2493_v19 = vpop.f32.mrb[12].mxu0 }
 0x1fa   : > { %2874 = vst.msk [vmem:[%s4588_s24 + $0x14] sm:$0xf] %vm2868_vm2, %v3290_v16  ;;  %v3478_v18 = vadd.f32 %v4580_v37, %v2027_v17  ;;  %v2029_v20 = vpop.f32.mrb[13].mxu1  ;;  %v3380_v21 = vpop.f32.mrb[13].mxu0 }
 0x1fb   : > { %v2030_v22 = vpop.f32.mrb[14].mxu1  ;;  %v2496_v25 = vpop.f32.mrb[14].mxu0 }
 0x1fc   : > { %v3479_v23 = vadd.f32 %v3478_v18, %v2493_v19  ;;  %v3480_v24 = vadd.f32 %v4580_v37, %v2030_v22  ;;  %v2032_v26 = vpop.f32.mrb[15].mxu1  ;;  %v3381_v27 = vpop.f32.mrb[15].mxu0 }
 0x1fe   : > { %v3291_v28 = vpack.c.bf16 %v3479_v23, %v3479_v23  ;;  %v3481_v29 = vadd.f32 %v3480_v24, %v2496_v25 }
 0x200   : > { %2875 = vst.msk [vmem:[%s4588_s24 + $0x18] sm:$0xf] %vm2868_vm2, %v3291_v28  ;;  %v3292_v30 = vpack.c.bf16 %v3481_v29, %v3481_v29 }
 0x201   : > { %v2035_v1 = vpop.f32.mrb[16].mxu1  ;;  %v2501_v32 = vpop.f32.mrb[16].mxu0 }
 0x202   : > { %2876 = vst.msk [vmem:[%s4588_s24 + $0x1c] sm:$0xf] %vm2868_vm2, %v3292_v30  ;;  %v3482_v31 = vadd.f32 %v4580_v37, %v2035_v1  ;;  %v2037_v33 = vpop.f32.mrb[17].mxu1  ;;  %v3384_v34 = vpop.f32.mrb[17].mxu0 }
 0x203   : > { %v2038_v35 = vpop.f32.mrb[18].mxu1  ;;  %v2504_v39 = vpop.f32.mrb[18].mxu0 }
 0x204   : > { %v3483_v36 = vadd.f32 %v3482_v31, %v2501_v32  ;;  %v3484_v38 = vadd.f32 %v4580_v37, %v2038_v35  ;;  %v2040_v41 = vpop.f32.mrb[19].mxu1  ;;  %v3385_v42 = vpop.f32.mrb[19].mxu0 }
 0x206   : > { %v3293_v43 = vpack.c.bf16 %v3483_v36, %v3483_v36  ;;  %v3485_v44 = vadd.f32 %v3484_v38, %v2504_v39 }
 0x208   : > { %2877 = vst.msk [vmem:[%s4588_s24 + $0x20] sm:$0xf] %vm2868_vm2, %v3293_v43  ;;  %v3294_v45 = vpack.c.bf16 %v3485_v44, %v3485_v44 }
 0x209   : > { %v2043_v40 = vpop.f32.mrb[20].mxu1  ;;  %v2509_v47 = vpop.f32.mrb[20].mxu0 }
 0x20a   : > { %2878 = vst.msk [vmem:[%s4588_s24 + $0x24] sm:$0xf] %vm2868_vm2, %v3294_v45  ;;  %v3486_v46 = vadd.f32 %v4580_v37, %v2043_v40  ;;  %v2045_v48 = vpop.f32.mrb[21].mxu1  ;;  %v3388_v49 = vpop.f32.mrb[21].mxu0 }
 0x20b   : > { %v2046_v50 = vpop.f32.mrb[22].mxu1  ;;  %v2512_v53 = vpop.f32.mrb[22].mxu0 }
 0x20c   : > { %v3487_v51 = vadd.f32 %v3486_v46, %v2509_v47  ;;  %v3488_v52 = vadd.f32 %v4580_v37, %v2046_v50  ;;  %v2048_v54 = vpop.f32.mrb[23].mxu1  ;;  %v3389_v55 = vpop.f32.mrb[23].mxu0 }
 0x20e   : > { %v3295_v56 = vpack.c.bf16 %v3487_v51, %v3487_v51  ;;  %v3489_v57 = vadd.f32 %v3488_v52, %v2512_v53 }
 0x210   : > { %2879 = vst.msk [vmem:[%s4588_s24 + $0x28] sm:$0xf] %vm2868_vm2, %v3295_v56  ;;  %v3296_v58 = vpack.c.bf16 %v3489_v57, %v3489_v57 }
 0x211   : > { %v2051_v59 = vpop.f32.mrb[24].mxu1  ;;  %v2517_v61 = vpop.f32.mrb[24].mxu0 }
 0x212   : > { %2880 = vst.msk [vmem:[%s4588_s24 + $0x2c] sm:$0xf] %vm2868_vm2, %v3296_v58  ;;  %v3490_v60 = vadd.f32 %v4580_v37, %v2051_v59  ;;  %v2053_v62 = vpop.f32.mrb[25].mxu1  ;;  %v3392_v63 = vpop.f32.mrb[25].mxu0 }
 0x213   : > { %v2054_v0 = vpop.f32.mrb[26].mxu1  ;;  %v2520_v4 = vpop.f32.mrb[26].mxu0 }
 0x214   : > { %v3491_v2 = vadd.f32 %v3490_v60, %v2517_v61  ;;  %v3492_v3 = vadd.f32 %v4580_v37, %v2054_v0  ;;  %v2056_v5 = vpop.f32.mrb[27].mxu1  ;;  %v3393_v6 = vpop.f32.mrb[27].mxu0 }
 0x216   : > { %v3297_v7 = vpack.c.bf16 %v3491_v2, %v3491_v2  ;;  %v3493_v8 = vadd.f32 %v3492_v3, %v2520_v4 }
 0x218   : > { %2881 = vst.msk [vmem:[%s4588_s24 + $0x30] sm:$0xf] %vm2868_vm2, %v3297_v7  ;;  %v3298_v9 = vpack.c.bf16 %v3493_v8, %v3493_v8 }
 0x219   : > { %v2059_v10 = vpop.f32.mrb[28].mxu1  ;;  %v2525_v12 = vpop.f32.mrb[28].mxu0 }
 0x21a   : > { %2882 = vst.msk [vmem:[%s4588_s24 + $0x34] sm:$0xf] %vm2868_vm2, %v3298_v9  ;;  %v3494_v11 = vadd.f32 %v4580_v37, %v2059_v10  ;;  %v2061_v13 = vpop.f32.mrb[29].mxu1  ;;  %v3396_v14 = vpop.f32.mrb[29].mxu0 }
 0x21b   : > { %v2062_v15 = vpop.f32.mrb[30].mxu1  ;;  %v2528_v18 = vpop.f32.mrb[30].mxu0 }
 0x21c   : > { %v3495_v16 = vadd.f32 %v3494_v11, %v2525_v12  ;;  %v3496_v17 = vadd.f32 %v4580_v37, %v2062_v15  ;;  %v2064_v19 = vpop.f32.mrb[31].mxu1  ;;  %v3397_v20 = vpop.f32.mrb[31].mxu0 }
 0x21e   : > { %v3299_v21 = vpack.c.bf16 %v3495_v16, %v3495_v16  ;;  %v3497_v22 = vadd.f32 %v3496_v17, %v2528_v18 }
 0x220   : > { %2883 = vst.msk [vmem:[%s4588_s24 + $0x38] sm:$0xf] %vm2868_vm2, %v3299_v21  ;;  %v3300_v23 = vpack.c.bf16 %v3497_v22, %v3497_v22 }
 0x221   : > { %v2067_v24 = vpop.f32.mrb[32].mxu1  ;;  %v2533_v26 = vpop.f32.mrb[32].mxu0 }
 0x222   : > { %2884 = vst.msk [vmem:[%s4588_s24 + $0x3c] sm:$0xf] %vm2868_vm2, %v3300_v23  ;;  %v3498_v25 = vadd.f32 %v4580_v37, %v2067_v24  ;;  %v2069_v27 = vpop.f32.mrb[33].mxu1  ;;  %v3400_v28 = vpop.f32.mrb[33].mxu0 }
 0x223   : > { %v2070_v29 = vpop.f32.mrb[34].mxu1  ;;  %v2536_v31 = vpop.f32.mrb[34].mxu0 }
 0x224   : > { %v3499_v30 = vadd.f32 %v3498_v25, %v2533_v26  ;;  %v3500_v1 = vadd.f32 %v4580_v37, %v2070_v29  ;;  %v2072_v32 = vpop.f32.mrb[35].mxu1  ;;  %v3401_v33 = vpop.f32.mrb[35].mxu0 }
 0x226   : > { %v3301_v34 = vpack.c.bf16 %v3499_v30, %v3499_v30  ;;  %v3501_v35 = vadd.f32 %v3500_v1, %v2536_v31 }
 0x228   : > { %2885 = vst.msk [vmem:[%s4588_s24 + $0x40] sm:$0xf] %vm2868_vm2, %v3301_v34  ;;  %v3302_v36 = vpack.c.bf16 %v3501_v35, %v3501_v35 }
 0x229   : > { %v2075_v38 = vpop.f32.mrb[36].mxu1  ;;  %v2541_v41 = vpop.f32.mrb[36].mxu0 }
 0x22a   : > { %2886 = vst.msk [vmem:[%s4588_s24 + $0x44] sm:$0xf] %vm2868_vm2, %v3302_v36  ;;  %v3502_v39 = vadd.f32 %v4580_v37, %v2075_v38  ;;  %v2077_v42 = vpop.f32.mrb[37].mxu1  ;;  %v3404_v43 = vpop.f32.mrb[37].mxu0 }
 0x22b   : > { %v2078_v44 = vpop.f32.mrb[38].mxu1  ;;  %v2544_v46 = vpop.f32.mrb[38].mxu0 }
 0x22c   : > { %v3503_v45 = vadd.f32 %v3502_v39, %v2541_v41  ;;  %v3504_v40 = vadd.f32 %v4580_v37, %v2078_v44  ;;  %v2080_v47 = vpop.f32.mrb[39].mxu1  ;;  %v3405_v48 = vpop.f32.mrb[39].mxu0 }
 0x22e   : > { %v3303_v49 = vpack.c.bf16 %v3503_v45, %v3503_v45  ;;  %v3505_v50 = vadd.f32 %v3504_v40, %v2544_v46 }
 0x230   : > { %2887 = vst.msk [vmem:[%s4588_s24 + $0x48] sm:$0xf] %vm2868_vm2, %v3303_v49  ;;  %v3304_v51 = vpack.c.bf16 %v3505_v50, %v3505_v50 }
 0x231   : > { %v2083_v52 = vpop.f32.mrb[40].mxu1  ;;  %v2549_v54 = vpop.f32.mrb[40].mxu0 }
 0x232   : > { %2888 = vst.msk [vmem:[%s4588_s24 + $0x4c] sm:$0xf] %vm2868_vm2, %v3304_v51  ;;  %v3506_v53 = vadd.f32 %v4580_v37, %v2083_v52  ;;  %v2085_v55 = vpop.f32.mrb[41].mxu1  ;;  %v3408_v56 = vpop.f32.mrb[41].mxu0 }
 0x233   : > { %v2086_v57 = vpop.f32.mrb[42].mxu1  ;;  %v2552_v60 = vpop.f32.mrb[42].mxu0 }
 0x234   : > { %v3507_v58 = vadd.f32 %v3506_v53, %v2549_v54  ;;  %v3508_v59 = vadd.f32 %v4580_v37, %v2086_v57  ;;  %v2088_v61 = vpop.f32.mrb[43].mxu1  ;;  %v3409_v62 = vpop.f32.mrb[43].mxu0 }
 0x236   : > { %v3305_v63 = vpack.c.bf16 %v3507_v58, %v3507_v58  ;;  %v3509_v0 = vadd.f32 %v3508_v59, %v2552_v60 }
 0x238   : > { %2889 = vst.msk [vmem:[%s4588_s24 + $0x50] sm:$0xf] %vm2868_vm2, %v3305_v63  ;;  %v3306_v2 = vpack.c.bf16 %v3509_v0, %v3509_v0 }
 0x239   : > { %v2091_v3 = vpop.f32.mrb[44].mxu1  ;;  %v2557_v5 = vpop.f32.mrb[44].mxu0 }
 0x23a   : > { %2890 = vst.msk [vmem:[%s4588_s24 + $0x54] sm:$0xf] %vm2868_vm2, %v3306_v2  ;;  %v3510_v4 = vadd.f32 %v4580_v37, %v2091_v3  ;;  %v2093_v6 = vpop.f32.mrb[45].mxu1  ;;  %v3412_v7 = vpop.f32.mrb[45].mxu0 }
 0x23b   : > { %v2094_v8 = vpop.f32.mrb[46].mxu1  ;;  %v2560_v11 = vpop.f32.mrb[46].mxu0 }
 0x23c   : > { %v3511_v9 = vadd.f32 %v3510_v4, %v2557_v5  ;;  %v3512_v10 = vadd.f32 %v4580_v37, %v2094_v8  ;;  %v2096_v12 = vpop.f32.mrb[47].mxu1  ;;  %v3413_v13 = vpop.f32.mrb[47].mxu0 }
 0x23e   : > { %v3307_v14 = vpack.c.bf16 %v3511_v9, %v3511_v9  ;;  %v3513_v15 = vadd.f32 %v3512_v10, %v2560_v11 }
 0x240   : > { %2891 = vst.msk [vmem:[%s4588_s24 + $0x58] sm:$0xf] %vm2868_vm2, %v3307_v14  ;;  %v3308_v16 = vpack.c.bf16 %v3513_v15, %v3513_v15 }
 0x241   : > { %v2099_v17 = vpop.f32.mrb[48].mxu1  ;;  %v2565_v19 = vpop.f32.mrb[48].mxu0 }
 0x242   : > { %2892 = vst.msk [vmem:[%s4588_s24 + $0x5c] sm:$0xf] %vm2868_vm2, %v3308_v16  ;;  %v3514_v18 = vadd.f32 %v4580_v37, %v2099_v17  ;;  %v2101_v20 = vpop.f32.mrb[49].mxu1  ;;  %v3416_v21 = vpop.f32.mrb[49].mxu0 }
 0x243   : > { %v2102_v22 = vpop.f32.mrb[50].mxu1  ;;  %v2568_v25 = vpop.f32.mrb[50].mxu0 }
 0x244   : > { %v3515_v23 = vadd.f32 %v3514_v18, %v2565_v19  ;;  %v3516_v24 = vadd.f32 %v4580_v37, %v2102_v22  ;;  %v2104_v26 = vpop.f32.mrb[51].mxu1  ;;  %v3417_v27 = vpop.f32.mrb[51].mxu0 }
 0x246   : > { %v3309_v28 = vpack.c.bf16 %v3515_v23, %v3515_v23  ;;  %v3517_v29 = vadd.f32 %v3516_v24, %v2568_v25 }
 0x248   : > { %2893 = vst.msk [vmem:[%s4588_s24 + $0x60] sm:$0xf] %vm2868_vm2, %v3309_v28  ;;  %v3310_v30 = vpack.c.bf16 %v3517_v29, %v3517_v29 }
 0x249   : > { %v2107_v1 = vpop.f32.mrb[52].mxu1  ;;  %v2573_v32 = vpop.f32.mrb[52].mxu0 }
 0x24a   : > { %2894 = vst.msk [vmem:[%s4588_s24 + $0x64] sm:$0xf] %vm2868_vm2, %v3310_v30  ;;  %v3518_v31 = vadd.f32 %v4580_v37, %v2107_v1  ;;  %v2109_v33 = vpop.f32.mrb[53].mxu1  ;;  %v3420_v34 = vpop.f32.mrb[53].mxu0 }
 0x24b   : > { %v2110_v35 = vpop.f32.mrb[54].mxu1  ;;  %v2576_v39 = vpop.f32.mrb[54].mxu0 }
 0x24c   : > { %v3519_v36 = vadd.f32 %v3518_v31, %v2573_v32  ;;  %v3520_v38 = vadd.f32 %v4580_v37, %v2110_v35  ;;  %v2112_v41 = vpop.f32.mrb[55].mxu1  ;;  %v3421_v42 = vpop.f32.mrb[55].mxu0 }
 0x24e   : > { %v3311_v43 = vpack.c.bf16 %v3519_v36, %v3519_v36  ;;  %v3521_v44 = vadd.f32 %v3520_v38, %v2576_v39 }
 0x250   : > { %2895 = vst.msk [vmem:[%s4588_s24 + $0x68] sm:$0xf] %vm2868_vm2, %v3311_v43  ;;  %v3312_v45 = vpack.c.bf16 %v3521_v44, %v3521_v44 }
 0x251   : > { %v2115_v40 = vpop.f32.mrb[56].mxu1  ;;  %v2581_v47 = vpop.f32.mrb[56].mxu0 }
 0x252   : > { %2896 = vst.msk [vmem:[%s4588_s24 + $0x6c] sm:$0xf] %vm2868_vm2, %v3312_v45  ;;  %v3522_v46 = vadd.f32 %v4580_v37, %v2115_v40  ;;  %v2117_v48 = vpop.f32.mrb[57].mxu1  ;;  %v3424_v49 = vpop.f32.mrb[57].mxu0 }
 0x253   : > { %v2118_v50 = vpop.f32.mrb[58].mxu1  ;;  %v2584_v53 = vpop.f32.mrb[58].mxu0 }
 0x254   : > { %v3523_v51 = vadd.f32 %v3522_v46, %v2581_v47  ;;  %v3524_v52 = vadd.f32 %v4580_v37, %v2118_v50  ;;  %v2120_v54 = vpop.f32.mrb[59].mxu1  ;;  %v3425_v55 = vpop.f32.mrb[59].mxu0 }
 0x256   : > { %v3313_v56 = vpack.c.bf16 %v3523_v51, %v3523_v51  ;;  %v3525_v57 = vadd.f32 %v3524_v52, %v2584_v53 }
 0x258   : > { %2897 = vst.msk [vmem:[%s4588_s24 + $0x70] sm:$0xf] %vm2868_vm2, %v3313_v56  ;;  %v3314_v58 = vpack.c.bf16 %v3525_v57, %v3525_v57 }
 0x259   : > { %v2123_v59 = vpop.f32.mrb[60].mxu1  ;;  %v2589_v61 = vpop.f32.mrb[60].mxu0 }
 0x25a   : > { %2898 = vst.msk [vmem:[%s4588_s24 + $0x74] sm:$0xf] %vm2868_vm2, %v3314_v58  ;;  %v3526_v60 = vadd.f32 %v4580_v37, %v2123_v59  ;;  %v2125_v62 = vpop.f32.mrb[61].mxu1  ;;  %v3428_v63 = vpop.f32.mrb[61].mxu0 }
 0x25b   : > { %v2126_v0 = vpop.f32.mrb[62].mxu1  ;;  %v2592_v4 = vpop.f32.mrb[62].mxu0 }
 0x25c   : > { %v3527_v2 = vadd.f32 %v3526_v60, %v2589_v61  ;;  %v3528_v3 = vadd.f32 %v4580_v37, %v2126_v0  ;;  %v2128_v5 = vpop.f32.mrb[63].mxu1  ;;  %v3429_v6 = vpop.f32.mrb[63].mxu0 }
 0x25e   : > { %v3315_v7 = vpack.c.bf16 %v3527_v2, %v3527_v2  ;;  %v3529_v8 = vadd.f32 %v3528_v3, %v2592_v4 }
 0x260   : > { %2899 = vst.msk [vmem:[%s4588_s24 + $0x78] sm:$0xf] %vm2868_vm2, %v3315_v7  ;;  %v3316_v9 = vpack.c.bf16 %v3529_v8, %v3529_v8 }
 0x261   : > { %v2131_v10 = vpop.f32.mrb[64].mxu1  ;;  %v2597_v12 = vpop.f32.mrb[64].mxu0 }
 0x262   : > { %2900 = vst.msk [vmem:[%s4588_s24 + $0x7c] sm:$0xf] %vm2868_vm2, %v3316_v9  ;;  %v3530_v11 = vadd.f32 %v4580_v37, %v2131_v10  ;;  %v2133_v13 = vpop.f32.mrb[65].mxu1  ;;  %v3432_v14 = vpop.f32.mrb[65].mxu0 }
 0x263   : > { %v2134_v15 = vpop.f32.mrb[66].mxu1  ;;  %v2600_v18 = vpop.f32.mrb[66].mxu0 }
 0x264   : > { %v3531_v16 = vadd.f32 %v3530_v11, %v2597_v12  ;;  %v3532_v17 = vadd.f32 %v4580_v37, %v2134_v15  ;;  %v2136_v19 = vpop.f32.mrb[67].mxu1  ;;  %v3433_v20 = vpop.f32.mrb[67].mxu0 }
 0x266   : > { %v3317_v21 = vpack.c.bf16 %v3531_v16, %v3531_v16  ;;  %v3533_v22 = vadd.f32 %v3532_v17, %v2600_v18 }
 0x268   : > { %2901 = vst.msk [vmem:[%s4588_s24 + $0x80] sm:$0xf] %vm2868_vm2, %v3317_v21  ;;  %v3318_v23 = vpack.c.bf16 %v3533_v22, %v3533_v22 }
 0x269   : > { %v2139_v24 = vpop.f32.mrb[68].mxu1  ;;  %v2605_v26 = vpop.f32.mrb[68].mxu0 }
 0x26a   : > { %2902 = vst.msk [vmem:[%s4588_s24 + $0x84] sm:$0xf] %vm2868_vm2, %v3318_v23  ;;  %v3534_v25 = vadd.f32 %v4580_v37, %v2139_v24  ;;  %v2141_v27 = vpop.f32.mrb[69].mxu1  ;;  %v3436_v28 = vpop.f32.mrb[69].mxu0 }
 0x26b   : > { %v2142_v29 = vpop.f32.mrb[70].mxu1  ;;  %v2608_v31 = vpop.f32.mrb[70].mxu0 }
 0x26c   : > { %v3535_v30 = vadd.f32 %v3534_v25, %v2605_v26  ;;  %v3536_v1 = vadd.f32 %v4580_v37, %v2142_v29  ;;  %v2144_v32 = vpop.f32.mrb[71].mxu1  ;;  %v3437_v33 = vpop.f32.mrb[71].mxu0 }
 0x26e   : > { %v3319_v34 = vpack.c.bf16 %v3535_v30, %v3535_v30  ;;  %v3537_v35 = vadd.f32 %v3536_v1, %v2608_v31 }
 0x270   : > { %2903 = vst.msk [vmem:[%s4588_s24 + $0x88] sm:$0xf] %vm2868_vm2, %v3319_v34  ;;  %v3320_v36 = vpack.c.bf16 %v3537_v35, %v3537_v35 }
 0x271   : > { %v2147_v38 = vpop.f32.mrb[72].mxu1  ;;  %v2613_v41 = vpop.f32.mrb[72].mxu0 }
 0x272   : > { %2904 = vst.msk [vmem:[%s4588_s24 + $0x8c] sm:$0xf] %vm2868_vm2, %v3320_v36  ;;  %v3538_v39 = vadd.f32 %v4580_v37, %v2147_v38  ;;  %v2149_v42 = vpop.f32.mrb[73].mxu1  ;;  %v3440_v43 = vpop.f32.mrb[73].mxu0 }
 0x273   : > { %v2150_v44 = vpop.f32.mrb[74].mxu1  ;;  %v2616_v46 = vpop.f32.mrb[74].mxu0 }
 0x274   : > { %v3539_v45 = vadd.f32 %v3538_v39, %v2613_v41  ;;  %v3540_v40 = vadd.f32 %v4580_v37, %v2150_v44  ;;  %v2152_v47 = vpop.f32.mrb[75].mxu1  ;;  %v3441_v48 = vpop.f32.mrb[75].mxu0 }
 0x276   : > { %v3321_v49 = vpack.c.bf16 %v3539_v45, %v3539_v45  ;;  %v3541_v50 = vadd.f32 %v3540_v40, %v2616_v46 }
 0x278   : > { %2905 = vst.msk [vmem:[%s4588_s24 + $0x90] sm:$0xf] %vm2868_vm2, %v3321_v49  ;;  %v3322_v51 = vpack.c.bf16 %v3541_v50, %v3541_v50 }
 0x279   : > { %v2155_v52 = vpop.f32.mrb[76].mxu1  ;;  %v2621_v54 = vpop.f32.mrb[76].mxu0 }
 0x27a   : > { %2906 = vst.msk [vmem:[%s4588_s24 + $0x94] sm:$0xf] %vm2868_vm2, %v3322_v51  ;;  %v3542_v53 = vadd.f32 %v4580_v37, %v2155_v52  ;;  %v2157_v55 = vpop.f32.mrb[77].mxu1  ;;  %v3444_v56 = vpop.f32.mrb[77].mxu0 }
 0x27b   : > { %v2158_v57 = vpop.f32.mrb[78].mxu1  ;;  %v2624_v60 = vpop.f32.mrb[78].mxu0 }
 0x27c   : > { %v3543_v58 = vadd.f32 %v3542_v53, %v2621_v54  ;;  %v3544_v59 = vadd.f32 %v4580_v37, %v2158_v57  ;;  %v2160_v61 = vpop.f32.mrb[79].mxu1  ;;  %v3445_v62 = vpop.f32.mrb[79].mxu0 }
 0x27e   : > { %v3323_v63 = vpack.c.bf16 %v3543_v58, %v3543_v58  ;;  %v3545_v0 = vadd.f32 %v3544_v59, %v2624_v60 }
 0x280   : > { %2907 = vst.msk [vmem:[%s4588_s24 + $0x98] sm:$0xf] %vm2868_vm2, %v3323_v63  ;;  %v3324_v2 = vpack.c.bf16 %v3545_v0, %v3545_v0 }
 0x281   : > { %v2163_v3 = vpop.f32.mrb[80].mxu1  ;;  %v2629_v5 = vpop.f32.mrb[80].mxu0 }
 0x282   : > { %2908 = vst.msk [vmem:[%s4588_s24 + $0x9c] sm:$0xf] %vm2868_vm2, %v3324_v2  ;;  %v3546_v4 = vadd.f32 %v4580_v37, %v2163_v3  ;;  %v2165_v6 = vpop.f32.mrb[81].mxu1  ;;  %v3448_v7 = vpop.f32.mrb[81].mxu0 }
 0x283   : > { %v2166_v8 = vpop.f32.mrb[82].mxu1  ;;  %v2632_v11 = vpop.f32.mrb[82].mxu0 }
 0x284   : > { %v3547_v9 = vadd.f32 %v3546_v4, %v2629_v5  ;;  %v3548_v10 = vadd.f32 %v4580_v37, %v2166_v8  ;;  %v2168_v12 = vpop.f32.mrb[83].mxu1  ;;  %v3449_v13 = vpop.f32.mrb[83].mxu0 }
 0x286   : > { %v3325_v14 = vpack.c.bf16 %v3547_v9, %v3547_v9  ;;  %v3549_v15 = vadd.f32 %v3548_v10, %v2632_v11 }
 0x288   : > { %2909 = vst.msk [vmem:[%s4588_s24 + $0xa0] sm:$0xf] %vm2868_vm2, %v3325_v14  ;;  %v3326_v16 = vpack.c.bf16 %v3549_v15, %v3549_v15 }
 0x289   : > { %v2171_v17 = vpop.f32.mrb[84].mxu1  ;;  %v2637_v19 = vpop.f32.mrb[84].mxu0 }
 0x28a   : > { %2910 = vst.msk [vmem:[%s4588_s24 + $0xa4] sm:$0xf] %vm2868_vm2, %v3326_v16  ;;  %v3550_v18 = vadd.f32 %v4580_v37, %v2171_v17  ;;  %v2173_v20 = vpop.f32.mrb[85].mxu1  ;;  %v3452_v21 = vpop.f32.mrb[85].mxu0 }
 0x28b   : > { %v2174_v22 = vpop.f32.mrb[86].mxu1  ;;  %v2640_v25 = vpop.f32.mrb[86].mxu0 }
 0x28c   : > { %v3551_v23 = vadd.f32 %v3550_v18, %v2637_v19  ;;  %v3552_v24 = vadd.f32 %v4580_v37, %v2174_v22  ;;  %v2176_v26 = vpop.f32.mrb[87].mxu1  ;;  %v3453_v27 = vpop.f32.mrb[87].mxu0 }
 0x28e   : > { %v3327_v28 = vpack.c.bf16 %v3551_v23, %v3551_v23  ;;  %v3553_v29 = vadd.f32 %v3552_v24, %v2640_v25 }
 0x290   : > { %2911 = vst.msk [vmem:[%s4588_s24 + $0xa8] sm:$0xf] %vm2868_vm2, %v3327_v28  ;;  %v3328_v30 = vpack.c.bf16 %v3553_v29, %v3553_v29 }
 0x291   : > { %v2179_v1 = vpop.f32.mrb[88].mxu1  ;;  %v2645_v32 = vpop.f32.mrb[88].mxu0 }
 0x292   : > { %2912 = vst.msk [vmem:[%s4588_s24 + $0xac] sm:$0xf] %vm2868_vm2, %v3328_v30  ;;  %v3554_v31 = vadd.f32 %v4580_v37, %v2179_v1  ;;  %v2181_v33 = vpop.f32.mrb[89].mxu1  ;;  %v3456_v34 = vpop.f32.mrb[89].mxu0 }
 0x293   : > { %v2182_v35 = vpop.f32.mrb[90].mxu1  ;;  %v2648_v39 = vpop.f32.mrb[90].mxu0 }
 0x294   : > { %v3555_v36 = vadd.f32 %v3554_v31, %v2645_v32  ;;  %v3556_v38 = vadd.f32 %v4580_v37, %v2182_v35  ;;  %v2184_v41 = vpop.f32.mrb[91].mxu1  ;;  %v3457_v42 = vpop.f32.mrb[91].mxu0 }
 0x296   : > { %v3329_v43 = vpack.c.bf16 %v3555_v36, %v3555_v36  ;;  %v3557_v44 = vadd.f32 %v3556_v38, %v2648_v39 }
 0x298   : > { %2913 = vst.msk [vmem:[%s4588_s24 + $0xb0] sm:$0xf] %vm2868_vm2, %v3329_v43  ;;  %v3330_v45 = vpack.c.bf16 %v3557_v44, %v3557_v44 }
 0x299   : > { %v2187_v40 = vpop.f32.mrb[92].mxu1  ;;  %v2653_v47 = vpop.f32.mrb[92].mxu0 }
 0x29a   : > { %2914 = vst.msk [vmem:[%s4588_s24 + $0xb4] sm:$0xf] %vm2868_vm2, %v3330_v45  ;;  %v3558_v46 = vadd.f32 %v4580_v37, %v2187_v40  ;;  %v2189_v48 = vpop.f32.mrb[93].mxu1  ;;  %v3460_v49 = vpop.f32.mrb[93].mxu0 }
 0x29b   : > { %v2190_v50 = vpop.f32.mrb[94].mxu1  ;;  %v2656_v53 = vpop.f32.mrb[94].mxu0 }
 0x29c   : > { %v3559_v51 = vadd.f32 %v3558_v46, %v2653_v47  ;;  %v3560_v52 = vadd.f32 %v4580_v37, %v2190_v50  ;;  %v2192_v54 = vpop.f32.mrb[95].mxu1  ;;  %v3461_v55 = vpop.f32.mrb[95].mxu0 }
 0x29e   : > { %v3331_v56 = vpack.c.bf16 %v3559_v51, %v3559_v51  ;;  %v3561_v57 = vadd.f32 %v3560_v52, %v2656_v53 }
 0x2a0   : > { %2915 = vst.msk [vmem:[%s4588_s24 + $0xb8] sm:$0xf] %vm2868_vm2, %v3331_v56  ;;  %v3332_v58 = vpack.c.bf16 %v3561_v57, %v3561_v57 }
 0x2a1   : > { %v2195_v59 = vpop.f32.mrb[96].mxu1  ;;  %v2661_v61 = vpop.f32.mrb[96].mxu0 }
 0x2a2   : > { %2916 = vst.msk [vmem:[%s4588_s24 + $0xbc] sm:$0xf] %vm2868_vm2, %v3332_v58  ;;  %v3562_v60 = vadd.f32 %v4580_v37, %v2195_v59  ;;  %v2197_v62 = vpop.f32.mrb[97].mxu1  ;;  %v3464_v63 = vpop.f32.mrb[97].mxu0 }
 0x2a3   : > { %v2198_v0 = vpop.f32.mrb[98].mxu1  ;;  %v2664_v4 = vpop.f32.mrb[98].mxu0 }
 0x2a4   : > { %v3563_v2 = vadd.f32 %v3562_v60, %v2661_v61  ;;  %v3564_v3 = vadd.f32 %v4580_v37, %v2198_v0  ;;  %v2200_v5 = vpop.f32.mrb[99].mxu1  ;;  %v3465_v6 = vpop.f32.mrb[99].mxu0 }
 0x2a6   : > { %v3333_v7 = vpack.c.bf16 %v3563_v2, %v3563_v2  ;;  %v3565_v8 = vadd.f32 %v3564_v3, %v2664_v4 }
 0x2a8   : > { %2917 = vst.msk [vmem:[%s4588_s24 + $0xc0] sm:$0xf] %vm2868_vm2, %v3333_v7  ;;  %v3334_v9 = vpack.c.bf16 %v3565_v8, %v3565_v8 }
 0x2aa   : > { %2918 = vst.msk [vmem:[%s4588_s24 + $0xc4] sm:$0xf] %vm2868_vm2, %v3334_v9 }
 0x2ab PF: > { %s13_s12 = sadd.s32 1, %s4084_s12  }
 0x2ac   : > { %p10_p4 = scmp.ge.s32.totalorder %s13_s12, 4  }
 0x2ae   :  { %12 = sbr.rel (!%p10_p4) target bundleno = 1 (0x1), region = 62 }

// kernel: _lambda_.10
= control target key start
LH: loop header
LB: loop body
LE: loop exit
PB: predicated region body
PF: predicated region fallthrough
CT: control target
= control target key end

     0   :  { %s260_s6 = smov 0   ;;  %s287_s0 = inlined_call_operand.vmem [shape: bf16[6,2,3,128], index: 0, kind: input, shape index: {}]   ;;  %s288_s1 = inlined_call_operand.vmem [shape: bf16[6,3,64], index: 1, kind: output, shape index: {}]  }
   0x1 LB: > { %s219_s7 = sadd.s32 4294967295, %s246_s6   ;;  %p223_p0 = scmp.ge.s32.totalorder %s246_s6, 1  ;;  %s246_s6 = sphi %s260_s6, %s11_s6  }
   0x2   : > { %p89_p1 = scmp.lt.s32.totalorder %s246_s6, 3 }
   0x4   : > { %p90_p2 = pnand %p223_p0, %p89_p1 }
   0x5   : > { %s110_s8 = smul.u32 (!%p90_p2), 3, %s219_s7  ;;  %s248_s13 = smov (!%p90_p2), 64   ;;  %vm151_vm0 = vcmask (!%p90_p2), 517120   ;;  %vm152_vm1 = vsmask.f32 (!%p90_p2), 1280  ;;  %v249_v15 = vmov (!%p90_p2), 0  }
   0x6   : > { %93 = sbr.rel (%p90_p2) target bundleno = 144 (0x90), region = 24  ;;  %vm274_vm2 = vmand (!%p90_p2), %vm151_vm0, %vm152_vm1 }
   0x7   : > { %p111_p3 = scmp.lt.s32.totalorder (!%p90_p2), %s110_s8, 5 }
   0xd   : > { %s292_s8 = smov (!%p111_p3, %s110_s8), 5 }
   0xe   : > { %s229_s9 = sshll.u32 %s292_s8, 2  ;;  %s226_s14 = sshll.u32 %s292_s8, 1 }
   0xf   : > { %s115_s12 = scalar_lea.vmem %s287_s0, %s229_s9  ;;  %s121_s17 = scalar_lea.vmem %s288_s1, %s226_s14 }
  0x10   : > { %v124_v0 = vld [vmem:[%s115_s12] sm:$0x3]  ;;  %v125_v1 = vld [vmem:[%s115_s12 + $0x2] sm:$0x3]  ;;  %v128_v2 = vld [vmem:[%s115_s12 + $0x8] sm:$0x3] }
  0x11   : > { %v130_v3 = vmax.bf16 %v125_v1, %v124_v0  ;;  %v129_v4 = vld [vmem:[%s115_s12 + $0xa] sm:$0x3]  ;;  %v126_v5 = vld [vmem:[%s115_s12 + $0x4] sm:$0x3]  ;;  %v127_v6 = vld [vmem:[%s115_s12 + $0x6] sm:$0x3] }
  0x12   : > { %v132_v7 = vmax.bf16 %v129_v4, %v128_v2  ;;  %v131_v8 = vmax.bf16 %v127_v6, %v126_v5  ;;  %v154_v13 = vld [vmem:[%s121_s17] sm:$0x3]  ;;  %v160_v17 = vld [vmem:[%s121_s17 + $0x4] sm:$0x3]  ;;  %v157_v23 = vld [vmem:[%s121_s17 + $0x2] sm:$0x3] }
  0x13   : > { %136 = vrot.lane.b32.xlu0 %v130_v3, %s248_s13 }
  0x14   : > { %140 = vrot.lane.b32.xlu1 %v132_v7, %s248_s13 }
  0x17   : > { %138 = vrot.lane.b32.xlu0 %v131_v8, %s248_s13 }
  0x85   : > { %v137_v9 = vpop.permute.xlu0 %136 }
  0x86   : > { %v145_v10 = vmax.bf16 %v137_v9, %v130_v3  ;;  %v141_v11 = vpop.permute.xlu1 %140 }
  0x87   : > { %v147_v14 = vmax.bf16 %v141_v11, %v132_v7 }
  0x88   : > { %v148_v16 = vmax.bf16 %v249_v15, %v145_v10 }
  0x89   : > { %v150_v18 = vmax.bf16 %v249_v15, %v147_v14  ;;  %v139_v19 = vpop.permute.xlu0 %138 }
  0x8a   : > { %v155_v20 = vsel %vm274_vm2, %v148_v16, %v154_v13  ;;  %v146_v21 = vmax.bf16 %v139_v19, %v131_v8 }
  0x8b   : > { %156 = vst [vmem:[%s121_s17] sm:$0x3] %v155_v20  ;;  %v161_v22 = vsel %vm274_vm2, %v150_v18, %v160_v17 }
  0x8c   : > { %162 = vst [vmem:[%s121_s17 + $0x4] sm:$0x3] %v161_v22  ;;  %v149_v24 = vmax.bf16 %v249_v15, %v146_v21 }
  0x8e   : > { %v158_v25 = vsel %vm274_vm2, %v149_v24, %v157_v23 }
  0x8f   : > { %159 = vst [vmem:[%s121_s17 + $0x2] sm:$0x3] %v158_v25 }
  0x90 PF: > { %s11_s6 = sadd.s32 1, %s246_s6  }
  0x91   : > { %p8_p4 = scmp.ge.s32.totalorder %s11_s6, 4  }
  0x93   :  { %10 = sbr.rel (!%p8_p4) target bundleno = 1 (0x1), region = 54 }

// kernel: _lambda_.9
= control target key start
LH: loop header
LB: loop body
LE: loop exit
PB: predicated region body
PF: predicated region fallthrough
CT: control target
= control target key end

     0   :  { %v1354_v38 = vmov 0.0   ;;  %vm1355_vm0 = vmmov 0   ;;  %vm622_vm1 = vcmask 261120   ;;  %vm963_vm2 = vcmask 519168   ;;  %s1716_s1 = inlined_call_operand.vmem [shape: bf16[800,64], index: 1, kind: input, shape index: {}]   ;;  %s1717_s0 = inlined_call_operand.vmem [shape: bf16[72,800], index: 0, kind: input, shape index: {}]   ;;  %s1718_s2 = inlined_call_operand.vmem [shape: f32[1,64], index: 2, kind: input, shape index: {}]   ;;  %s1719_s3 = inlined_call_operand.vmem [shape: bf16[72,64], index: 3, kind: output, shape index: {}]  }
   0x1   :  { %v1257_v0 = vld [vmem:[%s1716_s1 + $0x40] sm:$0xff]   ;;  %v1261_v4 = vld [vmem:[%s1716_s1 + $0x48] sm:$0xff]   ;;  %v1265_v8 = vld [vmem:[%s1716_s1 + $0x50] sm:$0xff]  }
   0x2   :  { %v1258_v1 = vld [vmem:[%s1716_s1] sm:$0xff]   ;;  %1086 = vmatprep.subr.bf16.mxu0 %v1257_v0  ;;  %v1262_v5 = vld [vmem:[%s1716_s1 + $0x8] sm:$0xff]   ;;  %v1266_v9 = vld [vmem:[%s1716_s1 + $0x10] sm:$0xff]  }
   0x3   :  { %v1259_v2 = vld [vmem:[%s1716_s1 + $0xc0] sm:$0xff]   ;;  %1087 = vmatpush3.bf16.msra.mxu0 %v1258_v1  ;;  %v1263_v6 = vld [vmem:[%s1716_s1 + $0xc8] sm:$0xff]   ;;  %v1267_v10 = vld [vmem:[%s1716_s1 + $0xd0] sm:$0xff]  }
   0x4   :  { %v1260_v3 = vld [vmem:[%s1716_s1 + $0x80] sm:$0xff]   ;;  %1132 = vmatprep.subr.bf16.mxu1 %v1259_v2  ;;  %1088 = vmatprep.subr.bf16.mxu0 %v1261_v4  ;;  %v1264_v7 = vld [vmem:[%s1716_s1 + $0x88] sm:$0xff]   ;;  %v1268_v11 = vld [vmem:[%s1716_s1 + $0x90] sm:$0xff]  }
   0x5   :  { %1133 = vmatpush3.bf16.msra.mxu1 %v1260_v3  ;;  %v1269_v12 = vld [vmem:[%s1716_s1 + $0x58] sm:$0xff]   ;;  %v1273_v16 = vld [vmem:[%s1716_s1 + $0x60] sm:$0xff]   ;;  %v1277_v20 = vld [vmem:[%s1716_s1 + $0x68] sm:$0xff]  }
   0x6   :  { %1134 = vmatprep.subr.bf16.mxu1 %v1263_v6  ;;  %v1270_v13 = vld [vmem:[%s1716_s1 + $0x18] sm:$0xff]   ;;  %v1274_v17 = vld [vmem:[%s1716_s1 + $0x20] sm:$0xff]   ;;  %v1278_v21 = vld [vmem:[%s1716_s1 + $0x28] sm:$0xff]  }
   0x7   :  { %1089 = vmatpush3.bf16.msra.mxu0 %v1262_v5  ;;  %v1271_v14 = vld [vmem:[%s1716_s1 + $0xd8] sm:$0xff]   ;;  %v1275_v18 = vld [vmem:[%s1716_s1 + $0xe0] sm:$0xff]   ;;  %v1279_v22 = vld [vmem:[%s1716_s1 + $0xe8] sm:$0xff]  }
   0x8   :  { %1090 = vmatprep.subr.bf16.mxu0 %v1265_v8  ;;  %v1272_v15 = vld [vmem:[%s1716_s1 + $0x98] sm:$0xff]   ;;  %v1276_v19 = vld [vmem:[%s1716_s1 + $0xa0] sm:$0xff]   ;;  %v1280_v23 = vld [vmem:[%s1716_s1 + $0xa8] sm:$0xff]  }
   0x9   :  { %1135 = vmatpush3.bf16.msra.mxu1 %v1264_v7  ;;  %v1281_v24 = vld [vmem:[%s1716_s1 + $0x70] sm:$0xff]   ;;  %v1285_v28 = vld [vmem:[%s1716_s1 + $0x78] sm:$0xff]   ;;  %v1290_v32 = vld [vmem:[%s1717_s0 + $0x4] ss:$28 sps:$4 sm:$0xff]  }
   0xa   :  { %1136 = vmatprep.subr.bf16.mxu1 %v1267_v10  ;;  %v1282_v25 = vld [vmem:[%s1716_s1 + $0x30] sm:$0xff]   ;;  %v1286_v29 = vld [vmem:[%s1716_s1 + $0x38] sm:$0xff]   ;;  %670 = vmatprep.mubr.bf16.mxu0 %v1290_v32  ;;  %v1292_v34 = vld [vmem:[%s1716_s1 + $0x140] sm:$0xff]  }
   0xb   :  { %1091 = vmatpush3.bf16.msra.mxu0 %v1266_v9  ;;  %v1283_v26 = vld [vmem:[%s1716_s1 + $0xf0] sm:$0xff]   ;;  %v1287_v30 = vld [vmem:[%s1716_s1 + $0xf8] sm:$0xff]   ;;  %v1293_v35 = vld [vmem:[%s1717_s0 + $0x8] ss:$28 sps:$4 sm:$0xff]  }
   0xc   :  { %1092 = vmatprep.subr.bf16.mxu0 %v1269_v12  ;;  %v1284_v27 = vld [vmem:[%s1716_s1 + $0xb0] sm:$0xff]   ;;  %v1288_v31 = vld [vmem:[%s1717_s0] ss:$28 sps:$4 sm:$0xff]   ;;  %v1295_v36 = vld [vmem:[%s1717_s0 + $0xc] ss:$28 sps:$4 sm:$0xff]  }
   0xd   :  { %1137 = vmatpush3.bf16.msra.mxu1 %v1268_v11  ;;  %v1291_v33 = vld [vmem:[%s1716_s1 + $0xb8] sm:$0xff]   ;;  %v1296_v37 = vld [vmem:[%s1716_s1 + $0x100] sm:$0xff]   ;;  %742 = vmatprep.mubr.bf16.mxu1 %v1295_v36  ;;  %v1297_v39 = vld [vmem:[%s1716_s1 + $0x148] sm:$0xff]  }
   0xe   :  { %1138 = vmatprep.subr.bf16.mxu1 %v1271_v14  ;;  %v1298_v40 = vld [vmem:[%s1716_s1 + $0x108] sm:$0xff]   ;;  %v1299_v41 = vld [vmem:[%s1716_s1 + $0x180] sm:$0xff]   ;;  %v1300_v42 = vld [vmem:[%s1717_s0 + $0x3c] ss:$28 sps:$4 sm:$0xff]  }
   0xf   :  { %1093 = vmatpush3.bf16.msra.mxu0 %v1270_v13  ;;  %v1302_v43 = vld [vmem:[%s1717_s0 + $0x38] ss:$28 sps:$4 sm:$0xff]   ;;  %v1303_v44 = vld [vmem:[%s1717_s0 + $0x44] ss:$28 sps:$4 sm:$0xff]   ;;  %v1311_v50 = vld [vmem:[%s1717_s0 + $0x70] ss:$28 sps:$4 sm:$0xff]  }
  0x10   :  { %1094 = vmatprep.subr.bf16.mxu0 %v1273_v16  ;;  %v1305_v45 = vld [vmem:[%s1717_s0 + $0x40] ss:$28 sps:$4 sm:$0xff]   ;;  %v1306_v46 = vld [vmem:[%s1716_s1 + $0x150] sm:$0xff]   ;;  %v1318_v56 = vld [vmem:[%s1717_s0 + $0xac] ss:$28 sps:$4 sm:$0xff]  }
  0x11   :  { %1139 = vmatpush3.bf16.msra.mxu1 %v1272_v15  ;;  %v1307_v47 = vld [vmem:[%s1716_s1 + $0x110] sm:$0xff]   ;;  %v1310_v49 = vld [vmem:[%s1716_s1 + $0x158] sm:$0xff]   ;;  %v1316_v54 = vld [vmem:[%s1716_s1 + $0x160] sm:$0xff]  }
  0x12   :  { %1140 = vmatprep.subr.bf16.mxu1 %v1275_v18  ;;  %v1308_v48 = vld [vmem:[%s1717_s0 + $0x74] ss:$28 sps:$4 sm:$0xff]   ;;  %v1312_v51 = vld [vmem:[%s1716_s1 + $0x118] sm:$0xff]   ;;  %v1317_v55 = vld [vmem:[%s1716_s1 + $0x120] sm:$0xff]  }
  0x13   :  { %1095 = vmatpush3.bf16.msra.mxu0 %v1274_v17  ;;  %v1313_v52 = vld [vmem:[%s1717_s0 + $0x7c] ss:$28 sps:$4 sm:$0xff]   ;;  %v1321_v57 = vld [vmem:[%s1717_s0 + $0xb4] ss:$28 sps:$4 sm:$0xff]   ;;  %v1320_v58 = vld [vmem:[%s1717_s0 + $0xa8] ss:$28 sps:$4 sm:$0xff]  }
  0x14   :  { %1096 = vmatprep.subr.bf16.mxu0 %v1277_v20  ;;  %v1315_v53 = vld [vmem:[%s1717_s0 + $0x78] ss:$28 sps:$4 sm:$0xff]   ;;  %v1323_v59 = vld [vmem:[%s1716_s1 + $0x168] sm:$0xff]   ;;  %v47_v0 = vld [vmem:[%s1717_s0 + $0xe0] sm:$0xff] }
  0x15   :  { %1141 = vmatpush3.bf16.msra.mxu1 %v1276_v19  ;;  %v1325_v60 = vld [vmem:[%s1716_s1 + $0x128] sm:$0xff]   ;;  %v1327_v63 = vld [vmem:[%s1716_s1 + $0x170] sm:$0xff]   ;;  %v1007_v1 = vcombine.high %v47_v0, %v47_v0  ;;  %v1333_v5 = vld [vmem:[%s1716_s1 + $0x178] sm:$0xff]   ;;  %v1006_v7 = vcombine.low %v47_v0, %v47_v0 }
  0x16   :  { %1142 = vmatprep.subr.bf16.mxu1 %v1279_v22  ;;  %v1324_v61 = vld [vmem:[%s1717_s0 + $0xb0] ss:$28 sps:$4 sm:$0xff]   ;;  %v1334_v6 = vld [vmem:[%s1716_s1 + $0x138] sm:$0xff]   ;;  %v1341_v13 = vld [vmem:[%s1717_s0 + $0x48] ss:$28 sps:$4 sm:$0xff]  }
  0x17   :  { %1097 = vmatpush3.bf16.msra.mxu0 %v1278_v21  ;;  %v1326_v62 = vld [vmem:[%s1716_s1 + $0x188] sm:$0xff]   ;;  %v1329_v2 = vld [vmem:[%s1716_s1 + $0x130] sm:$0xff]   ;;  %v1343_v14 = vld [vmem:[%s1717_s0 + $0x84] ss:$28 sps:$4 sm:$0xff]  }
  0x18   :  { %1098 = vmatprep.subr.bf16.mxu0 %v1281_v24  ;;  %v48_v3 = vld [vmem:[%s1717_s0 + $0xe8] sm:$0xff]  ;;  %v1337_v8 = vld [vmem:[%s1717_s0 + $0x14] ss:$28 sps:$4 sm:$0xff]   ;;  %v1345_v16 = vld [vmem:[%s1717_s0 + $0x80] ss:$28 sps:$4 sm:$0xff]  }
  0x19   :  { %1143 = vmatpush3.bf16.msra.mxu1 %v1280_v23  ;;  %v1009_v4 = vcombine.high %v48_v3, %v48_v3  ;;  %v1008_v9 = vcombine.low %v48_v3, %v48_v3  ;;  %v1335_v10 = vld [vmem:[%s1717_s0 + $0x10] ss:$28 sps:$4 sm:$0xff]   ;;  %v1338_v12 = vld [vmem:[%s1717_s0 + $0x18] ss:$28 sps:$4 sm:$0xff]   ;;  %v1346_v18 = vld [vmem:[%s1717_s0 + $0x88] ss:$28 sps:$4 sm:$0xff]  }
  0x1a   :  { %1144 = vmatprep.subr.bf16.mxu1 %v1283_v26  ;;  %v1339_v11 = vld [vmem:[%s1717_s0 + $0x4c] ss:$28 sps:$4 sm:$0xff]   ;;  %v1347_v17 = vld [vmem:[%s1717_s0 + $0xbc] ss:$28 sps:$4 sm:$0xff]   ;;  %v49_v19 = vld [vmem:[%s1717_s0 + $0xf0] sm:$0xff] }
  0x1b   :  { %1099 = vmatpush3.bf16.msra.mxu0 %v1282_v25  ;;  %v1342_v15 = vld [vmem:[%s1717_s0 + $0x50] ss:$28 sps:$4 sm:$0xff]   ;;  %v1349_v20 = vld [vmem:[%s1717_s0 + $0xb8] ss:$28 sps:$4 sm:$0xff]   ;;  %v1011_v21 = vcombine.high %v49_v19, %v49_v19  ;;  %v1350_v22 = vld [vmem:[%s1717_s0 + $0xc0] ss:$28 sps:$4 sm:$0xff]   ;;  %v1010_v23 = vcombine.low %v49_v19, %v49_v19 }
  0x1c   :  { %1100 = vmatprep.subr.bf16.mxu0 %v1285_v28  ;;  %v1353_v24 = vld [vmem:[%s1717_s0 + $0xf8] ss:$0 sps:$4 sm:$0xff]   ;;  %v1642_v26 = vld [vmem:[%s1718_s2] ss:$0 sm:$0xff] }
  0x1d   :  { %1145 = vmatpush3.bf16.msra.mxu1 %v1284_v27 }
  0x1e   :  { %1146 = vmatprep.subr.bf16.mxu1 %v1287_v30 }
  0x1f   :  { %1101 = vmatpush3.bf16.msra.mxu0 %v1286_v29 }
  0x20   :  { %1178 = vmatprep.subr.bf16.mxu0 %v1292_v34 }
  0x21   :  { %1147 = vmatpush3.bf16.msra.mxu1 %v1291_v33 }
  0x22   :  { %671 = vmatmul.mubr.bf16.vlgmr.msra.gmra.mrb[0].mxu0 %v1288_v31  ;;  %1231 = vmatprep.subr.bf16.mxu1 %v1354_v38 }
  0x23   :  { %1179 = vmatpush3.bf16.msra.mxu0 %v1296_v37  ;;  %678 = vmatprep.mubr.bf16.mxu0 %v1300_v42 }
  0x24   :  { %743 = vmatmul.mubr.bf16.vlgmr.msra.gmra.mrb[0].mxu1 %v1293_v35  ;;  %1180 = vmatprep.subr.bf16.mxu0 %v1297_v39 }
  0x25   :  { %1232 = vmatpush3.bf16.msra.mxu1 %v1299_v41  ;;  %750 = vmatprep.mubr.bf16.mxu1 %v1303_v44 }
  0x26   :  { %1233 = vmatprep.subr.bf16.mxu1 %v1354_v38 }
  0x27   :  { %1181 = vmatpush3.bf16.msra.mxu0 %v1298_v40 }
  0x28   :  { %1182 = vmatprep.subr.bf16.mxu0 %v1306_v46 }
  0x29   :  { %1234 = vmatpush3.bf16.msra.mxu1 %v1326_v62 }
  0x2a   :  { %679 = vmatmul.mubr.bf16.gmra.mrb[4].mxu0 %v1302_v43 }
  0x2b   :  { %1183 = vmatpush3.bf16.msra.mxu0 %v1307_v47  ;;  %686 = vmatprep.mubr.bf16.mxu0 %v1308_v48 }
  0x2c   :  { %751 = vmatmul.mubr.bf16.gmra.mrb[4].mxu1 %v1305_v45  ;;  %1184 = vmatprep.subr.bf16.mxu0 %v1310_v49 }
  0x2d   :  { %758 = vmatprep.mubr.bf16.mxu1 %v1313_v52 }
  0x2f   :  { %1185 = vmatpush3.bf16.msra.mxu0 %v1312_v51 }
  0x30   :  { %1186 = vmatprep.subr.bf16.mxu0 %v1316_v54 }
  0x32   :  { %687 = vmatmul.mubr.bf16.gmra.mrb[8].mxu0 %v1311_v50 }
  0x33   :  { %694 = vmatprep.mubr.bf16.mxu0 %v1318_v56  ;;  %1187 = vmatpush3.bf16.msra.mxu0 %v1317_v55 }
  0x34   :  { %759 = vmatmul.mubr.bf16.gmra.mrb[8].mxu1 %v1315_v53  ;;  %1188 = vmatprep.subr.bf16.mxu0 %v1323_v59 }
  0x35   :  { %766 = vmatprep.mubr.bf16.mxu1 %v1321_v57 }
  0x37   :  { %1189 = vmatpush3.bf16.msra.mxu0 %v1325_v60 }
  0x38   :  { %1190 = vmatprep.subr.bf16.mxu0 %v1327_v63 }
  0x3a   :  { %695 = vmatmul.mubr.bf16.gmra.mrb[12].mxu0 %v1320_v58 }
  0x3b   :  { %702 = vmatprep.mubr.bf16.mxu0 %v1007_v1  ;;  %1191 = vmatpush3.bf16.msra.mxu0 %v1329_v2 }
  0x3c   :  { %767 = vmatmul.mubr.bf16.gmra.mrb[12].mxu1 %v1324_v61  ;;  %1192 = vmatprep.subr.bf16.mxu0 %v1333_v5 }
  0x3d   :  { %774 = vmatprep.mubr.bf16.mxu1 %v1009_v4 }
  0x3f   :  { %1193 = vmatpush3.bf16.msra.mxu0 %v1334_v6 }
  0x42   :  { %703 = vmatmul.mubr.bf16.gmra.mrb[16].mxu0 %v1006_v7 }
  0x43   :  { %814 = vmatprep.mubr.bf16.mxu0 %v1337_v8 }
  0x44   :  { %775 = vmatmul.mubr.bf16.gmra.mrb[16].mxu1 %v1008_v9 }
  0x45   :  { %1235 = vmatprep.mubr.msk.bf16.mxu1 %vm1355_vm0, %v1354_v38 }
  0x4a   :  { %815 = vmatmul.mubr.bf16.vlgmr.msra.gmra.mrb[20].mxu0 %v1335_v10 }
  0x4b   :  { %822 = vmatprep.mubr.bf16.mxu0 %v1339_v11 }
  0x4c   :  { %1236 = vmatmul.mubr.msk.bf16.vlgmr.msra.gmra.mrb[20].mxu1 %vm622_vm1, %v1338_v12 }
  0x4d   :  { %1239 = vmatprep.mubr.msk.bf16.mxu1 %vm1355_vm0, %v1354_v38 }
  0x52   :  { %823 = vmatmul.mubr.bf16.gmra.mrb[24].mxu0 %v1341_v13 }
  0x53   :  { %830 = vmatprep.mubr.bf16.mxu0 %v1343_v14 }
  0x54   :  { %1240 = vmatmul.mubr.msk.bf16.gmra.mrb[24].mxu1 %vm622_vm1, %v1342_v15 }
  0x55   :  { %1243 = vmatprep.mubr.msk.bf16.mxu1 %vm1355_vm0, %v1354_v38 }
  0x5a   :  { %831 = vmatmul.mubr.bf16.gmra.mrb[28].mxu0 %v1345_v16 }
  0x5b   :  { %838 = vmatprep.mubr.bf16.mxu0 %v1347_v17 }
  0x5c   :  { %1244 = vmatmul.mubr.msk.bf16.gmra.mrb[28].mxu1 %vm622_vm1, %v1346_v18 }
  0x5d   :  { %1247 = vmatprep.mubr.msk.bf16.mxu1 %vm1355_vm0, %v1354_v38 }
  0x62   :  { %839 = vmatmul.mubr.bf16.gmra.mrb[32].mxu0 %v1349_v20 }
  0x63   :  { %846 = vmatprep.mubr.bf16.mxu0 %v1011_v21 }
  0x64   :  { %1248 = vmatmul.mubr.msk.bf16.gmra.mrb[32].mxu1 %vm622_vm1, %v1350_v22 }
  0x65   :  { %1251 = vmatprep.mubr.msk.bf16.mxu1 %vm1355_vm0, %v1354_v38 }
  0x6a   :  { %847 = vmatmul.mubr.bf16.gmra.mrb[36].mxu0 %v1010_v23 }
  0x6c   :  { %1252 = vmatmul.mubr.msk.bf16.gmra.mrb[36].mxu1 %vm622_vm1, %v1353_v24 }
  0xf5   :  { %v1102_v25 = vpop.f32.mrb[0].mxu0 }
  0xf6   :  { %v1103_v27 = vpop.f32.mrb[1].mxu0 }
  0xf7   :  { %v1104_v28 = vadd.f32 %v1103_v27, %v1102_v25  ;;  %v1105_v29 = vpop.f32.mrb[2].mxu0  ;;  %v1148_v30 = vpop.f32.mrb[0].mxu1 }
  0xf8   :  { %v1106_v31 = vpop.f32.mrb[3].mxu0  ;;  %v1149_v34 = vpop.f32.mrb[1].mxu1 }
  0xf9   :  { %v673_v32 = vadd.f32 %v1104_v28, %v1642_v26  ;;  %v1107_v33 = vadd.f32 %v1106_v31, %v1105_v29  ;;  %v1150_v35 = vadd.f32 %v1149_v34, %v1148_v30  ;;  %v1151_v36 = vpop.f32.mrb[2].mxu1 }
  0xfa   :  { %v1152_v38 = vpop.f32.mrb[3].mxu1 }
  0xfb   :  { %v676_v37 = vadd.f32 %v1107_v33, %v1642_v26  ;;  %v1646_v39 = vadd.f32 %v1150_v35, %v673_v32  ;;  %v1153_v40 = vadd.f32 %v1152_v38, %v1151_v36 }
  0xfd   :  { %v1108_v41 = vpop.f32.mrb[4].mxu0  ;;  %v1648_v42 = vadd.f32 %v1153_v40, %v676_v37 }
  0xfe   :  { %v1109_v43 = vpop.f32.mrb[5].mxu0 }
  0xff   :  { %v1110_v44 = vadd.f32 %v1109_v43, %v1108_v41  ;;  %v1111_v45 = vpop.f32.mrb[6].mxu0  ;;  %v1154_v46 = vpop.f32.mrb[4].mxu1 }
 0x100   :  { %v1112_v47 = vpop.f32.mrb[7].mxu0  ;;  %v1155_v50 = vpop.f32.mrb[5].mxu1 }
 0x101   :  { %v681_v48 = vadd.f32 %v1110_v44, %v1642_v26  ;;  %v1113_v49 = vadd.f32 %v1112_v47, %v1111_v45  ;;  %v1156_v51 = vadd.f32 %v1155_v50, %v1154_v46  ;;  %v1157_v52 = vpop.f32.mrb[6].mxu1 }
 0x102   :  { %v1158_v54 = vpop.f32.mrb[7].mxu1 }
 0x103   :  { %v684_v53 = vadd.f32 %v1113_v49, %v1642_v26  ;;  %v1652_v55 = vadd.f32 %v1156_v51, %v681_v48  ;;  %v1159_v56 = vadd.f32 %v1158_v54, %v1157_v52 }
 0x105   :  { %v1114_v57 = vpop.f32.mrb[8].mxu0  ;;  %v1654_v58 = vadd.f32 %v1159_v56, %v684_v53 }
 0x106   :  { %v1115_v59 = vpop.f32.mrb[9].mxu0 }
 0x107   :  { %v1116_v60 = vadd.f32 %v1115_v59, %v1114_v57  ;;  %v1117_v61 = vpop.f32.mrb[10].mxu0  ;;  %v1160_v62 = vpop.f32.mrb[8].mxu1 }
 0x108   :  { %v1118_v63 = vpop.f32.mrb[11].mxu0  ;;  %v1161_v2 = vpop.f32.mrb[9].mxu1 }
 0x109   :  { %v689_v0 = vadd.f32 %v1116_v60, %v1642_v26  ;;  %v1119_v1 = vadd.f32 %v1118_v63, %v1117_v61  ;;  %v1162_v3 = vadd.f32 %v1161_v2, %v1160_v62  ;;  %v1163_v4 = vpop.f32.mrb[10].mxu1 }
 0x10a   :  { %v1164_v6 = vpop.f32.mrb[11].mxu1 }
 0x10b   :  { %v692_v5 = vadd.f32 %v1119_v1, %v1642_v26  ;;  %v1658_v7 = vadd.f32 %v1162_v3, %v689_v0  ;;  %v1165_v8 = vadd.f32 %v1164_v6, %v1163_v4 }
 0x10d   :  { %v1120_v9 = vpop.f32.mrb[12].mxu0  ;;  %v1660_v10 = vadd.f32 %v1165_v8, %v692_v5 }
 0x10e   :  { %v1121_v11 = vpop.f32.mrb[13].mxu0 }
 0x10f   :  { %v1122_v12 = vadd.f32 %v1121_v11, %v1120_v9  ;;  %v1123_v13 = vpop.f32.mrb[14].mxu0  ;;  %v1166_v14 = vpop.f32.mrb[12].mxu1 }
 0x110   :  { %v1124_v15 = vpop.f32.mrb[15].mxu0  ;;  %v1167_v18 = vpop.f32.mrb[13].mxu1 }
 0x111   :  { %v697_v16 = vadd.f32 %v1122_v12, %v1642_v26  ;;  %v1125_v17 = vadd.f32 %v1124_v15, %v1123_v13  ;;  %v1168_v19 = vadd.f32 %v1167_v18, %v1166_v14  ;;  %v1169_v20 = vpop.f32.mrb[14].mxu1 }
 0x112   :  { %v1170_v22 = vpop.f32.mrb[15].mxu1 }
 0x113   :  { %v700_v21 = vadd.f32 %v1125_v17, %v1642_v26  ;;  %v1664_v23 = vadd.f32 %v1168_v19, %v697_v16  ;;  %v1171_v24 = vadd.f32 %v1170_v22, %v1169_v20 }
 0x115   :  { %v1126_v25 = vpop.f32.mrb[16].mxu0  ;;  %v1666_v27 = vadd.f32 %v1171_v24, %v700_v21 }
 0x116   :  { %v1127_v28 = vpop.f32.mrb[17].mxu0 }
 0x117   :  { %v1128_v29 = vadd.f32 %v1127_v28, %v1126_v25  ;;  %v1129_v30 = vpop.f32.mrb[18].mxu0  ;;  %v1172_v31 = vpop.f32.mrb[16].mxu1 }
 0x118   :  { %v1130_v32 = vpop.f32.mrb[19].mxu0  ;;  %v1173_v34 = vpop.f32.mrb[17].mxu1 }
 0x119   :  { %v705_v33 = vadd.f32 %v1128_v29, %v1642_v26  ;;  %v1174_v35 = vadd.f32 %v1173_v34, %v1172_v31  ;;  %v1175_v36 = vpop.f32.mrb[18].mxu1 }
 0x11a   :  { %v1176_v37 = vpop.f32.mrb[19].mxu1 }
 0x11b   :  { %v1669_v38 = vadd.f32 %v1174_v35, %v705_v33 }
 0x11d   :  { %v1194_v40 = vpop.f32.mrb[20].mxu0 }
 0x11e   :  { %v1195_v41 = vpop.f32.mrb[21].mxu0 }
 0x11f   :  { %v1196_v43 = vadd.f32 %v1195_v41, %v1194_v40  ;;  %v1197_v44 = vpop.f32.mrb[22].mxu0  ;;  %v888_v46 = vpop.f32.mrb[20].mxu1 }
 0x120   :  { %v1198_v45 = vpop.f32.mrb[23].mxu0  ;;  %v1237_v49 = vpop.f32.mrb[21].mxu1 }
 0x121   :  { %v1199_v47 = vadd.f32 %v1198_v45, %v1197_v44  ;;  %v817_v48 = vadd.f32 %v1196_v43, %v1646_v39  ;;  %v891_v50 = vpop.f32.mrb[22].mxu1 }
 0x122   :  { %v1238_v52 = vpop.f32.mrb[23].mxu1 }
 0x123   :  { %v889_v51 = vadd.f32 %v888_v46, %v817_v48  ;;  %v820_v26 = vadd.f32 %v1199_v47, %v1648_v42 }
 0x125   :  { %v1077_v53 = vpack.c.bf16 %v889_v51, %v889_v51  ;;  %v892_v54 = vadd.f32 %v891_v50, %v820_v26  ;;  %v1200_v56 = vpop.f32.mrb[24].mxu0 }
 0x126   :  { %v1201_v57 = vpop.f32.mrb[25].mxu0 }
 0x127   :  { %964 = vst.msk [vmem:[%s1719_s3] sm:$0xf] %vm963_vm2, %v1077_v53  ;;  %v1078_v59 = vpack.c.bf16 %v892_v54, %v892_v54  ;;  %v1202_v60 = vadd.f32 %v1201_v57, %v1200_v56  ;;  %v1203_v61 = vpop.f32.mrb[26].mxu0  ;;  %v896_v62 = vpop.f32.mrb[24].mxu1 }
 0x128   :  { %v1204_v39 = vpop.f32.mrb[27].mxu0  ;;  %v1241_v0 = vpop.f32.mrb[25].mxu1 }
 0x129   :  { %965 = vst.msk [vmem:[%s1719_s3 + $0x4] sm:$0xf] %vm963_vm2, %v1078_v59  ;;  %v1205_v42 = vadd.f32 %v1204_v39, %v1203_v61  ;;  %v825_v63 = vadd.f32 %v1202_v60, %v1652_v55  ;;  %v899_v1 = vpop.f32.mrb[26].mxu1 }
 0x12a   :  { %v1242_v4 = vpop.f32.mrb[27].mxu1 }
 0x12b   :  { %v897_v2 = vadd.f32 %v896_v62, %v825_v63  ;;  %v828_v3 = vadd.f32 %v1205_v42, %v1654_v58 }
 0x12d   :  { %v1079_v5 = vpack.c.bf16 %v897_v2, %v897_v2  ;;  %v900_v6 = vadd.f32 %v899_v1, %v828_v3  ;;  %v1206_v8 = vpop.f32.mrb[28].mxu0 }
 0x12e   :  { %v1207_v9 = vpop.f32.mrb[29].mxu0 }
 0x12f   :  { %966 = vst.msk [vmem:[%s1719_s3 + $0x8] sm:$0xf] %vm963_vm2, %v1079_v5  ;;  %v1080_v11 = vpack.c.bf16 %v900_v6, %v900_v6  ;;  %v1208_v12 = vadd.f32 %v1207_v9, %v1206_v8  ;;  %v1209_v13 = vpop.f32.mrb[30].mxu0  ;;  %v904_v55 = vpop.f32.mrb[28].mxu1 }
 0x130   :  { %v1210_v14 = vpop.f32.mrb[31].mxu0  ;;  %v1245_v16 = vpop.f32.mrb[29].mxu1 }
 0x131   :  { %967 = vst.msk [vmem:[%s1719_s3 + $0xc] sm:$0xf] %vm963_vm2, %v1080_v11  ;;  %v1211_v58 = vadd.f32 %v1210_v14, %v1209_v13  ;;  %v833_v15 = vadd.f32 %v1208_v12, %v1658_v7  ;;  %v907_v17 = vpop.f32.mrb[30].mxu1 }
 0x132   :  { %v1246_v20 = vpop.f32.mrb[31].mxu1 }
 0x133   :  { %v905_v18 = vadd.f32 %v904_v55, %v833_v15  ;;  %v836_v19 = vadd.f32 %v1211_v58, %v1660_v10 }
 0x135   :  { %v1081_v21 = vpack.c.bf16 %v905_v18, %v905_v18  ;;  %v908_v22 = vadd.f32 %v907_v17, %v836_v19  ;;  %v1212_v24 = vpop.f32.mrb[32].mxu0 }
 0x136   :  { %v1213_v25 = vpop.f32.mrb[33].mxu0 }
 0x137   :  { %968 = vst.msk [vmem:[%s1719_s3 + $0x10] sm:$0xf] %vm963_vm2, %v1081_v21  ;;  %v1082_v28 = vpack.c.bf16 %v908_v22, %v908_v22  ;;  %v1214_v29 = vadd.f32 %v1213_v25, %v1212_v24  ;;  %v1215_v30 = vpop.f32.mrb[34].mxu0  ;;  %v912_v7 = vpop.f32.mrb[32].mxu1 }
 0x138   :  { %v1216_v31 = vpop.f32.mrb[35].mxu0  ;;  %v1249_v33 = vpop.f32.mrb[33].mxu1 }
 0x139   :  { %969 = vst.msk [vmem:[%s1719_s3 + $0x14] sm:$0xf] %vm963_vm2, %v1082_v28  ;;  %v1217_v10 = vadd.f32 %v1216_v31, %v1215_v30  ;;  %v841_v32 = vadd.f32 %v1214_v29, %v1664_v23  ;;  %v915_v34 = vpop.f32.mrb[34].mxu1 }
 0x13a   :  { %v1250_v37 = vpop.f32.mrb[35].mxu1 }
 0x13b   :  { %v913_v35 = vadd.f32 %v912_v7, %v841_v32  ;;  %v844_v36 = vadd.f32 %v1217_v10, %v1666_v27 }
 0x13d   :  { %v1083_v40 = vpack.c.bf16 %v913_v35, %v913_v35  ;;  %v916_v41 = vadd.f32 %v915_v34, %v844_v36  ;;  %v1218_v43 = vpop.f32.mrb[36].mxu0 }
 0x13e   :  { %v1219_v44 = vpop.f32.mrb[37].mxu0 }
 0x13f   :  { %970 = vst.msk [vmem:[%s1719_s3 + $0x18] sm:$0xf] %vm963_vm2, %v1083_v40  ;;  %v1084_v45 = vpack.c.bf16 %v916_v41, %v916_v41  ;;  %v1220_v46 = vadd.f32 %v1219_v44, %v1218_v43  ;;  %v1221_v47 = vpop.f32.mrb[38].mxu0  ;;  %v920_v23 = vpop.f32.mrb[36].mxu1 }
 0x140   :  { %v1222_v48 = vpop.f32.mrb[39].mxu0  ;;  %v1253_v49 = vpop.f32.mrb[37].mxu1 }
 0x141   :  { %971 = vst.msk [vmem:[%s1719_s3 + $0x1c] sm:$0xf] %vm963_vm2, %v1084_v45  ;;  %v849_v27 = vadd.f32 %v1220_v46, %v1669_v38  ;;  %v923_v50 = vpop.f32.mrb[38].mxu1 }
 0x142   :  { %v1254_v26 = vpop.f32.mrb[39].mxu1 }
 0x143   :  { %v921_v51 = vadd.f32 %v920_v23, %v849_v27 }
 0x145   :  { %v1085_v52 = vpack.c.bf16 %v921_v51, %v921_v51 }
 0x147   :  { %972 = vst.msk [vmem:[%s1719_s3 + $0x20] sm:$0xf] %vm963_vm2, %v1085_v52 }

// kernel: _lambda_.11
= control target key start
LH: loop header
LB: loop body
LE: loop exit
PB: predicated region body
PF: predicated region fallthrough
CT: control target
= control target key end

     0   :  { %v97_v32 = vlaneseq  ;;  %v1066_v33 = vmov 1966171168   ;;  %s1452_s0 = inlined_call_operand.vmem [shape: bf16[2,576], index: 0, kind: input, shape index: {}]   ;;  %s1453_s1 = inlined_call_operand.vmem [shape: bf16[576,256], index: 1, kind: input, shape index: {}]   ;;  %s1454_s2 = inlined_call_operand.vmem [shape: f32[1,256], index: 2, kind: input, shape index: {}]   ;;  %s1455_s3 = inlined_call_operand.vmem [shape: f32[256,10], index: 3, kind: input, shape index: {}]   ;;  %s1456_s4 = inlined_call_operand.vmem [shape: f32[1,10], index: 4, kind: input, shape index: {}]   ;;  %s1457_s5 = inlined_call_operand.hbm [shape: f32[2,10], index: 5, kind: output, shape index: {}]  }
   0x1   :  { %v929_v0 = vld [vmem:[%s1453_s1 + $0x104] ss:$8 sps:$4 sm:$0xff]   ;;  %v931_v1 = vld [vmem:[%s1453_s1 + $0x100] ss:$8 sps:$4 sm:$0xff]   ;;  %v932_v2 = vld [vmem:[%s1453_s1 + $0x114] ss:$8 sps:$4 sm:$0xff]   ;;  %v110_v34 = vunpack.c.l.s4 %v1066_v33 }
   0x2   :  { %556 = vmatprep.subr.bf16.mxu0 %v929_v0  ;;  %v934_v3 = vld [vmem:[%s1453_s1 + $0x110] ss:$8 sps:$4 sm:$0xff]   ;;  %v935_v4 = vld [vmem:[%s1453_s1 + $0x124] ss:$8 sps:$4 sm:$0xff]   ;;  %v940_v6 = vld [vmem:[%s1453_s1] ss:$8 sps:$4 sm:$0xff]  }
   0x3   :  { %557 = vmatpush1.bf16.msra.mxu0 %v931_v1  ;;  %v938_v5 = vld [vmem:[%s1453_s1 + $0x4] ss:$8 sps:$4 sm:$0xff]   ;;  %v937_v7 = vld [vmem:[%s1453_s1 + $0x120] ss:$8 sps:$4 sm:$0xff]   ;;  %v944_v8 = vld [vmem:[%s1453_s1 + $0x14] ss:$8 sps:$4 sm:$0xff]   ;;  %v111_v40 = vunpack.c.0.s8 %v110_v34 }
   0x4   :  { %558 = vmatprep.subr.bf16.mxu0 %v932_v2  ;;  %515 = vmatprep.subr.bf16.mxu1 %v938_v5  ;;  %v946_v9 = vld [vmem:[%s1453_s1 + $0x10] ss:$8 sps:$4 sm:$0xff]   ;;  %v941_v10 = vld [vmem:[%s1453_s1 + $0x134] ss:$8 sps:$4 sm:$0xff]   ;;  %v950_v12 = vld [vmem:[%s1453_s1 + $0x24] ss:$8 sps:$4 sm:$0xff]  }
   0x5   :  { %516 = vmatpush1.bf16.msra.mxu1 %v940_v6  ;;  %v943_v11 = vld [vmem:[%s1453_s1 + $0x130] ss:$8 sps:$4 sm:$0xff]   ;;  %v947_v13 = vld [vmem:[%s1453_s1 + $0x144] ss:$8 sps:$4 sm:$0xff]   ;;  %v952_v14 = vld [vmem:[%s1453_s1 + $0x20] ss:$8 sps:$4 sm:$0xff]  }
   0x6   :  { %517 = vmatprep.subr.bf16.mxu1 %v944_v8  ;;  %v956_v15 = vld [vmem:[%s1453_s1 + $0x34] ss:$8 sps:$4 sm:$0xff]   ;;  %v949_v16 = vld [vmem:[%s1453_s1 + $0x140] ss:$8 sps:$4 sm:$0xff]   ;;  %v958_v18 = vld [vmem:[%s1453_s1 + $0x30] ss:$8 sps:$4 sm:$0xff]  }
   0x7   :  { %559 = vmatpush1.bf16.msra.mxu0 %v934_v3  ;;  %v953_v17 = vld [vmem:[%s1453_s1 + $0x154] ss:$8 sps:$4 sm:$0xff]   ;;  %v962_v19 = vld [vmem:[%s1453_s1 + $0x44] ss:$8 sps:$4 sm:$0xff]   ;;  %v955_v20 = vld [vmem:[%s1453_s1 + $0x150] ss:$8 sps:$4 sm:$0xff]  }
   0x8   :  { %560 = vmatprep.subr.bf16.mxu0 %v935_v4  ;;  %v959_v21 = vld [vmem:[%s1453_s1 + $0x164] ss:$8 sps:$4 sm:$0xff]   ;;  %v964_v22 = vld [vmem:[%s1453_s1 + $0x40] ss:$8 sps:$4 sm:$0xff]   ;;  %v968_v23 = vld [vmem:[%s1453_s1 + $0x54] ss:$8 sps:$4 sm:$0xff]  }
   0x9   :  { %518 = vmatpush1.bf16.msra.mxu1 %v946_v9  ;;  %v961_v24 = vld [vmem:[%s1453_s1 + $0x160] ss:$8 sps:$4 sm:$0xff]   ;;  %v965_v25 = vld [vmem:[%s1453_s1 + $0x174] ss:$8 sps:$4 sm:$0xff]   ;;  %v970_v26 = vld [vmem:[%s1453_s1 + $0x50] ss:$8 sps:$4 sm:$0xff]  }
   0xa   :  { %519 = vmatprep.subr.bf16.mxu1 %v950_v12  ;;  %v974_v27 = vld [vmem:[%s1453_s1 + $0x64] ss:$8 sps:$4 sm:$0xff]   ;;  %v967_v28 = vld [vmem:[%s1453_s1 + $0x170] ss:$8 sps:$4 sm:$0xff]   ;;  %v976_v30 = vld [vmem:[%s1453_s1 + $0x60] ss:$8 sps:$4 sm:$0xff]  }
   0xb   :  { %561 = vmatpush1.bf16.msra.mxu0 %v937_v7  ;;  %v971_v29 = vld [vmem:[%s1453_s1 + $0x184] ss:$8 sps:$4 sm:$0xff]   ;;  %v980_v31 = vld [vmem:[%s1453_s1 + $0x74] ss:$8 sps:$4 sm:$0xff]   ;;  %v973_v35 = vld [vmem:[%s1453_s1 + $0x180] ss:$8 sps:$4 sm:$0xff]  }
   0xc   :  { %562 = vmatprep.subr.bf16.mxu0 %v941_v10  ;;  %v977_v36 = vld [vmem:[%s1453_s1 + $0x194] ss:$8 sps:$4 sm:$0xff]   ;;  %v982_v37 = vld [vmem:[%s1453_s1 + $0x70] ss:$8 sps:$4 sm:$0xff]   ;;  %v986_v38 = vld [vmem:[%s1453_s1 + $0x84] ss:$8 sps:$4 sm:$0xff]  }
   0xd   :  { %520 = vmatpush1.bf16.msra.mxu1 %v952_v14  ;;  %v1207_v39 = vshrl.u32 %v97_v32, 7  ;;  %v979_v41 = vld [vmem:[%s1453_s1 + $0x190] ss:$8 sps:$4 sm:$0xff]   ;;  %v983_v42 = vld [vmem:[%s1453_s1 + $0x1a4] ss:$8 sps:$4 sm:$0xff]  }
   0xe   :  { %521 = vmatprep.subr.bf16.mxu1 %v956_v15  ;;  %v988_v43 = vld [vmem:[%s1453_s1 + $0x80] ss:$8 sps:$4 sm:$0xff]   ;;  %v992_v44 = vld [vmem:[%s1453_s1 + $0x94] ss:$8 sps:$4 sm:$0xff]   ;;  %v994_v48 = vld [vmem:[%s1453_s1 + $0x90] ss:$8 sps:$4 sm:$0xff]  }
   0xf   :  { %563 = vmatpush1.bf16.msra.mxu0 %v943_v11  ;;  %v1222_v45 = vsub.s32 %v111_v40, %v1207_v39  ;;  %v985_v46 = vld [vmem:[%s1453_s1 + $0x1a0] ss:$8 sps:$4 sm:$0xff]   ;;  %v989_v47 = vld [vmem:[%s1453_s1 + $0x1b4] ss:$8 sps:$4 sm:$0xff]   ;;  %v998_v49 = vld [vmem:[%s1453_s1 + $0xa4] ss:$8 sps:$4 sm:$0xff]  }
  0x10   :  { %564 = vmatprep.subr.bf16.mxu0 %v947_v13  ;;  %v1239_v50 = vld [vmem:[%s1452_s0] sm:$0x1f]  ;;  %v991_v52 = vld [vmem:[%s1453_s1 + $0x1b0] ss:$8 sps:$4 sm:$0xff]   ;;  %v1004_v56 = vld [vmem:[%s1453_s1 + $0xb4] ss:$8 sps:$4 sm:$0xff]  }
  0x11   :  { %522 = vmatpush1.bf16.msra.mxu1 %v958_v18  ;;  %v115_v51 = vrot.slane %v1239_v50, %v1222_v45  ;;  %v995_v53 = vld [vmem:[%s1453_s1 + $0x1c4] ss:$8 sps:$4 sm:$0xff]   ;;  %v1000_v54 = vld [vmem:[%s1453_s1 + $0xa0] ss:$8 sps:$4 sm:$0xff]   ;;  %v1006_v59 = vld [vmem:[%s1453_s1 + $0xb0] ss:$8 sps:$4 sm:$0xff]  }
  0x12   :  { %523 = vmatprep.subr.bf16.mxu1 %v962_v19  ;;  %v997_v58 = vld [vmem:[%s1453_s1 + $0x1c0] ss:$8 sps:$4 sm:$0xff]   ;;  %v1001_v61 = vld [vmem:[%s1453_s1 + $0x1d4] ss:$8 sps:$4 sm:$0xff]   ;;  %v1010_v62 = vld [vmem:[%s1453_s1 + $0xc4] ss:$8 sps:$4 sm:$0xff]  }
  0x13   :  { %565 = vmatpush1.bf16.msra.mxu0 %v949_v16  ;;  %v123_v55 = vcombine.high %v115_v51, %v115_v51  ;;  %v1003_v63 = vld [vmem:[%s1453_s1 + $0x1d0] ss:$8 sps:$4 sm:$0xff]   ;;  %v1012_v0 = vld [vmem:[%s1453_s1 + $0xc0] ss:$8 sps:$4 sm:$0xff]   ;;  %v1007_v1 = vld [vmem:[%s1453_s1 + $0x1e4] ss:$8 sps:$4 sm:$0xff]  }
  0x14   :  { %566 = vmatprep.subr.bf16.mxu0 %v953_v17  ;;  %v1016_v2 = vld [vmem:[%s1453_s1 + $0xd4] ss:$8 sps:$4 sm:$0xff]   ;;  %v1009_v3 = vld [vmem:[%s1453_s1 + $0x1e0] ss:$8 sps:$4 sm:$0xff]   ;;  %v1018_v4 = vld [vmem:[%s1453_s1 + $0xd0] ss:$8 sps:$4 sm:$0xff]  }
  0x15   :  { %524 = vmatpush1.bf16.msra.mxu1 %v964_v22  ;;  %v144_v57 = vrot.slane %v123_v55, %v1222_v45 }
  0x16   :  { %525 = vmatprep.subr.bf16.mxu1 %v968_v23 }
  0x17   :  { %567 = vmatpush1.bf16.msra.mxu0 %v955_v20  ;;  %v146_v60 = vcombine.high %v144_v57, %v144_v57  ;;  %547 = vmatprep.mubr.bf16.mxu1 %v144_v57 }
  0x18   :  { %568 = vmatprep.subr.bf16.mxu0 %v959_v21 }
  0x19   :  { %526 = vmatpush1.bf16.msra.mxu1 %v970_v26  ;;  %588 = vmatprep.mubr.bf16.mxu0 %v146_v60 }
  0x1a   :  { %527 = vmatprep.subr.bf16.mxu1 %v974_v27 }
  0x1b   :  { %569 = vmatpush1.bf16.msra.mxu0 %v961_v24 }
  0x1c   :  { %570 = vmatprep.subr.bf16.mxu0 %v965_v25 }
  0x1d   :  { %528 = vmatpush1.bf16.msra.mxu1 %v976_v30 }
  0x1e   :  { %529 = vmatprep.subr.bf16.mxu1 %v980_v31 }
  0x1f   :  { %571 = vmatpush1.bf16.msra.mxu0 %v967_v28 }
  0x20   :  { %572 = vmatprep.subr.bf16.mxu0 %v971_v29 }
  0x21   :  { %530 = vmatpush1.bf16.msra.mxu1 %v982_v37 }
  0x22   :  { %531 = vmatprep.subr.bf16.mxu1 %v986_v38 }
  0x23   :  { %573 = vmatpush1.bf16.msra.mxu0 %v973_v35 }
  0x24   :  { %574 = vmatprep.subr.bf16.mxu0 %v977_v36 }
  0x25   :  { %532 = vmatpush1.bf16.msra.mxu1 %v988_v43 }
  0x26   :  { %533 = vmatprep.subr.bf16.mxu1 %v992_v44 }
  0x27   :  { %575 = vmatpush1.bf16.msra.mxu0 %v979_v41 }
  0x28   :  { %576 = vmatprep.subr.bf16.mxu0 %v983_v42 }
  0x29   :  { %534 = vmatpush1.bf16.msra.mxu1 %v994_v48 }
  0x2a   :  { %535 = vmatprep.subr.bf16.mxu1 %v998_v49 }
  0x2b   :  { %577 = vmatpush1.bf16.msra.mxu0 %v985_v46 }
  0x2c   :  { %578 = vmatprep.subr.bf16.mxu0 %v989_v47 }
  0x2d   :  { %536 = vmatpush1.bf16.msra.mxu1 %v1000_v54 }
  0x2e   :  { %537 = vmatprep.subr.bf16.mxu1 %v1004_v56 }
  0x2f   :  { %579 = vmatpush1.bf16.msra.mxu0 %v991_v52 }
  0x30   :  { %580 = vmatprep.subr.bf16.mxu0 %v995_v53 }
  0x31   :  { %538 = vmatpush1.bf16.msra.mxu1 %v1006_v59 }
  0x32   :  { %539 = vmatprep.subr.bf16.mxu1 %v1010_v62 }
  0x33   :  { %581 = vmatpush1.bf16.msra.mxu0 %v997_v58 }
  0x34   :  { %582 = vmatprep.subr.bf16.mxu0 %v1001_v61 }
  0x35   :  { %540 = vmatpush1.bf16.msra.mxu1 %v1012_v0 }
  0x37   :  { %583 = vmatpush1.bf16.msra.mxu0 %v1003_v63 }
  0x38   :  { %10 = vsyncpa [#allocation3], 0  ;;  %584 = vmatprep.subr.bf16.mxu0 %v1007_v1  ;;  %v1013_v5 = vld [vmem:[%s1453_s1 + $0x1f4] ss:$8 sps:$4 sm:$0xff]   ;;  %541 = vmatprep.subr.bf16.mxu1 %v1016_v2  ;;  %v1023_v6 = vld [vmem:[%s1453_s1 + $0xe4] ss:$8 sps:$4 sm:$0xff]   ;;  %v130_v7 = vrot.slane %v115_v51, %v1222_v45  ;;  %v108_v32 = vcombine.high %v1239_v50, %v1239_v50 }
  0x39   :  { %v1015_v8 = vld [vmem:[%s1453_s1 + $0x1f0] ss:$8 sps:$4 sm:$0xff]   ;;  %542 = vmatpush1.bf16.msra.mxu1 %v1018_v4  ;;  %v1025_v9 = vld [vmem:[%s1453_s1 + $0xe0] ss:$8 sps:$4 sm:$0xff]   ;;  %v1022_v10 = vld [vmem:[%s1453_s1 + $0x204] ss:$8 sps:$4 sm:$0xff]  }
  0x3a   :  { %543 = vmatprep.subr.bf16.mxu1 %v1023_v6  ;;  %v1029_v11 = vld [vmem:[%s1453_s1 + $0xf4] ss:$8 sps:$4 sm:$0xff]   ;;  %v145_v12 = vcombine.high %v130_v7, %v130_v7  ;;  %v656_v13 = vld [vmem:[%s1455_s3 + $0x80] sm:$0xff]  ;;  %v657_v14 = vld [vmem:[%s1455_s3 + $0x88] sm:$0xff]  ;;  %v1067_v26 = vmov 0   ;;  %v122_v42 = vrot.slane %v108_v32, %v1222_v45  ;;  %vm511_vm0 = vcmask 523264  }
  0x3b   :  { %585 = vmatpush1.bf16.msra.mxu0 %v1009_v3  ;;  %v1020_v15 = vld [vmem:[%s1453_s1 + $0x200] ss:$8 sps:$4 sm:$0xff]   ;;  %v1031_v16 = vld [vmem:[%s1453_s1 + $0xf0] ss:$8 sps:$4 sm:$0xff]   ;;  %v1028_v17 = vld [vmem:[%s1453_s1 + $0x214] ss:$8 sps:$4 sm:$0xff]   ;;  %v886_v20 = vpack.c.bf16 %v657_v14, %v656_v13 }
  0x3c   :  { %586 = vmatprep.subr.bf16.mxu0 %v1013_v5  ;;  %v640_v18 = vld [vmem:[%s1455_s3] sm:$0xff]  ;;  %v641_v19 = vld [vmem:[%s1455_s3 + $0x8] sm:$0xff]  ;;  %v658_v21 = vld [vmem:[%s1455_s3 + $0x90] sm:$0xff]  ;;  %v137_v51 = vrot.slane %v122_v42, %v1222_v45  ;;  %v103_v14 = vsub.s32 1, %v1207_v39  ;;  %vm749_vm1 = vcmask 74752   ;;  %s1068_s23 = smov [#allocation2]  }
  0x3d   :  { %544 = vmatpush1.bf16.msra.mxu1 %v1025_v9  ;;  %v659_v22 = vld [vmem:[%s1455_s3 + $0x98] sm:$0xff]  ;;  %v888_v24 = vpack.c.bf16 %v641_v19, %v640_v18  ;;  %v1034_v25 = vld [vmem:[%s1453_s1 + $0x224] ss:$8 sps:$4 sm:$0xff]   ;;  %v642_v28 = vld [vmem:[%s1455_s3 + $0x10] sm:$0xff]  ;;  %s769_s24 = sshll.u32 %s1068_s23, 4  ;;  %s770_s24 = int_to_ptr.vmem [resolvable:$true] %s769_s24 }
  0x3e   :  { %545 = vmatprep.subr.bf16.mxu1 %v1029_v11  ;;  %v1026_v23 = vld [vmem:[%s1453_s1 + $0x210] ss:$8 sps:$4 sm:$0xff]   ;;  %v890_v27 = vpack.c.bf16 %v659_v22, %v658_v21  ;;  %v660_v30 = vld [vmem:[%s1455_s3 + $0xa0] sm:$0xff]  ;;  %v661_v31 = vld [vmem:[%s1455_s3 + $0xa8] sm:$0xff]  ;;  %v99_v11 = vsub.s32 0, %v1207_v39  ;;  %p1047_p1 = scmp.lt.s32.totalorder %s770_s24, %s770_s24 }
  0x3f   :  { %587 = vmatpush1.bf16.msra.mxu0 %v1015_v8  ;;  %v643_v29 = vld [vmem:[%s1455_s3 + $0x18] sm:$0xff]  ;;  %v1032_v33 = vld [vmem:[%s1453_s1 + $0x220] ss:$8 sps:$4 sm:$0xff]   ;;  %v894_v36 = vpack.c.bf16 %v661_v31, %v660_v30  ;;  %v662_v40 = vld [vmem:[%s1455_s3 + $0xb0] sm:$0xff] }
  0x40   :  { %597 = vmatprep.subr.bf16.mxu0 %v1022_v10  ;;  %v892_v34 = vpack.c.bf16 %v643_v29, %v642_v28  ;;  %v1037_v35 = vld [vmem:[%s1453_s1 + $0x234] ss:$8 sps:$4 sm:$0xff]   ;;  %v644_v37 = vld [vmem:[%s1455_s3 + $0x20] sm:$0xff]  ;;  %v645_v38 = vld [vmem:[%s1455_s3 + $0x28] sm:$0xff] }
  0x41   :  { %546 = vmatpush1.bf16.msra.mxu1 %v1031_v16  ;;  %v663_v41 = vld [vmem:[%s1455_s3 + $0xb8] sm:$0xff]  ;;  %v896_v44 = vpack.c.bf16 %v645_v38, %v644_v37  ;;  %v646_v47 = vld [vmem:[%s1455_s3 + $0x30] sm:$0xff]  ;;  %v664_v49 = vld [vmem:[%s1455_s3 + $0xc0] sm:$0xff] }
  0x42   :  { %589 = vmatmul.mubr.bf16.vlgmr.msra.gmra.mrb[0].mxu0 %v145_v12  ;;  %887 = vmatprep.subr.bf16.mxu1 %v886_v20  ;;  %v1035_v43 = vld [vmem:[%s1453_s1 + $0x230] ss:$8 sps:$4 sm:$0xff]   ;;  %v898_v46 = vpack.c.bf16 %v663_v41, %v662_v40  ;;  %v665_v50 = vld [vmem:[%s1455_s3 + $0xc8] sm:$0xff]  ;;  %v648_v54 = vld [vmem:[%s1455_s3 + $0x40] sm:$0xff] }
  0x43   :  { %598 = vmatpush1.bf16.msra.mxu0 %v1020_v15  ;;  %629 = vmatprep.mubr.bf16.mxu0 %v1067_v26  ;;  %v647_v48 = vld [vmem:[%s1455_s3 + $0x38] sm:$0xff]  ;;  %v902_v53 = vpack.c.bf16 %v665_v50, %v664_v49  ;;  %v649_v55 = vld [vmem:[%s1455_s3 + $0x48] sm:$0xff]  ;;  %v666_v45 = vld [vmem:[%s1455_s3 + $0xd0] sm:$0xff] }
  0x44   :  { %599 = vmatprep.subr.bf16.mxu0 %v1028_v17  ;;  %548 = vmatmul.mubr.bf16.vlgmr.msra.gmra.mrb[0].mxu1 %v130_v7  ;;  %v900_v52 = vpack.c.bf16 %v647_v48, %v646_v47  ;;  %v904_v56 = vpack.c.bf16 %v649_v55, %v648_v54  ;;  %v667_v57 = vld [vmem:[%s1455_s3 + $0xd8] sm:$0xff]  ;;  %v650_v59 = vld [vmem:[%s1455_s3 + $0x50] sm:$0xff]  ;;  %v668_v62 = vld [vmem:[%s1455_s3 + $0xe0] sm:$0xff] }
  0x45   :  { %889 = vmatpush3.bf16.msra.mxu1 %v888_v24  ;;  %v906_v58 = vpack.c.bf16 %v667_v57, %v666_v45  ;;  %v651_v60 = vld [vmem:[%s1455_s3 + $0x58] sm:$0xff]  ;;  %v669_v63 = vld [vmem:[%s1455_s3 + $0xe8] sm:$0xff]  ;;  %v652_v1 = vld [vmem:[%s1455_s3 + $0x60] sm:$0xff] }
  0x46   :  { %891 = vmatprep.subr.bf16.mxu1 %v890_v27  ;;  %v908_v61 = vpack.c.bf16 %v651_v60, %v650_v59  ;;  %v910_v0 = vpack.c.bf16 %v669_v63, %v668_v62  ;;  %v653_v2 = vld [vmem:[%s1455_s3 + $0x68] sm:$0xff]  ;;  %v670_v4 = vld [vmem:[%s1455_s3 + $0xf0] sm:$0xff]  ;;  %v671_v5 = vld [vmem:[%s1455_s3 + $0xf8] sm:$0xff] }
  0x47   :  { %600 = vmatpush1.bf16.msra.mxu0 %v1026_v23  ;;  %v912_v3 = vpack.c.bf16 %v653_v2, %v652_v1  ;;  %v914_v6 = vpack.c.bf16 %v671_v5, %v670_v4  ;;  %v654_v7 = vld [vmem:[%s1455_s3 + $0x70] sm:$0xff]  ;;  %v655_v8 = vld [vmem:[%s1455_s3 + $0x78] sm:$0xff]  ;;  %v95_v13 = vld [vmem:[%s1454_s2] sm:$0x3] }
  0x48   :  { %601 = vmatprep.subr.bf16.mxu0 %v1034_v25  ;;  %v916_v9 = vpack.c.bf16 %v655_v8, %v654_v7  ;;  %v100_v17 = vrot.slane %v95_v13, %v99_v11  ;;  %v104_v18 = vrot.slane %v95_v13, %v103_v14  ;;  %v850_v39 = vld [vmem:[%s1456_s4] ss:$0 sm:$0xff]  ;;  %s1042_s4 = scalar_lea.vmem %s770_s24, 32 }
  0x49   :  { %893 = vmatpush3.bf16.msra.mxu1 %v892_v34  ;;  %p1043_p0 = scmp.ne.s32.totalorder %s770_s24, %s1042_s4  ;;  %p1048_p2 = scmp.lt.s32.totalorder %s1042_s4, %s1042_s4 }
  0x4a   :  { %895 = vmatprep.subr.bf16.mxu1 %v894_v36 }
  0x4b   :  { %602 = vmatpush1.bf16.msra.mxu0 %v1032_v33  ;;  %p1049_p3 = por %p1048_p2, %p1047_p1 }
  0x4c   :  { %603 = vmatprep.subr.bf16.mxu0 %v1037_v35 }
  0x4d   :  { %897 = vmatpush3.bf16.msra.mxu1 %v896_v44  ;;  %p1050_p4 = pnand %p1049_p3, %p1043_p0 }
  0x4e   :  { %899 = vmatprep.subr.bf16.mxu1 %v898_v46 }
  0x4f   :  { %604 = vmatpush1.bf16.msra.mxu0 %v1035_v43 }
  0x51   :  { %901 = vmatpush3.bf16.msra.mxu1 %v900_v52 }
  0x52   :  { %849 = vmatmul.mubr.msk.bf16.vlgmr.msra.gmra.mrb[0].mxu0 %vm511_vm0, %v137_v51  ;;  %903 = vmatprep.subr.bf16.mxu1 %v902_v53 }
  0x55   :  { %905 = vmatpush3.bf16.msra.mxu1 %v904_v56 }
  0x56   :  { %907 = vmatprep.subr.bf16.mxu1 %v906_v58 }
  0x59   :  { %909 = vmatpush3.bf16.msra.mxu1 %v908_v61 }
  0x5a   :  { %911 = vmatprep.subr.bf16.mxu1 %v910_v0 }
  0x5d   :  { %913 = vmatpush3.bf16.msra.mxu1 %v912_v3 }
  0x5e   :  { %915 = vmatprep.subr.bf16.mxu1 %v914_v6 }
  0x61   :  { %917 = vmatpush3.bf16.msra.mxu1 %v916_v9 }
 0x117   :  { %v549_v10 = vpop.f32.mrb[0].mxu1 }
 0x118   :  { %v551_v12 = vpop.f32.mrb[1].mxu1  ;;  %v550_v19 = vadd.f32 %v549_v10, %v100_v17 }
 0x119   :  { %v553_v15 = vpop.f32.mrb[2].mxu1  ;;  %v552_v20 = vadd.f32 %v551_v12, %v104_v18 }
 0x11a   :  { %v554_v16 = vpop.f32.mrb[3].mxu1 }
 0x125   :  { %v631_v21 = vpop.f32.mrb[0].mxu0 }
 0x126   :  { %v919_v22 = vadd.f32 %v631_v21, %v550_v19  ;;  %v633_v23 = vpop.f32.mrb[1].mxu0 }
 0x127   :  { %v921_v24 = vadd.f32 %v633_v23, %v552_v20  ;;  %v635_v25 = vpop.f32.mrb[2].mxu0 }
 0x128   :  { %v636_v26 = vpop.f32.mrb[3].mxu0  ;;  %v638_v28 = vmax.f32 %v919_v22, 0.0 }
 0x129   :  { %v639_v27 = vmax.f32 %v921_v24, 0.0 }
 0x12b   :  { %743 = vmatprep.mubr.f32.mxu1 %v639_v27 }
 0x12c   :  { %744 = vmatmul.mubr.f32.vlgmr.msra.gmra.mrb[4].mxu1 %v638_v28 }
 0x1ff   :  { %v883_v29 = vpop.f32.mrb[4].mxu1 }
 0x200   :  { %v884_v30 = vpop.f32.mrb[5].mxu1 }
 0x201   :  { %v885_v31 = vadd.f32 %v884_v30, %v883_v29 }
 0x203   :  { %v746_v32 = vadd.f32 %v885_v31, %v850_v39 }
 0x205   :  { %v750_v33 = vsel %vm749_vm1, %v746_v32, -inf }
 0x206   :  { %751 = vmax.xlane.f32.xlu0 %v750_v33 }
 0x293   :  { %v752_v34 = vpop.xlane.xlu0 %751 }
 0x294   :  { %v753_v35 = vsub.f32 %v746_v32, %v752_v34 }
 0x296   :  { %v754_v36 = vmul.f32 1.442695, %v753_v35 }
 0x298   :  { %1038 = vpow2.f32 %v754_v36 }
 0x2a2   :  { %v1039_v37 = vpop.eup %1038 }
 0x2a3   :  { %v756_v38 = vsel %vm749_vm1, %v1039_v37, 0.0 }
 0x2a4   :  { %757 = vadd.xlane.f32.xlu0 %v756_v38 }
 0x331   :  { %v758_v40 = vpop.xlane.xlu0 %757 }
 0x332   :  { %1040 = vlog2.f32 %v758_v40 }
 0x33c   :  { %v1041_v41 = vpop.eup %1040 }
 0x33d   :  { %v760_v42 = vmul.f32 0.6931472, %v1041_v41 }
 0x33f   :  { %v761_v43 = vsub.f32 %v753_v35, %v760_v42 }
 0x341   :  { %762 = vst.msk [vmem:[#allocation2] sm:$0x3] %vm749_vm1, %v761_v43 }
 0x342   :  { %1053 = shalt.err (!%p1050_p4)
}
 0x343   :  { %s1054_s27 = scalar_lea.hbm %s1457_s5, 32 }
 0x344   :  { %p1055_p5 = scmp.ne.s32.totalorder %s1457_s5, %s1054_s27  ;;  %p1058_p6 = scmp.lt.u32.totalorder %s1054_s27, %s1457_s5 }
 0x346   :  { %p1060_p7 = pnand %p1058_p6, %p1055_p5 }
 0x348   :  { %1063 = shalt.err (!%p1060_p7)
}
 0x349   :  { %772 = dma.vmem_to_hbm [thread:$0]  %s770_s24, 32, %s1457_s5, [#allocation3]  }
 0x34a   :  { %1064 = dma.done.wait [#allocation3], 32  }
 0x34b   :  { %1065 = vsyncadd [#allocation3], 4294967264 }
 0x34c   :  { %776 = vsyncpa [#allocation3], 1 }

</bundles_post_ra>
